<compile_context>
chip_gen: v7x
topology: tpu7x:2x2x1
jax: 0.10.0
libtpu: 0.0.40
codegen_flags: <defaults>
</compile_context>

<pallas_src>
import functools

import jax
import jax.numpy as jnp
from jax.experimental import pallas as pl
from jax.experimental.pallas import tpu as pltpu

# f32-accurate matmuls for the pure-JAX reference used in the self-check.
jax.config.update("jax_default_matmul_precision", "highest")

K_HOPS = 2        # TAGConv default number of hops
NUM_LAYERS = 3
LRP_EPS = 1e-6    # epsilon for the epsilon-LRP rule


def _fused_lrp_kernel(adj_ref, x_ref, w_ref, wt_ref, b_ref,
                      r3_ref, r2_ref, r1_ref, r0_ref, *, f_in0):
    """One graph per grid step: 3 TAGConv forwards + 3 epsilon-LRP backwards.

    adj_ref: (N, N)   symmetric-normalized adjacency (graph axis squeezed).
    x_ref:   (N, F)   zero-padded node features.
    w_ref:   (L, K+1, F, F) per-layer / per-hop weights (zero padded).
    wt_ref:  (L, K+1, F, F) pre-transposed weights.
    b_ref:   (L, 1, F) biases.
    """
    adj = adj_ref[...]
    x = x_ref[...]

    def hops(h):
        # [h, A h, A^2 h] via the serial chain; adj is already resident in VMEM.
        ah = jnp.dot(adj, h, preferred_element_type=jnp.float32)
        a2h = jnp.dot(adj, ah, preferred_element_type=jnp.float32)
        return (h, ah, a2h)

    def tag_fwd(h, layer):
        # TAGConv layer: three small accumulated MXU dots (one pass each).
        hk = hops(h)
        z = b_ref[layer]
        for k in range(K_HOPS + 1):
            z = z + jnp.dot(hk[k], w_ref[layer, k],
                            preferred_element_type=jnp.float32)
        return z

    def lrp_step(a, r, z, layer):
        # epsilon-LRP via the gradient trick (adjacency symmetric => A^T = A).
        zs = z + LRP_EPS * jnp.where(z >= 0.0, 1.0, -1.0)
        s = r * pl.reciprocal(zs, approx=False)
        sk = hops(s)
        c = jnp.zeros_like(z)
        for k in range(K_HOPS + 1):
            c = c + jnp.dot(sk[k], wt_ref[layer, k],
                            preferred_element_type=jnp.float32)
        return a * c

    # ---- standard inference (activations never leave VMEM) ----
    h1 = tag_fwd(x, 0)
    h2 = tag_fwd(h1, 1)
    h3 = tag_fwd(h2, 2)

    # ---- layer-wise relevance propagation ----
    r3 = h3
    r2 = lrp_step(h2, r3, h3, 2)   # z == stored forward activation, no recompute
    r1 = lrp_step(h1, r2, h2, 1)   # z == stored forward activation, no recompute

    # The reference feeds ones_like(x) into the first LRP layer; mask to the real
    # input width so padded lanes stay exactly zero (no reliance on weight padding).
    lane = jax.lax.broadcasted_iota(jnp.int32, x.shape, 1)
    ones = jnp.where(lane < f_in0, jnp.float32(1.0), jnp.float32(0.0))
    z0 = tag_fwd(ones, 0)          # first layer's z must be recomputed from ones
    r0 = lrp_step(ones, r1, z0, 0)

    r3_ref[...] = r3
    r2_ref[...] = r2
    r1_ref[...] = r1
    r0_ref[...] = r0


def _pack_params(params, fpad):
    """Pad per-layer TAGConv weights to tight (fpad, fpad) hop tiles (and W^T)."""
    w_all = jnp.zeros((NUM_LAYERS, K_HOPS + 1, fpad, fpad), jnp.float32)
    wt_all = jnp.zeros((NUM_LAYERS, K_HOPS + 1, fpad, fpad), jnp.float32)
    b_all = jnp.zeros((NUM_LAYERS, 1, fpad), jnp.float32)
    for layer, (w, b) in enumerate(params):
        _, f_in, f_out = w.shape
        wf = w.astype(jnp.float32)
        w_all = w_all.at[layer, :, :f_in, :f_out].set(wf)
        wt_all = wt_all.at[layer, :, :f_out, :f_in].set(jnp.transpose(wf, (0, 2, 1)))
        b_all = b_all.at[layer, 0, :f_out].set(b.astype(jnp.float32).reshape(-1))
    return w_all, wt_all, b_all


def _tile_padded_bytes(shape, itemsize=4):
    """Bytes a f32 buffer occupies in VMEM after (8, 128) tile padding."""
    if len(shape) == 1:
        lead, sub, last = 1, 1, shape[0]
    else:
        *lead_dims, sub, last = shape
        lead = 1
        for d in lead_dims:
            lead *= d
    return lead * (-(-sub // 8) * 8) * (-(-last // 128) * 128) * itemsize


def _vmem_limit_bytes(n, fpad):
    per_graph = (_tile_padded_bytes((n, n)) + _tile_padded_bytes((n, fpad))   # adj, x
                 + 4 * _tile_padded_bytes((n, fpad)))                          # 4 outputs
    weights = (2 * _tile_padded_bytes((NUM_LAYERS, K_HOPS + 1, fpad, fpad))
               + _tile_padded_bytes((NUM_LAYERS, 1, fpad)))
    live = 12 * _tile_padded_bytes((n, fpad)) + 2 * _tile_padded_bytes((n, n))
    # double-buffered pipeline blocks + resident weights + live intermediates,
    # 2x headroom, clamped to a budget that is safe on v5e/v6e/v7x.
    need = 2 * (2 * per_graph + 2 * weights + live)
    return int(min(max(need, 16 << 20), 48 << 20))


@jax.jit
def lrp_model_forward_batched(adj, x, params):
    """Batched JAX/Pallas equivalent of LRPModel.forward over G independent graphs.

    Args:
      adj: (G, N, N) symmetric-normalized adjacency (D^-1/2 A D^-1/2) per graph.
      x:   (G, N, F_in) node features (graph.ndata['h']).
      params: list of (W, b) per TAGConv layer, W: (K+1, F_in, F_out), b: (1, F_out).
    Returns:
      [r3, r2, r1, r0]: relevances per graph (mirrors the PyTorch return order).
    """
    g, n, f_in0 = x.shape
    widths = [f_in0]
    for (w, _) in params:
        widths += [w.shape[1], w.shape[2]]
    fpad = max(8, -(-max(widths) // 8) * 8)         # tight lane padding (32 here, not 128)
    feat_out = [w.shape[-1] for (w, _) in params]

    adj = adj.astype(jnp.float32)
    x_pad = jnp.zeros((g, n, fpad), jnp.float32).at[:, :, :f_in0].set(x.astype(jnp.float32))
    w_all, wt_all, b_all = _pack_params(params, fpad)

    kernel = functools.partial(_fused_lrp_kernel, f_in0=f_in0)
    per_graph = pl.BlockSpec((None, n, fpad), lambda i: (i, 0, 0))
    resident = lambda ndim: (lambda i: (0,) * ndim)   # weights stay in VMEM for all graphs
    out_pad = jax.ShapeDtypeStruct((g, n, fpad), jnp.float32)

    r3, r2, r1, r0 = pl.pallas_call(
        kernel,
        grid=(g,),
        in_specs=[
            pl.BlockSpec((None, n, n), lambda i: (i, 0, 0)),                        # adj
            per_graph,                                                               # x
            pl.BlockSpec((NUM_LAYERS, K_HOPS + 1, fpad, fpad), resident(4)),         # W
            pl.BlockSpec((NUM_LAYERS, K_HOPS + 1, fpad, fpad), resident(4)),         # W^T
            pl.BlockSpec((NUM_LAYERS, 1, fpad), resident(3)),                        # bias
        ],
        out_specs=(per_graph, per_graph, per_graph, per_graph),
        out_shape=(out_pad, out_pad, out_pad, out_pad),
        compiler_params=pltpu.CompilerParams(
            dimension_semantics=("parallel",),          # v7x: graphs split across both TCs
            vmem_limit_bytes=_vmem_limit_bytes(n, fpad)),
    )(adj, x_pad, w_all, wt_all, b_all)

    # Strip lane padding back to the true per-layer relevance widths.
    return [r3[..., :feat_out[2]], r2[..., :feat_out[1]],
            r1[..., :feat_out[0]], r0[..., :f_in0]]


def lrp_model_forward(adj, x, params):
    """Single-graph API mirroring LRPModel.forward (one molecule graph)."""
    outs = lrp_model_forward_batched(adj[None], x[None], params)
    return [o[0] for o in outs]


def _lrp_reference(adj, x, params):
    """Pure-JAX f32 reference of the same LRPModel math (single graph)."""
    def tag(h, w, b):
        ah = adj @ h
        a2h = adj @ ah
        return h @ w[0] + ah @ w[1] + a2h @ w[2] + b

    def lrp(a, r, z, w):
        zs = z + LRP_EPS * jnp.where(z >= 0.0, 1.0, -1.0)
        s = r / zs
        as1 = adj @ s
        as2 = adj @ as1
        c = s @ w[0].T + as1 @ w[1].T + as2 @ w[2].T
        return a * c

    (w0, b0), (w1, b1), (w2, b2) = params
    h1 = tag(x, w0, b0)
    h2 = tag(h1, w1, b1)
    h3 = tag(h2, w2, b2)
    ones = jnp.ones_like(x)
    r3 = h3
    r2 = lrp(h2, r3, h3, w2)
    r1 = lrp(h1, r2, h2, w1)
    r0 = lrp(ones, r1, tag(ones, w0, b0), w0)
    return [r3, r2, r1, r0]


if __name__ == "__main__":
    key = jax.random.PRNGKey(0)
    G, N = 4, 8                    # batch of small molecule-sized graphs
    feats = [16, 32, 32, 8]        # in -> hidden1 -> hidden2 -> out

    k_adj, k_x, k_w = jax.random.split(key, 3)

    # synthetic undirected graphs; symmetric normalization D^-1/2 A D^-1/2
    # (no self loops -- the k=0 hop of TAGConv supplies the identity term)
    upper = jax.random.bernoulli(k_adj, 0.5, (G, N, N)).astype(jnp.float32)
    a_mat = jnp.triu(upper, 1)
    a_mat = a_mat + jnp.swapaxes(a_mat, -1, -2)
    deg = a_mat.sum(axis=-1)
    d_inv_sqrt = jnp.where(deg > 0, 1.0 / jnp.sqrt(jnp.maximum(deg, 1e-12)), 0.0)
    adj = a_mat * d_inv_sqrt[..., :, None] * d_inv_sqrt[..., None, :]

    x = jax.random.normal(k_x, (G, N, feats[0]), dtype=jnp.float32)

    # deterministic synthetic TAGConv parameters
    params = []
    wkeys = jax.random.split(k_w, len(feats) - 1)
    for i in range(len(feats) - 1):
        f_in, f_out = feats[i], feats[i + 1]
        kw, kb = jax.random.split(wkeys[i])
        scale = 1.0 / jnp.sqrt(jnp.float32(f_in * (K_HOPS + 1)))
        w = scale * jax.random.normal(kw, (K_HOPS + 1, f_in, f_out), dtype=jnp.float32)
        b = 0.01 * jax.random.normal(kb, (1, f_out), dtype=jnp.float32)
        params.append((w, b))

    out = lrp_model_forward_batched(adj, x, params)
    out = jax.block_until_ready(out)

    # f32 reference path (same math, plain JAX) for a tolerance check.
    ref = jax.vmap(lambda a, h: _lrp_reference(a, h, params))(adj, x)

    assert len(out) == 4
    expected_widths = [feats[3], feats[2], feats[1], feats[0]]
    for o, r, width in zip(out, ref, expected_widths):
        assert o.shape == (G, N, width)
        assert o.dtype == jnp.float32
        assert bool(jnp.all(jnp.isfinite(o)))
        assert bool(jnp.allclose(o, r, rtol=1e-2, atol=1e-4)), "mismatch vs f32 reference"

    # single-graph path mirrors the PyTorch LRPModel.forward signature
    single = lrp_model_forward(adj[0], x[0], params)
    single = jax.block_until_ready(single)
    for s, o in zip(single, out):
        assert bool(jnp.allclose(s, o[0], rtol=1e-4, atol=1e-6))

    print("KERNEL_OK")
</pallas_src>

<mosaic_0001>
module attributes {stable_mosaic.version = 11 : i64} {
  func.func @_fused_lrp_kernel(%arg0: i32, %arg1: memref<1x8x8xf32, #tpu.memory_space<vmem>>, %arg2: memref<1x8x32xf32, #tpu.memory_space<vmem>>, %arg3: memref<3x3x32x32xf32, #tpu.memory_space<vmem>>, %arg4: memref<3x3x32x32xf32, #tpu.memory_space<vmem>>, %arg5: memref<3x1x32xf32, #tpu.memory_space<vmem>>, %arg6: memref<1x8x32xf32, #tpu.memory_space<vmem>>, %arg7: memref<1x8x32xf32, #tpu.memory_space<vmem>>, %arg8: memref<1x8x32xf32, #tpu.memory_space<vmem>>, %arg9: memref<1x8x32xf32, #tpu.memory_space<vmem>>) attributes {dimension_semantics = [#tpu.dimension_semantics<parallel>], iteration_bounds = array<i64: 4>, scalar_prefetch = 0 : i64, scratch_operands = 0 : i64, tpu.core_type = #tpu.core_type<tc>, window_params = [{transform_indices = @transform_0, window_bounds = array<i64: 1, 8, 8>}, {transform_indices = @transform_1, window_bounds = array<i64: 1, 8, 32>}, {pipeline_mode = #tpu.pipeline_mode<synchronous>, transform_indices = @transform_2, window_bounds = array<i64: 3, 3, 32, 32>}, {pipeline_mode = #tpu.pipeline_mode<synchronous>, transform_indices = @transform_3, window_bounds = array<i64: 3, 3, 32, 32>}, {pipeline_mode = #tpu.pipeline_mode<synchronous>, transform_indices = @transform_4, window_bounds = array<i64: 3, 1, 32>}, {transform_indices = @transform_5, window_bounds = array<i64: 1, 8, 32>}, {transform_indices = @transform_6, window_bounds = array<i64: 1, 8, 32>}, {transform_indices = @transform_7, window_bounds = array<i64: 1, 8, 32>}, {transform_indices = @transform_8, window_bounds = array<i64: 1, 8, 32>}]} {
    %c0 = arith.constant 0 : index
    %c0_0 = arith.constant 0 : index
    %c0_1 = arith.constant 0 : index
    %0 = vector.load %arg1[%c0, %c0_0, %c0_1] : memref<1x8x8xf32, #tpu.memory_space<vmem>>, vector<1x8x8xf32>
    %1 = vector.shape_cast %0 : vector<1x8x8xf32> to vector<8x8xf32>
    %c0_2 = arith.constant 0 : index
    %c0_3 = arith.constant 0 : index
    %c0_4 = arith.constant 0 : index
    %2 = vector.load %arg2[%c0_2, %c0_3, %c0_4] : memref<1x8x32xf32, #tpu.memory_space<vmem>>, vector<1x8x32xf32>
    %3 = vector.shape_cast %2 : vector<1x8x32xf32> to vector<8x32xf32>
    %cst = arith.constant dense<0.000000e+00> : vector<8x32xf32>
    %4 = tpu.matmul %1, %3, %cst {dimension_numbers = #tpu.dot_dimension_numbers<[1], [0], [0], [1], [0, 0, 1, 1], [], []>, precision = #tpu.contract_precision<fp32>} : vector<8x8xf32>, vector<8x32xf32>, vector<8x32xf32> -> vector<8x32xf32>
    %cst_5 = arith.constant dense<0.000000e+00> : vector<8x32xf32>
    %5 = tpu.matmul %1, %4, %cst_5 {dimension_numbers = #tpu.dot_dimension_numbers<[1], [0], [0], [1], [0, 0, 1, 1], [], []>, precision = #tpu.contract_precision<fp32>} : vector<8x8xf32>, vector<8x32xf32>, vector<8x32xf32> -> vector<8x32xf32>
    %c0_6 = arith.constant 0 : index
    %c0_7 = arith.constant 0 : index
    %c0_8 = arith.constant 0 : index
    %6 = vector.load %arg5[%c0_6, %c0_7, %c0_8] : memref<3x1x32xf32, #tpu.memory_space<vmem>>, vector<1x1x32xf32>
    %7 = vector.shape_cast %6 : vector<1x1x32xf32> to vector<1x32xf32>
    %c0_9 = arith.constant 0 : index
    %c0_10 = arith.constant 0 : index
    %c0_11 = arith.constant 0 : index
    %c0_12 = arith.constant 0 : index
    %8 = vector.load %arg3[%c0_9, %c0_10, %c0_11, %c0_12] : memref<3x3x32x32xf32, #tpu.memory_space<vmem>>, vector<1x1x32x32xf32>
    %9 = vector.shape_cast %8 : vector<1x1x32x32xf32> to vector<32x32xf32>
    %cst_13 = arith.constant dense<0.000000e+00> : vector<8x32xf32>
    %10 = tpu.matmul %3, %9, %cst_13 {dimension_numbers = #tpu.dot_dimension_numbers<[1], [0], [0], [1], [0, 0, 1, 1], [], []>, precision = #tpu.contract_precision<fp32>} : vector<8x32xf32>, vector<32x32xf32>, vector<8x32xf32> -> vector<8x32xf32>
    %11 = vector.broadcast %7 : vector<1x32xf32> to vector<8x32xf32>
    %12 = arith.addf %11, %10 : vector<8x32xf32>
    %c0_14 = arith.constant 0 : index
    %c1 = arith.constant 1 : index
    %c0_15 = arith.constant 0 : index
    %c0_16 = arith.constant 0 : index
    %13 = vector.load %arg3[%c0_14, %c1, %c0_15, %c0_16] : memref<3x3x32x32xf32, #tpu.memory_space<vmem>>, vector<1x1x32x32xf32>
    %14 = vector.shape_cast %13 : vector<1x1x32x32xf32> to vector<32x32xf32>
    %cst_17 = arith.constant dense<0.000000e+00> : vector<8x32xf32>
    %15 = tpu.matmul %4, %14, %cst_17 {dimension_numbers = #tpu.dot_dimension_numbers<[1], [0], [0], [1], [0, 0, 1, 1], [], []>, precision = #tpu.contract_precision<fp32>} : vector<8x32xf32>, vector<32x32xf32>, vector<8x32xf32> -> vector<8x32xf32>
    %16 = arith.addf %12, %15 : vector<8x32xf32>
    %c0_18 = arith.constant 0 : index
    %c2 = arith.constant 2 : index
    %c0_19 = arith.constant 0 : index
    %c0_20 = arith.constant 0 : index
    %17 = vector.load %arg3[%c0_18, %c2, %c0_19, %c0_20] : memref<3x3x32x32xf32, #tpu.memory_space<vmem>>, vector<1x1x32x32xf32>
    %18 = vector.shape_cast %17 : vector<1x1x32x32xf32> to vector<32x32xf32>
    %cst_21 = arith.constant dense<0.000000e+00> : vector<8x32xf32>
    %19 = tpu.matmul %5, %18, %cst_21 {dimension_numbers = #tpu.dot_dimension_numbers<[1], [0], [0], [1], [0, 0, 1, 1], [], []>, precision = #tpu.contract_precision<fp32>} : vector<8x32xf32>, vector<32x32xf32>, vector<8x32xf32> -> vector<8x32xf32>
    %20 = arith.addf %16, %19 : vector<8x32xf32>
    %cst_22 = arith.constant dense<0.000000e+00> : vector<8x32xf32>
    %21 = tpu.matmul %1, %20, %cst_22 {dimension_numbers = #tpu.dot_dimension_numbers<[1], [0], [0], [1], [0, 0, 1, 1], [], []>, precision = #tpu.contract_precision<fp32>} : vector<8x8xf32>, vector<8x32xf32>, vector<8x32xf32> -> vector<8x32xf32>
    %cst_23 = arith.constant dense<0.000000e+00> : vector<8x32xf32>
    %22 = tpu.matmul %1, %21, %cst_23 {dimension_numbers = #tpu.dot_dimension_numbers<[1], [0], [0], [1], [0, 0, 1, 1], [], []>, precision = #tpu.contract_precision<fp32>} : vector<8x8xf32>, vector<8x32xf32>, vector<8x32xf32> -> vector<8x32xf32>
    %c1_24 = arith.constant 1 : index
    %c0_25 = arith.constant 0 : index
    %c0_26 = arith.constant 0 : index
    %23 = vector.load %arg5[%c1_24, %c0_25, %c0_26] : memref<3x1x32xf32, #tpu.memory_space<vmem>>, vector<1x1x32xf32>
    %24 = vector.shape_cast %23 : vector<1x1x32xf32> to vector<1x32xf32>
    %c1_27 = arith.constant 1 : index
    %c0_28 = arith.constant 0 : index
    %c0_29 = arith.constant 0 : index
    %c0_30 = arith.constant 0 : index
    %25 = vector.load %arg3[%c1_27, %c0_28, %c0_29, %c0_30] : memref<3x3x32x32xf32, #tpu.memory_space<vmem>>, vector<1x1x32x32xf32>
    %26 = vector.shape_cast %25 : vector<1x1x32x32xf32> to vector<32x32xf32>
    %cst_31 = arith.constant dense<0.000000e+00> : vector<8x32xf32>
    %27 = tpu.matmul %20, %26, %cst_31 {dimension_numbers = #tpu.dot_dimension_numbers<[1], [0], [0], [1], [0, 0, 1, 1], [], []>, precision = #tpu.contract_precision<fp32>} : vector<8x32xf32>, vector<32x32xf32>, vector<8x32xf32> -> vector<8x32xf32>
    %28 = vector.broadcast %24 : vector<1x32xf32> to vector<8x32xf32>
    %29 = arith.addf %28, %27 : vector<8x32xf32>
    %c1_32 = arith.constant 1 : index
    %c1_33 = arith.constant 1 : index
    %c0_34 = arith.constant 0 : index
    %c0_35 = arith.constant 0 : index
    %30 = vector.load %arg3[%c1_32, %c1_33, %c0_34, %c0_35] : memref<3x3x32x32xf32, #tpu.memory_space<vmem>>, vector<1x1x32x32xf32>
    %31 = vector.shape_cast %30 : vector<1x1x32x32xf32> to vector<32x32xf32>
    %cst_36 = arith.constant dense<0.000000e+00> : vector<8x32xf32>
    %32 = tpu.matmul %21, %31, %cst_36 {dimension_numbers = #tpu.dot_dimension_numbers<[1], [0], [0], [1], [0, 0, 1, 1], [], []>, precision = #tpu.contract_precision<fp32>} : vector<8x32xf32>, vector<32x32xf32>, vector<8x32xf32> -> vector<8x32xf32>
    %33 = arith.addf %29, %32 : vector<8x32xf32>
    %c1_37 = arith.constant 1 : index
    %c2_38 = arith.constant 2 : index
    %c0_39 = arith.constant 0 : index
    %c0_40 = arith.constant 0 : index
    %34 = vector.load %arg3[%c1_37, %c2_38, %c0_39, %c0_40] : memref<3x3x32x32xf32, #tpu.memory_space<vmem>>, vector<1x1x32x32xf32>
    %35 = vector.shape_cast %34 : vector<1x1x32x32xf32> to vector<32x32xf32>
    %cst_41 = arith.constant dense<0.000000e+00> : vector<8x32xf32>
    %36 = tpu.matmul %22, %35, %cst_41 {dimension_numbers = #tpu.dot_dimension_numbers<[1], [0], [0], [1], [0, 0, 1, 1], [], []>, precision = #tpu.contract_precision<fp32>} : vector<8x32xf32>, vector<32x32xf32>, vector<8x32xf32> -> vector<8x32xf32>
    %37 = arith.addf %33, %36 : vector<8x32xf32>
    %cst_42 = arith.constant dense<0.000000e+00> : vector<8x32xf32>
    %38 = tpu.matmul %1, %37, %cst_42 {dimension_numbers = #tpu.dot_dimension_numbers<[1], [0], [0], [1], [0, 0, 1, 1], [], []>, precision = #tpu.contract_precision<fp32>} : vector<8x8xf32>, vector<8x32xf32>, vector<8x32xf32> -> vector<8x32xf32>
    %cst_43 = arith.constant dense<0.000000e+00> : vector<8x32xf32>
    %39 = tpu.matmul %1, %38, %cst_43 {dimension_numbers = #tpu.dot_dimension_numbers<[1], [0], [0], [1], [0, 0, 1, 1], [], []>, precision = #tpu.contract_precision<fp32>} : vector<8x8xf32>, vector<8x32xf32>, vector<8x32xf32> -> vector<8x32xf32>
    %c2_44 = arith.constant 2 : index
    %c0_45 = arith.constant 0 : index
    %c0_46 = arith.constant 0 : index
    %40 = vector.load %arg5[%c2_44, %c0_45, %c0_46] : memref<3x1x32xf32, #tpu.memory_space<vmem>>, vector<1x1x32xf32>
    %41 = vector.shape_cast %40 : vector<1x1x32xf32> to vector<1x32xf32>
    %c2_47 = arith.constant 2 : index
    %c0_48 = arith.constant 0 : index
    %c0_49 = arith.constant 0 : index
    %c0_50 = arith.constant 0 : index
    %42 = vector.load %arg3[%c2_47, %c0_48, %c0_49, %c0_50] : memref<3x3x32x32xf32, #tpu.memory_space<vmem>>, vector<1x1x32x32xf32>
    %43 = vector.shape_cast %42 : vector<1x1x32x32xf32> to vector<32x32xf32>
    %cst_51 = arith.constant dense<0.000000e+00> : vector<8x32xf32>
    %44 = tpu.matmul %37, %43, %cst_51 {dimension_numbers = #tpu.dot_dimension_numbers<[1], [0], [0], [1], [0, 0, 1, 1], [], []>, precision = #tpu.contract_precision<fp32>} : vector<8x32xf32>, vector<32x32xf32>, vector<8x32xf32> -> vector<8x32xf32>
    %45 = vector.broadcast %41 : vector<1x32xf32> to vector<8x32xf32>
    %46 = arith.addf %45, %44 : vector<8x32xf32>
    %c2_52 = arith.constant 2 : index
    %c1_53 = arith.constant 1 : index
    %c0_54 = arith.constant 0 : index
    %c0_55 = arith.constant 0 : index
    %47 = vector.load %arg3[%c2_52, %c1_53, %c0_54, %c0_55] : memref<3x3x32x32xf32, #tpu.memory_space<vmem>>, vector<1x1x32x32xf32>
    %48 = vector.shape_cast %47 : vector<1x1x32x32xf32> to vector<32x32xf32>
    %cst_56 = arith.constant dense<0.000000e+00> : vector<8x32xf32>
    %49 = tpu.matmul %38, %48, %cst_56 {dimension_numbers = #tpu.dot_dimension_numbers<[1], [0], [0], [1], [0, 0, 1, 1], [], []>, precision = #tpu.contract_precision<fp32>} : vector<8x32xf32>, vector<32x32xf32>, vector<8x32xf32> -> vector<8x32xf32>
    %50 = arith.addf %46, %49 : vector<8x32xf32>
    %c2_57 = arith.constant 2 : index
    %c2_58 = arith.constant 2 : index
    %c0_59 = arith.constant 0 : index
    %c0_60 = arith.constant 0 : index
    %51 = vector.load %arg3[%c2_57, %c2_58, %c0_59, %c0_60] : memref<3x3x32x32xf32, #tpu.memory_space<vmem>>, vector<1x1x32x32xf32>
    %52 = vector.shape_cast %51 : vector<1x1x32x32xf32> to vector<32x32xf32>
    %cst_61 = arith.constant dense<0.000000e+00> : vector<8x32xf32>
    %53 = tpu.matmul %39, %52, %cst_61 {dimension_numbers = #tpu.dot_dimension_numbers<[1], [0], [0], [1], [0, 0, 1, 1], [], []>, precision = #tpu.contract_precision<fp32>} : vector<8x32xf32>, vector<32x32xf32>, vector<8x32xf32> -> vector<8x32xf32>
    %54 = arith.addf %50, %53 : vector<8x32xf32>
    %cst_62 = arith.constant 0.000000e+00 : f32
    %55 = vector.broadcast %cst_62 : f32 to vector<8x32xf32>
    %56 = arith.cmpf oge, %54, %55 : vector<8x32xf32>
    %cst_63 = arith.constant 1.000000e+00 : f32
    %cst_64 = arith.constant -1.000000e+00 : f32
    %57 = vector.broadcast %cst_63 : f32 to vector<8x32xf32>
    %58 = vector.broadcast %cst_64 : f32 to vector<8x32xf32>
    %59 = arith.select %56, %57, %58 : vector<8x32xi1>, vector<8x32xf32>
    %cst_65 = arith.constant 9.99999997E-7 : f32
    %60 = vector.broadcast %cst_65 : f32 to vector<8x32xf32>
    %61 = arith.mulf %60, %59 : vector<8x32xf32>
    %62 = arith.addf %54, %61 : vector<8x32xf32>
    %63 = tpu.reciprocal %62 : vector<8x32xf32> -> vector<8x32xf32>
    %64 = arith.mulf %54, %63 : vector<8x32xf32>
    %cst_66 = arith.constant dense<0.000000e+00> : vector<8x32xf32>
    %65 = tpu.matmul %1, %64, %cst_66 {dimension_numbers = #tpu.dot_dimension_numbers<[1], [0], [0], [1], [0, 0, 1, 1], [], []>, precision = #tpu.contract_precision<fp32>} : vector<8x8xf32>, vector<8x32xf32>, vector<8x32xf32> -> vector<8x32xf32>
    %cst_67 = arith.constant dense<0.000000e+00> : vector<8x32xf32>
    %66 = tpu.matmul %1, %65, %cst_67 {dimension_numbers = #tpu.dot_dimension_numbers<[1], [0], [0], [1], [0, 0, 1, 1], [], []>, precision = #tpu.contract_precision<fp32>} : vector<8x8xf32>, vector<8x32xf32>, vector<8x32xf32> -> vector<8x32xf32>
    %cst_68 = arith.constant 0.000000e+00 : f32
    %67 = vector.broadcast %cst_68 : f32 to vector<8x32xf32>
    %c2_69 = arith.constant 2 : index
    %c0_70 = arith.constant 0 : index
    %c0_71 = arith.constant 0 : index
    %c0_72 = arith.constant 0 : index
    %68 = vector.load %arg4[%c2_69, %c0_70, %c0_71, %c0_72] : memref<3x3x32x32xf32, #tpu.memory_space<vmem>>, vector<1x1x32x32xf32>
    %69 = vector.shape_cast %68 : vector<1x1x32x32xf32> to vector<32x32xf32>
    %cst_73 = arith.constant dense<0.000000e+00> : vector<8x32xf32>
    %70 = tpu.matmul %64, %69, %cst_73 {dimension_numbers = #tpu.dot_dimension_numbers<[1], [0], [0], [1], [0, 0, 1, 1], [], []>, precision = #tpu.contract_precision<fp32>} : vector<8x32xf32>, vector<32x32xf32>, vector<8x32xf32> -> vector<8x32xf32>
    %71 = arith.addf %67, %70 : vector<8x32xf32>
    %c2_74 = arith.constant 2 : index
    %c1_75 = arith.constant 1 : index
    %c0_76 = arith.constant 0 : index
    %c0_77 = arith.constant 0 : index
    %72 = vector.load %arg4[%c2_74, %c1_75, %c0_76, %c0_77] : memref<3x3x32x32xf32, #tpu.memory_space<vmem>>, vector<1x1x32x32xf32>
    %73 = vector.shape_cast %72 : vector<1x1x32x32xf32> to vector<32x32xf32>
    %cst_78 = arith.constant dense<0.000000e+00> : vector<8x32xf32>
    %74 = tpu.matmul %65, %73, %cst_78 {dimension_numbers = #tpu.dot_dimension_numbers<[1], [0], [0], [1], [0, 0, 1, 1], [], []>, precision = #tpu.contract_precision<fp32>} : vector<8x32xf32>, vector<32x32xf32>, vector<8x32xf32> -> vector<8x32xf32>
    %75 = arith.addf %71, %74 : vector<8x32xf32>
    %c2_79 = arith.constant 2 : index
    %c2_80 = arith.constant 2 : index
    %c0_81 = arith.constant 0 : index
    %c0_82 = arith.constant 0 : index
    %76 = vector.load %arg4[%c2_79, %c2_80, %c0_81, %c0_82] : memref<3x3x32x32xf32, #tpu.memory_space<vmem>>, vector<1x1x32x32xf32>
    %77 = vector.shape_cast %76 : vector<1x1x32x32xf32> to vector<32x32xf32>
    %cst_83 = arith.constant dense<0.000000e+00> : vector<8x32xf32>
    %78 = tpu.matmul %66, %77, %cst_83 {dimension_numbers = #tpu.dot_dimension_numbers<[1], [0], [0], [1], [0, 0, 1, 1], [], []>, precision = #tpu.contract_precision<fp32>} : vector<8x32xf32>, vector<32x32xf32>, vector<8x32xf32> -> vector<8x32xf32>
    %79 = arith.addf %75, %78 : vector<8x32xf32>
    %80 = arith.mulf %37, %79 : vector<8x32xf32>
    %cst_84 = arith.constant 0.000000e+00 : f32
    %81 = vector.broadcast %cst_84 : f32 to vector<8x32xf32>
    %82 = arith.cmpf oge, %37, %81 : vector<8x32xf32>
    %cst_85 = arith.constant 1.000000e+00 : f32
    %cst_86 = arith.constant -1.000000e+00 : f32
    %83 = vector.broadcast %cst_85 : f32 to vector<8x32xf32>
    %84 = vector.broadcast %cst_86 : f32 to vector<8x32xf32>
    %85 = arith.select %82, %83, %84 : vector<8x32xi1>, vector<8x32xf32>
    %cst_87 = arith.constant 9.99999997E-7 : f32
    %86 = vector.broadcast %cst_87 : f32 to vector<8x32xf32>
    %87 = arith.mulf %86, %85 : vector<8x32xf32>
    %88 = arith.addf %37, %87 : vector<8x32xf32>
    %89 = tpu.reciprocal %88 : vector<8x32xf32> -> vector<8x32xf32>
    %90 = arith.mulf %80, %89 : vector<8x32xf32>
    %cst_88 = arith.constant dense<0.000000e+00> : vector<8x32xf32>
    %91 = tpu.matmul %1, %90, %cst_88 {dimension_numbers = #tpu.dot_dimension_numbers<[1], [0], [0], [1], [0, 0, 1, 1], [], []>, precision = #tpu.contract_precision<fp32>} : vector<8x8xf32>, vector<8x32xf32>, vector<8x32xf32> -> vector<8x32xf32>
    %cst_89 = arith.constant dense<0.000000e+00> : vector<8x32xf32>
    %92 = tpu.matmul %1, %91, %cst_89 {dimension_numbers = #tpu.dot_dimension_numbers<[1], [0], [0], [1], [0, 0, 1, 1], [], []>, precision = #tpu.contract_precision<fp32>} : vector<8x8xf32>, vector<8x32xf32>, vector<8x32xf32> -> vector<8x32xf32>
    %cst_90 = arith.constant 0.000000e+00 : f32
    %93 = vector.broadcast %cst_90 : f32 to vector<8x32xf32>
    %c1_91 = arith.constant 1 : index
    %c0_92 = arith.constant 0 : index
    %c0_93 = arith.constant 0 : index
    %c0_94 = arith.constant 0 : index
    %94 = vector.load %arg4[%c1_91, %c0_92, %c0_93, %c0_94] : memref<3x3x32x32xf32, #tpu.memory_space<vmem>>, vector<1x1x32x32xf32>
    %95 = vector.shape_cast %94 : vector<1x1x32x32xf32> to vector<32x32xf32>
    %cst_95 = arith.constant dense<0.000000e+00> : vector<8x32xf32>
    %96 = tpu.matmul %90, %95, %cst_95 {dimension_numbers = #tpu.dot_dimension_numbers<[1], [0], [0], [1], [0, 0, 1, 1], [], []>, precision = #tpu.contract_precision<fp32>} : vector<8x32xf32>, vector<32x32xf32>, vector<8x32xf32> -> vector<8x32xf32>
    %97 = arith.addf %93, %96 : vector<8x32xf32>
    %c1_96 = arith.constant 1 : index
    %c1_97 = arith.constant 1 : index
    %c0_98 = arith.constant 0 : index
    %c0_99 = arith.constant 0 : index
    %98 = vector.load %arg4[%c1_96, %c1_97, %c0_98, %c0_99] : memref<3x3x32x32xf32, #tpu.memory_space<vmem>>, vector<1x1x32x32xf32>
    %99 = vector.shape_cast %98 : vector<1x1x32x32xf32> to vector<32x32xf32>
    %cst_100 = arith.constant dense<0.000000e+00> : vector<8x32xf32>
    %100 = tpu.matmul %91, %99, %cst_100 {dimension_numbers = #tpu.dot_dimension_numbers<[1], [0], [0], [1], [0, 0, 1, 1], [], []>, precision = #tpu.contract_precision<fp32>} : vector<8x32xf32>, vector<32x32xf32>, vector<8x32xf32> -> vector<8x32xf32>
    %101 = arith.addf %97, %100 : vector<8x32xf32>
    %c1_101 = arith.constant 1 : index
    %c2_102 = arith.constant 2 : index
    %c0_103 = arith.constant 0 : index
    %c0_104 = arith.constant 0 : index
    %102 = vector.load %arg4[%c1_101, %c2_102, %c0_103, %c0_104] : memref<3x3x32x32xf32, #tpu.memory_space<vmem>>, vector<1x1x32x32xf32>
    %103 = vector.shape_cast %102 : vector<1x1x32x32xf32> to vector<32x32xf32>
    %cst_105 = arith.constant dense<0.000000e+00> : vector<8x32xf32>
    %104 = tpu.matmul %92, %103, %cst_105 {dimension_numbers = #tpu.dot_dimension_numbers<[1], [0], [0], [1], [0, 0, 1, 1], [], []>, precision = #tpu.contract_precision<fp32>} : vector<8x32xf32>, vector<32x32xf32>, vector<8x32xf32> -> vector<8x32xf32>
    %105 = arith.addf %101, %104 : vector<8x32xf32>
    %106 = arith.mulf %20, %105 : vector<8x32xf32>
    %107 = tpu.iota {dimensions = array<i32: 1>} : vector<8x32xi32>
    %c16_i32 = arith.constant 16 : i32
    %108 = vector.broadcast %c16_i32 : i32 to vector<8x32xi32>
    %109 = arith.cmpi slt, %107, %108 : vector<8x32xi32>
    %cst_106 = arith.constant 1.000000e+00 : f32
    %cst_107 = arith.constant 0.000000e+00 : f32
    %110 = vector.broadcast %cst_106 : f32 to vector<8x32xf32>
    %111 = vector.broadcast %cst_107 : f32 to vector<8x32xf32>
    %112 = arith.select %109, %110, %111 : vector<8x32xi1>, vector<8x32xf32>
    %cst_108 = arith.constant dense<0.000000e+00> : vector<8x32xf32>
    %113 = tpu.matmul %1, %112, %cst_108 {dimension_numbers = #tpu.dot_dimension_numbers<[1], [0], [0], [1], [0, 0, 1, 1], [], []>, precision = #tpu.contract_precision<fp32>} : vector<8x8xf32>, vector<8x32xf32>, vector<8x32xf32> -> vector<8x32xf32>
    %cst_109 = arith.constant dense<0.000000e+00> : vector<8x32xf32>
    %114 = tpu.matmul %1, %113, %cst_109 {dimension_numbers = #tpu.dot_dimension_numbers<[1], [0], [0], [1], [0, 0, 1, 1], [], []>, precision = #tpu.contract_precision<fp32>} : vector<8x8xf32>, vector<8x32xf32>, vector<8x32xf32> -> vector<8x32xf32>
    %c0_110 = arith.constant 0 : index
    %c0_111 = arith.constant 0 : index
    %c0_112 = arith.constant 0 : index
    %115 = vector.load %arg5[%c0_110, %c0_111, %c0_112] : memref<3x1x32xf32, #tpu.memory_space<vmem>>, vector<1x1x32xf32>
    %116 = vector.shape_cast %115 : vector<1x1x32xf32> to vector<1x32xf32>
    %c0_113 = arith.constant 0 : index
    %c0_114 = arith.constant 0 : index
    %c0_115 = arith.constant 0 : index
    %c0_116 = arith.constant 0 : index
    %117 = vector.load %arg3[%c0_113, %c0_114, %c0_115, %c0_116] : memref<3x3x32x32xf32, #tpu.memory_space<vmem>>, vector<1x1x32x32xf32>
    %118 = vector.shape_cast %117 : vector<1x1x32x32xf32> to vector<32x32xf32>
    %cst_117 = arith.constant dense<0.000000e+00> : vector<8x32xf32>
    %119 = tpu.matmul %112, %118, %cst_117 {dimension_numbers = #tpu.dot_dimension_numbers<[1], [0], [0], [1], [0, 0, 1, 1], [], []>, precision = #tpu.contract_precision<fp32>} : vector<8x32xf32>, vector<32x32xf32>, vector<8x32xf32> -> vector<8x32xf32>
    %120 = vector.broadcast %116 : vector<1x32xf32> to vector<8x32xf32>
    %121 = arith.addf %120, %119 : vector<8x32xf32>
    %c0_118 = arith.constant 0 : index
    %c1_119 = arith.constant 1 : index
    %c0_120 = arith.constant 0 : index
    %c0_121 = arith.constant 0 : index
    %122 = vector.load %arg3[%c0_118, %c1_119, %c0_120, %c0_121] : memref<3x3x32x32xf32, #tpu.memory_space<vmem>>, vector<1x1x32x32xf32>
    %123 = vector.shape_cast %122 : vector<1x1x32x32xf32> to vector<32x32xf32>
    %cst_122 = arith.constant dense<0.000000e+00> : vector<8x32xf32>
    %124 = tpu.matmul %113, %123, %cst_122 {dimension_numbers = #tpu.dot_dimension_numbers<[1], [0], [0], [1], [0, 0, 1, 1], [], []>, precision = #tpu.contract_precision<fp32>} : vector<8x32xf32>, vector<32x32xf32>, vector<8x32xf32> -> vector<8x32xf32>
    %125 = arith.addf %121, %124 : vector<8x32xf32>
    %c0_123 = arith.constant 0 : index
    %c2_124 = arith.constant 2 : index
    %c0_125 = arith.constant 0 : index
    %c0_126 = arith.constant 0 : index
    %126 = vector.load %arg3[%c0_123, %c2_124, %c0_125, %c0_126] : memref<3x3x32x32xf32, #tpu.memory_space<vmem>>, vector<1x1x32x32xf32>
    %127 = vector.shape_cast %126 : vector<1x1x32x32xf32> to vector<32x32xf32>
    %cst_127 = arith.constant dense<0.000000e+00> : vector<8x32xf32>
    %128 = tpu.matmul %114, %127, %cst_127 {dimension_numbers = #tpu.dot_dimension_numbers<[1], [0], [0], [1], [0, 0, 1, 1], [], []>, precision = #tpu.contract_precision<fp32>} : vector<8x32xf32>, vector<32x32xf32>, vector<8x32xf32> -> vector<8x32xf32>
    %129 = arith.addf %125, %128 : vector<8x32xf32>
    %cst_128 = arith.constant 0.000000e+00 : f32
    %130 = vector.broadcast %cst_128 : f32 to vector<8x32xf32>
    %131 = arith.cmpf oge, %129, %130 : vector<8x32xf32>
    %cst_129 = arith.constant 1.000000e+00 : f32
    %cst_130 = arith.constant -1.000000e+00 : f32
    %132 = vector.broadcast %cst_129 : f32 to vector<8x32xf32>
    %133 = vector.broadcast %cst_130 : f32 to vector<8x32xf32>
    %134 = arith.select %131, %132, %133 : vector<8x32xi1>, vector<8x32xf32>
    %cst_131 = arith.constant 9.99999997E-7 : f32
    %135 = vector.broadcast %cst_131 : f32 to vector<8x32xf32>
    %136 = arith.mulf %135, %134 : vector<8x32xf32>
    %137 = arith.addf %129, %136 : vector<8x32xf32>
    %138 = tpu.reciprocal %137 : vector<8x32xf32> -> vector<8x32xf32>
    %139 = arith.mulf %106, %138 : vector<8x32xf32>
    %cst_132 = arith.constant dense<0.000000e+00> : vector<8x32xf32>
    %140 = tpu.matmul %1, %139, %cst_132 {dimension_numbers = #tpu.dot_dimension_numbers<[1], [0], [0], [1], [0, 0, 1, 1], [], []>, precision = #tpu.contract_precision<fp32>} : vector<8x8xf32>, vector<8x32xf32>, vector<8x32xf32> -> vector<8x32xf32>
    %cst_133 = arith.constant dense<0.000000e+00> : vector<8x32xf32>
    %141 = tpu.matmul %1, %140, %cst_133 {dimension_numbers = #tpu.dot_dimension_numbers<[1], [0], [0], [1], [0, 0, 1, 1], [], []>, precision = #tpu.contract_precision<fp32>} : vector<8x8xf32>, vector<8x32xf32>, vector<8x32xf32> -> vector<8x32xf32>
    %cst_134 = arith.constant 0.000000e+00 : f32
    %142 = vector.broadcast %cst_134 : f32 to vector<8x32xf32>
    %c0_135 = arith.constant 0 : index
    %c0_136 = arith.constant 0 : index
    %c0_137 = arith.constant 0 : index
    %c0_138 = arith.constant 0 : index
    %143 = vector.load %arg4[%c0_135, %c0_136, %c0_137, %c0_138] : memref<3x3x32x32xf32, #tpu.memory_space<vmem>>, vector<1x1x32x32xf32>
    %144 = vector.shape_cast %143 : vector<1x1x32x32xf32> to vector<32x32xf32>
    %cst_139 = arith.constant dense<0.000000e+00> : vector<8x32xf32>
    %145 = tpu.matmul %139, %144, %cst_139 {dimension_numbers = #tpu.dot_dimension_numbers<[1], [0], [0], [1], [0, 0, 1, 1], [], []>, precision = #tpu.contract_precision<fp32>} : vector<8x32xf32>, vector<32x32xf32>, vector<8x32xf32> -> vector<8x32xf32>
    %146 = arith.addf %142, %145 : vector<8x32xf32>
    %c0_140 = arith.constant 0 : index
    %c1_141 = arith.constant 1 : index
    %c0_142 = arith.constant 0 : index
    %c0_143 = arith.constant 0 : index
    %147 = vector.load %arg4[%c0_140, %c1_141, %c0_142, %c0_143] : memref<3x3x32x32xf32, #tpu.memory_space<vmem>>, vector<1x1x32x32xf32>
    %148 = vector.shape_cast %147 : vector<1x1x32x32xf32> to vector<32x32xf32>
    %cst_144 = arith.constant dense<0.000000e+00> : vector<8x32xf32>
    %149 = tpu.matmul %140, %148, %cst_144 {dimension_numbers = #tpu.dot_dimension_numbers<[1], [0], [0], [1], [0, 0, 1, 1], [], []>, precision = #tpu.contract_precision<fp32>} : vector<8x32xf32>, vector<32x32xf32>, vector<8x32xf32> -> vector<8x32xf32>
    %150 = arith.addf %146, %149 : vector<8x32xf32>
    %c0_145 = arith.constant 0 : index
    %c2_146 = arith.constant 2 : index
    %c0_147 = arith.constant 0 : index
    %c0_148 = arith.constant 0 : index
    %151 = vector.load %arg4[%c0_145, %c2_146, %c0_147, %c0_148] : memref<3x3x32x32xf32, #tpu.memory_space<vmem>>, vector<1x1x32x32xf32>
    %152 = vector.shape_cast %151 : vector<1x1x32x32xf32> to vector<32x32xf32>
    %cst_149 = arith.constant dense<0.000000e+00> : vector<8x32xf32>
    %153 = tpu.matmul %141, %152, %cst_149 {dimension_numbers = #tpu.dot_dimension_numbers<[1], [0], [0], [1], [0, 0, 1, 1], [], []>, precision = #tpu.contract_precision<fp32>} : vector<8x32xf32>, vector<32x32xf32>, vector<8x32xf32> -> vector<8x32xf32>
    %154 = arith.addf %150, %153 : vector<8x32xf32>
    %155 = arith.mulf %112, %154 : vector<8x32xf32>
    %c0_150 = arith.constant 0 : index
    %c0_151 = arith.constant 0 : index
    %c0_152 = arith.constant 0 : index
    %156 = vector.load %arg6[%c0_150, %c0_151, %c0_152] : memref<1x8x32xf32, #tpu.memory_space<vmem>>, vector<1x8x32xf32>
    %157 = vector.shape_cast %156 : vector<1x8x32xf32> to vector<8x32xf32>
    %158 = vector.shape_cast %54 : vector<8x32xf32> to vector<1x8x32xf32>
    tpu.vector_store %arg6[%c0_150, %c0_151, %c0_152], %158 {strides = array<i32>} : memref<1x8x32xf32, #tpu.memory_space<vmem>>, vector<1x8x32xf32>,
    %c0_153 = arith.constant 0 : index
    %c0_154 = arith.constant 0 : index
    %c0_155 = arith.constant 0 : index
    %159 = vector.load %arg7[%c0_153, %c0_154, %c0_155] : memref<1x8x32xf32, #tpu.memory_space<vmem>>, vector<1x8x32xf32>
    %160 = vector.shape_cast %159 : vector<1x8x32xf32> to vector<8x32xf32>
    %161 = vector.shape_cast %80 : vector<8x32xf32> to vector<1x8x32xf32>
    tpu.vector_store %arg7[%c0_153, %c0_154, %c0_155], %161 {strides = array<i32>} : memref<1x8x32xf32, #tpu.memory_space<vmem>>, vector<1x8x32xf32>,
    %c0_156 = arith.constant 0 : index
    %c0_157 = arith.constant 0 : index
    %c0_158 = arith.constant 0 : index
    %162 = vector.load %arg8[%c0_156, %c0_157, %c0_158] : memref<1x8x32xf32, #tpu.memory_space<vmem>>, vector<1x8x32xf32>
    %163 = vector.shape_cast %162 : vector<1x8x32xf32> to vector<8x32xf32>
    %164 = vector.shape_cast %106 : vector<8x32xf32> to vector<1x8x32xf32>
    tpu.vector_store %arg8[%c0_156, %c0_157, %c0_158], %164 {strides = array<i32>} : memref<1x8x32xf32, #tpu.memory_space<vmem>>, vector<1x8x32xf32>,
    %c0_159 = arith.constant 0 : index
    %c0_160 = arith.constant 0 : index
    %c0_161 = arith.constant 0 : index
    %165 = vector.load %arg9[%c0_159, %c0_160, %c0_161] : memref<1x8x32xf32, #tpu.memory_space<vmem>>, vector<1x8x32xf32>
    %166 = vector.shape_cast %165 : vector<1x8x32xf32> to vector<8x32xf32>
    %167 = vector.shape_cast %155 : vector<8x32xf32> to vector<1x8x32xf32>
    tpu.vector_store %arg9[%c0_159, %c0_160, %c0_161], %167 {strides = array<i32>} : memref<1x8x32xf32, #tpu.memory_space<vmem>>, vector<1x8x32xf32>,
    return
  }
  func.func @transform_0(%arg0: i32) -> (i32, i32, i32) {
    %c0_i32 = arith.constant 0 : i32
    %c0_i32_0 = arith.constant 0 : i32
    %c0_i32_1 = arith.constant 0 : i32
    return %arg0, %c0_i32, %c0_i32_0 : i32, i32, i32
  }
  func.func @transform_1(%arg0: i32) -> (i32, i32, i32) {
    %c0_i32 = arith.constant 0 : i32
    %c0_i32_0 = arith.constant 0 : i32
    %c0_i32_1 = arith.constant 0 : i32
    return %arg0, %c0_i32, %c0_i32_0 : i32, i32, i32
  }
  func.func @transform_2(%arg0: i32) -> (i32, i32, i32, i32) {
    %c0_i32 = arith.constant 0 : i32
    %c0_i32_0 = arith.constant 0 : i32
    %c0_i32_1 = arith.constant 0 : i32
    %c0_i32_2 = arith.constant 0 : i32
    %c0_i32_3 = arith.constant 0 : i32
    return %c0_i32, %c0_i32_0, %c0_i32_1, %c0_i32_2 : i32, i32, i32, i32
  }
  func.func @transform_3(%arg0: i32) -> (i32, i32, i32, i32) {
    %c0_i32 = arith.constant 0 : i32
    %c0_i32_0 = arith.constant 0 : i32
    %c0_i32_1 = arith.constant 0 : i32
    %c0_i32_2 = arith.constant 0 : i32
    %c0_i32_3 = arith.constant 0 : i32
    return %c0_i32, %c0_i32_0, %c0_i32_1, %c0_i32_2 : i32, i32, i32, i32
  }
  func.func @transform_4(%arg0: i32) -> (i32, i32, i32) {
    %c0_i32 = arith.constant 0 : i32
    %c0_i32_0 = arith.constant 0 : i32
    %c0_i32_1 = arith.constant 0 : i32
    %c0_i32_2 = arith.constant 0 : i32
    return %c0_i32, %c0_i32_0, %c0_i32_1 : i32, i32, i32
  }
  func.func @transform_5(%arg0: i32) -> (i32, i32, i32) {
    %c0_i32 = arith.constant 0 : i32
    %c0_i32_0 = arith.constant 0 : i32
    %c0_i32_1 = arith.constant 0 : i32
    return %arg0, %c0_i32, %c0_i32_0 : i32, i32, i32
  }
  func.func @transform_6(%arg0: i32) -> (i32, i32, i32) {
    %c0_i32 = arith.constant 0 : i32
    %c0_i32_0 = arith.constant 0 : i32
    %c0_i32_1 = arith.constant 0 : i32
    return %arg0, %c0_i32, %c0_i32_0 : i32, i32, i32
  }
  func.func @transform_7(%arg0: i32) -> (i32, i32, i32) {
    %c0_i32 = arith.constant 0 : i32
    %c0_i32_0 = arith.constant 0 : i32
    %c0_i32_1 = arith.constant 0 : i32
    return %arg0, %c0_i32, %c0_i32_0 : i32, i32, i32
  }
  func.func @transform_8(%arg0: i32) -> (i32, i32, i32) {
    %c0_i32 = arith.constant 0 : i32
    %c0_i32_0 = arith.constant 0 : i32
    %c0_i32_1 = arith.constant 0 : i32
    return %arg0, %c0_i32, %c0_i32_0 : i32, i32, i32
  }
}

</mosaic_0001>

<bundles_post_ra>
// kernel: lrp_model_forward_batched.1
= control target key start
LH: loop header
LB: loop body
LE: loop exit
PB: predicated region body
PF: predicated region fallthrough
CT: control target
= control target key end

     0   :  { %s23112_s0 = inlined_call_operand.vmem [shape: f32[4,8,8], index: 0, kind: input, shape index: {}]   ;;  %s23113_s1 = inlined_call_operand.vmem [shape: f32[4,8,32], index: 1, kind: input, shape index: {}]   ;;  %s23114_s2 = inlined_call_operand.vmem [shape: f32[3,3,32,32], index: 2, kind: input, shape index: {}]   ;;  %s23115_s3 = inlined_call_operand.vmem [shape: f32[3,3,32,32], index: 3, kind: input, shape index: {}]   ;;  %s23116_s4 = inlined_call_operand.vmem [shape: f32[3,1,32], index: 4, kind: input, shape index: {}]   ;;  %s23117_s5 = inlined_call_operand.hbm [shape: f32[4,8,32], index: 5, kind: output, shape index: {0}]   ;;  %s23118_s6 = inlined_call_operand.hbm [shape: f32[4,8,32], index: 6, kind: output, shape index: {1}]   ;;  %s23119_s7 = inlined_call_operand.hbm [shape: f32[4,8,32], index: 7, kind: output, shape index: {2}]   ;;  %s23120_s8 = inlined_call_operand.hbm [shape: f32[4,8,32], index: 8, kind: output, shape index: {3}]  }
   0x1   :  { %23124 = sst [smem:[#allocation12_spill]] %s23112_s0 }
   0x2   :  { %23125 = sst [smem:[#allocation13_spill]] %s23113_s1 }
   0x3   :  { %23126 = sst [smem:[#allocation14_spill]] %s23114_s2 }
   0x4   :  { %14 = vsyncpa [#allocation3], 0 }
   0x5   :  { %16 = vsyncpa [#allocation3 + $0x1], 0 }
   0x6   :  { %17 = vsyncpa [#allocation5], 0 }
   0x7   :  { %19 = vsyncpa [#allocation5 + $0x1], 0 }
   0x8   :  { %20 = vsyncpa [#allocation8], 0 }
   0x9   :  { %22 = vsyncpa [#allocation8 + $0x1], 0  ;;  %s21338_s27 = smov 0   ;;  %s21340_s28 = smov 0  }
   0xa   :  { %s21342_s29 = smov 0   ;;  %s21344_s30 = smov 0  }
   0xb LB: > { %s21359_s9 = sadd.s32 4294967295, %s21282_s30   ;;  %s23121_s10 = sadd.s32 4294967294, %s21282_s30   ;;  %s21282_s30 = sphi %s21344_s30, %s23138_s30   ;;  %s21278_s29 = sphi %s21342_s29, %s23137_s29   ;;  %s21274_s28 = sphi %s21340_s28, %s23136_s28   ;;  %s21270_s27 = sphi %s21338_s27, %s23135_s27  }
   0xc   : > { %s21363_s11 = sadd.s32 1, %s21282_s30   ;;  %s150_s12 = sadd.s32 1, %s21278_s29 }
   0xd   : > { %s147_s13 = ssub.s32 %s21282_s30, %s21363_s11  ;;  %p160_p0 = scmp.ne.s32.totalorder %s21278_s29, %s21274_s28 }
   0xe   : > { %p148_p1 = scmp.eq.s32.totalorder %s147_s13, 0  ;;  %p161_p2 = scmp.eq.s32.totalorder %s21359_s9, 3 }
   0xf   : > { %p166_p3 = scmp.ne.s32.totalorder %s21274_s28, %s21270_s27  ;;  %p167_p4 = scmp.eq.s32.totalorder %s23121_s10, 3 }
  0x10   : > { %s21376_s14 = scalar_select %p148_p1, %s21278_s29, %s150_s12  }
  0x11   : > { %p21378_p5 = por %p161_p2, %p160_p0  ;;  %p21382_p6 = por %p167_p4, %p166_p3 }
  0x12   : > { %p17229_p7 = scmp.ge.s32.totalorder %s21282_s30, 1  ;;  %p286_p8 = scmp.lt.s32.totalorder %s21282_s30, 5 }
  0x14   : > { %p287_p9 = pnand %p17229_p7, %p286_p8 }
  0x15   : > { %p338_p10 = scmp.lt.s32.totalorder (!%p287_p9), %s21359_s9, 3  ;;  %v21284_v0 = vmov (!%p287_p9), 0.0   ;;  %vm21285_vm0 = vmmov (!%p287_p9), 0   ;;  %vm348_vm1 = vcmask (!%p287_p9), 64512   ;;  %s23129_s0 = sld [smem:[#allocation12_spill]] (!%p287_p9)  ;;  %v21286_v19 = vmov (!%p287_p9), 0.0|0.0  }
  0x16   : > { %290 = sbr.rel (%p287_p9) target bundleno = 4729 (0x1279), region = 40  ;;  %18119 = vmatprep.subr.mxu0 (!%p287_p9), %v21284_v0  ;;  %18121 = vmatprep.mubr.msk.f32.mxu0 (!%p287_p9), %vm21285_vm0, %v21284_v0  ;;  %s23130_s1 = sld [smem:[#allocation13_spill]] (!%p287_p9)  ;;  %vm1249_vm2 = vcmask (!%p287_p9), 261120  }
  0x17   : > { %18149 = vmatprep.subr.mxu1 (!%p287_p9), %v21284_v0  ;;  %18151 = vmatprep.mubr.msk.f32.mxu1 (!%p287_p9), %vm21285_vm0, %v21284_v0  ;;  %s23131_s2 = sld [smem:[#allocation14_spill]] (!%p287_p9)  ;;  %s16999_s26 = sand.u32 (!%p287_p9), 1, %s21359_s9  }
  0x18   : > { %s22963_s12 = sshll.u32 (!%p287_p9), %s21359_s9, 7  ;;  %s21289_s19 = smov (!%p287_p9), [#allocation4]  }
  0x19   : > { %s22969_s23 = scalar_lea.hbm (!%p287_p9), %s23118_s6, %s22963_s12  ;;  %s21132_s20 = sshll.u32 (!%p287_p9), %s21289_s19, 4  ;;  %s21133_s20 = int_to_ptr.vmem [resolvable:$false] %s21132_s20 }
  0x1d   : > { %s339_s17 = scalar_select %p338_p10, %s21359_s9, 3  ;;  %v17237_v14 = vld [vmem:[%s23131_s2 + $0x20] sm:$0xff]  ;;  %v17238_v15 = vld [vmem:[%s23131_s2 + $0x28] sm:$0xff]  ;;  %v17239_v20 = vld [vmem:[%s23131_s2 + $0x30] sm:$0xff] }
  0x1e   : > { %v1754_v16 = vand.u32 4294901760, %v17237_v14  ;;  %v1757_v17 = vand.u32 4294901760, %v17238_v15  ;;  %v17240_v21 = vld [vmem:[%s23131_s2 + $0x38] sm:$0xff]  ;;  %v1760_v22 = vand.u32 4294901760, %v17239_v20  ;;  %v1245_v46 = vld [vmem:[%s23131_s2] sm:$0xff]  ;;  %v1246_v47 = vld [vmem:[%s23131_s2 + $0x8] sm:$0xff] }
  0x1f   : > { %s17234_s18 = sshll.u32 %s339_s17, 3  ;;  %v1763_v23 = vand.u32 4294901760, %v17240_v21  ;;  %v1254_v49 = vand.u32 4294901760, %v1245_v46  ;;  %v1257_v50 = vand.u32 4294901760, %v1246_v47  ;;  %v1247_v51 = vld [vmem:[%s23131_s2 + $0x10] sm:$0xff]  ;;  %v1248_v52 = vld [vmem:[%s23131_s2 + $0x18] sm:$0xff] }
  0x20   : > { %s341_s21 = scalar_lea.vmem %s23129_s0, %s17234_s18  ;;  %s345_s24 = scalar_lea.vmem %s23130_s1, %s17234_s18  ;;  %v21447_v18 = vpack.c.bf16 %v1757_v17, %v1754_v16  ;;  %v21460_v25 = vsub.f32 %v17237_v14, %v1754_v16  ;;  %v21462_v26 = vsub.f32 %v17238_v15, %v1757_v17  ;;  %v21466_v27 = vsub.f32 %v17239_v20, %v1760_v22 }
  0x21   : > { %v346_v1 = vld [vmem:[%s341_s21] sm:$0xff]  ;;  %v21458_v24 = vpack.c.bf16 %v1763_v23, %v1760_v22  ;;  %v21468_v28 = vsub.f32 %v17240_v21, %v1763_v23  ;;  %v1260_v54 = vand.u32 4294901760, %v1247_v51  ;;  %v1263_v55 = vand.u32 4294901760, %v1248_v52  ;;  %s22118_s17 = sand.u32 1, %s21274_s28   ;;  %s22981_s9 = scalar_lea.sflag [#allocation5], %s16999_s26 }
  0x22   : > { %v21402_v2 = vld [vmem:[%s345_s24] sm:$0xff]  ;;  %v350_v3 = vsel %vm348_vm1, %v346_v1, 0  ;;  %v1835_v33 = vand.u32 4294901760, %v21460_v25  ;;  %v1842_v34 = vand.u32 4294901760, %v21462_v26  ;;  %v1849_v40 = vand.u32 4294901760, %v21466_v27  ;;  %s22121_s18 = sshll.u32 %s22118_s17, 3 }
  0x23   : > { %v353_v4 = vand.u32 4294901760, %v21402_v2  ;;  %v21405_v5 = vand.u32 4294901760, %v350_v3  ;;  %v1856_v41 = vand.u32 4294901760, %v21468_v28  ;;  %v1251_v48 = vsel %vm1249_vm2, %v21402_v2, 0  ;;  %s23123_s21 = scalar_lea.vmem [#allocation2], %s22121_s18  ;;  %s323_s13 = scalar_lea.vmem [#allocation4], %s22121_s18 }
  0x24   : > { %v21484_v39 = vpack.c.bf16 %v1842_v34, %v1835_v33  ;;  %v21542_v53 = vand.u32 4294901760, %v1251_v48  ;;  %v1334_v56 = vsub.f32 %v1245_v46, %v1254_v49  ;;  %v1341_v57 = vsub.f32 %v1246_v47, %v1257_v50  ;;  %s23122_s22 = scalar_lea.vmem [#allocation6], %s22121_s18  ;;  %s17036_s24 = sshll.u32 %s323_s13, 4  ;;  %s22973_s24 = int_to_ptr.vmem [resolvable:$true] %s17036_s24 }
  0x25   : > { %18120 = vmatpush3.msra.mxu0 %v353_v4  ;;  %v430_v6 = vsub.f32 %v21402_v2, %v353_v4  ;;  %v21409_v7 = vsub.f32 %v350_v3, %v21405_v5  ;;  %v21498_v45 = vpack.c.bf16 %v1856_v41, %v1849_v40  ;;  %v1348_v61 = vsub.f32 %v1247_v51, %v1260_v54  ;;  %p21135_p0 = scmp.lt.s32.totalorder %s22973_s24, %s21133_s20 }
  0x26   : > { %18124 = vmatprep.subr.mxu0 %v21284_v0  ;;  %v1323_v58 = vsub.f32 %v1251_v48, %v21542_v53  ;;  %v1335_v59 = vand.u32 4294901760, %v1334_v56  ;;  %v1342_v60 = vand.u32 4294901760, %v1341_v57  ;;  %v1355_v62 = vsub.f32 %v1248_v52, %v1263_v55  ;;  %v17244_v52 = vld [vmem:[%s23131_s2 + $0x58] sm:$0xff] }
  0x27   : > { %v431_v8 = vand.u32 4294901760, %v430_v6  ;;  %v21413_v9 = vand.u32 4294901760, %v21409_v7  ;;  %v21549_v63 = vpack.c.bf16 %v1257_v50, %v1254_v49  ;;  %v21569_v23 = vpack.c.bf16 %v1341_v57, %v1334_v56 }
  0x28   : > { %v1324_v1 = vand.u32 4294901760, %v1323_v58  ;;  %v1336_v2 = vsub.f32 %v1334_v56, %v1335_v59  ;;  %v1343_v3 = vsub.f32 %v1341_v57, %v1342_v60 }
  0x29   : > { %v432_v10 = vsub.f32 %v430_v6, %v431_v8  ;;  %v421_v11 = vsub.f32 %v21409_v7, %v21413_v9 }
  0x2b   : > { %v433_v12 = vand.u32 4294901760, %v432_v10  ;;  %v21417_v13 = vand.u32 4294901760, %v421_v11  ;;  %v1325_v10 = vsub.f32 %v1323_v58, %v1324_v1  ;;  %v1337_v11 = vand.u32 4294901760, %v1336_v2 }
  0x2d   : > { %18122 = vmatmul.mubr.f32.vlgmr.msra.gmra.mrb[0].mxu0 %v21417_v13  ;;  %v1326_v16 = vand.u32 4294901760, %v1325_v10 }
  0x2e   : > { %18125 = vmatpush3.msra.mxu0 %v433_v12  ;;  %18126 = vmatprep.mubr.msk.f32.mxu0 %vm21285_vm0, %v21284_v0  ;;  %v1344_v12 = vand.u32 4294901760, %v1343_v3 }
  0x2f   : > { %18129 = vmatprep.subr.mxu0 %v21284_v0 }
  0x30   : > { %v21559_v17 = vpack.c.bf16 %v1344_v12, %v1337_v11 }
  0x35   : > { %18127 = vmatmul.mubr.f32.vlgmr.msra.gmra.mrb[0].mxu0 %v21405_v5 }
  0x36   : > { %18130 = vmatpush3.msra.mxu0 %v430_v6  ;;  %18131 = vmatprep.mubr.msk.f32.mxu0 %vm21285_vm0, %v21284_v0  ;;  %v1356_v6 = vand.u32 4294901760, %v1355_v62 }
  0x37   : > { %18134 = vmatprep.subr.mxu0 %v21284_v0 }
  0x38   : > { %v1357_v15 = vsub.f32 %v1355_v62, %v1356_v6 }
  0x3a   : > { %v1358_v21 = vand.u32 4294901760, %v1357_v15 }
  0x3d   : > { %18132 = vmatmul.mubr.f32.vlgmr.msra.gmra.mrb[0].mxu0 %v21409_v7 }
  0x3e   : > { %18135 = vmatpush3.msra.mxu0 %v353_v4  ;;  %18136 = vmatprep.mubr.msk.f32.mxu0 %vm21285_vm0, %v21284_v0 }
  0x3f   : > { %18139 = vmatprep.subr.mxu0 %v21284_v0 }
  0x45   : > { %18137 = vmatmul.mubr.f32.vlgmr.msra.gmra.mrb[0].mxu0 %v21413_v9 }
  0x46   : > { %18140 = vmatpush3.msra.mxu0 %v431_v8  ;;  %18141 = vmatprep.mubr.msk.f32.mxu0 %vm21285_vm0, %v21284_v0  ;;  %v21552_v8 = vpack.c.bf16 %v1263_v55, %v1260_v54  ;;  %v2257_v54 = vand.u32 4294901760, %v17244_v52 }
  0x47   : > { %18144 = vmatprep.subr.mxu0 %v21284_v0 }
  0x4d   : > { %18142 = vmatmul.mubr.f32.vlgmr.msra.gmra.mrb[0].mxu0 %v21405_v5 }
  0x4e   : > { %18145 = vmatpush3.msra.mxu0 %v353_v4  ;;  %18146 = vmatprep.mubr.msk.f32.mxu0 %vm21285_vm0, %v21284_v0  ;;  %v1349_v4 = vand.u32 4294901760, %v1348_v61 }
  0x4f   : > { %19979 = vmatprep.subr.bf16.mxu0 %v21286_v19 }
  0x50   : > { %v1350_v14 = vsub.f32 %v1348_v61, %v1349_v4 }
  0x52   : > { %v1351_v20 = vand.u32 4294901760, %v1350_v14 }
  0x54   : > { %v21563_v22 = vpack.c.bf16 %v1358_v21, %v1351_v20 }
  0x55   : > { %18147 = vmatmul.mubr.f32.vlgmr.msra.gmra.mrb[0].mxu0 %v21405_v5 }
  0x56   : > { %18286 = vmatprep.mubr.msk.f32.mxu0 %vm21285_vm0, %v21284_v0  ;;  %19981 = vmatpush3.bf16.msra.mxu0 %v21447_v18 }
  0x57   : > { %19982 = vmatprep.subr.bf16.mxu0 %v21286_v19 }
  0x5a   : > { %19984 = vmatpush3.bf16.msra.mxu0 %v21458_v24 }
  0x5b   : > { %19985 = vmatprep.subr.bf16.mxu0 %v21286_v19 }
 0x128   : > { %v794_v29 = vpop.f32.mrb[0].mxu0 }
 0x129   : > { %v799_v30 = vand.u32 4294901760, %v794_v29  ;;  %v1751_v31 = vsel %vm1249_vm2, %v794_v29, 0  ;;  %v18148_v32 = vpop.f32.mrb[1].mxu0 }
 0x12a   : > { %v21473_v35 = vand.u32 4294901760, %v1751_v31  ;;  %v1836_v32 = vsub.f32 %v21460_v25, %v1835_v33  ;;  %v1857_v33 = vsub.f32 %v21468_v28, %v1856_v41  ;;  %v21637_v41 = vpack.c.bf16 %v21462_v26, %v21460_v25  ;;  %v17241_v25 = vld [vmem:[%s23131_s2 + $0x40] sm:$0xff] }
 0x12b   : > { %v876_v36 = vsub.f32 %v794_v29, %v799_v30  ;;  %18150 = vmatpush3.msra.mxu1 %v799_v30  ;;  %v21574_v29 = vpack.c.bf16 %v1355_v62, %v1348_v61  ;;  %v2349_v61 = vsub.f32 %v17244_v52, %v2257_v54 }
 0x12c   : > { %v21476_v37 = vsub.f32 %v1751_v31, %v21473_v35  ;;  %18152 = vmatmul.mubr.f32.vlgmr.msra.gmra.mrb[0].mxu1 %v21417_v13  ;;  %18154 = vmatprep.subr.mxu1 %v21284_v0  ;;  %v21590_v31 = vpack.c.bf16 %v1356_v6, %v1349_v4  ;;  %v1858_v48 = vand.u32 4294901760, %v1857_v33 }
 0x12d   : > { %v877_v38 = vand.u32 4294901760, %v876_v36  ;;  %18156 = vmatprep.mubr.msk.f32.mxu1 %vm21285_vm0, %v21284_v0  ;;  %v2350_v3 = vand.u32 4294901760, %v2349_v61 }
 0x12e   : > { %v1824_v42 = vand.u32 4294901760, %v21476_v37 }
 0x12f   : > { %v878_v43 = vsub.f32 %v876_v36, %v877_v38  ;;  %v2351_v10 = vsub.f32 %v2349_v61, %v2350_v3 }
 0x130   : > { %18287 = vmatmul.mubr.f32.vlgmr.msra.gmra.mrb[2].mxu0 %v1824_v42 }
 0x131   : > { %19987 = vmatpush3.bf16.msra.mxu0 %v21484_v39  ;;  %v879_v44 = vand.u32 4294901760, %v878_v43  ;;  %18297 = vmatprep.mubr.msk.f32.mxu0 %vm21285_vm0, %v21284_v0  ;;  %v2352_v12 = vand.u32 4294901760, %v2351_v10  ;;  %v17248_v10 = vld [vmem:[%s23131_s2 + $0x70] sm:$0xff] }
 0x132   : > { %19988 = vmatprep.subr.bf16.mxu0 %v21286_v19 }
 0x133   : > { %18155 = vmatpush3.msra.mxu1 %v879_v44  ;;  %v1850_v44 = vsub.f32 %v21466_v27, %v1849_v40 }
 0x134   : > { %18157 = vmatmul.mubr.f32.vlgmr.msra.gmra.mrb[0].mxu1 %v21405_v5  ;;  %18159 = vmatprep.subr.mxu1 %v21284_v0 }
 0x135   : > { %18160 = vmatpush3.msra.mxu1 %v876_v36  ;;  %19990 = vmatpush3.bf16.msra.mxu0 %v21498_v45  ;;  %v1843_v36 = vsub.f32 %v21462_v26, %v1842_v34  ;;  %v1825_v34 = vsub.f32 %v21476_v37, %v1824_v42  ;;  %v1851_v47 = vand.u32 4294901760, %v1850_v44  ;;  %v21644_v42 = vpack.c.bf16 %v21468_v28, %v21466_v27  ;;  %v17242_v26 = vld [vmem:[%s23131_s2 + $0x48] sm:$0xff] }
 0x136   : > { %19991 = vmatprep.subr.bf16.mxu0 %v21286_v19  ;;  %18161 = vmatprep.mubr.msk.f32.mxu1 %vm21285_vm0, %v21284_v0  ;;  %v2248_v27 = vand.u32 4294901760, %v17241_v25  ;;  %v2251_v28 = vand.u32 4294901760, %v17242_v26 }
 0x137   : > { %18164 = vmatprep.subr.mxu1 %v21284_v0  ;;  %v1844_v43 = vand.u32 4294901760, %v1843_v36  ;;  %v1826_v49 = vand.u32 4294901760, %v1825_v34  ;;  %v21629_v40 = vpack.c.bf16 %v1858_v48, %v1851_v47 }
 0x138   : > { %18298 = vmatmul.mubr.f32.vlgmr.msra.gmra.mrb[2].mxu0 %v21473_v35  ;;  %v2328_v50 = vsub.f32 %v17241_v25, %v2248_v27  ;;  %v2335_v51 = vsub.f32 %v17242_v26, %v2251_v28  ;;  %v17236_v25 = vld [vmem:[%s23116_s4] ss:$0 sm:$0xff] }
 0x139   : > { %19993 = vmatpush3.bf16.msra.mxu0 %v21447_v18  ;;  %18308 = vmatprep.mubr.msk.f32.mxu0 %vm21285_vm0, %v21284_v0 }
 0x13a   : > { %19994 = vmatprep.subr.bf16.mxu0 %v21286_v19  ;;  %v2329_v55 = vand.u32 4294901760, %v2328_v50  ;;  %v2336_v56 = vand.u32 4294901760, %v2335_v51  ;;  %v21678_v15 = vpack.c.bf16 %v2335_v51, %v2328_v50 }
 0x13c   : > { %18162 = vmatmul.mubr.f32.vlgmr.msra.gmra.mrb[0].mxu1 %v21409_v7  ;;  %v21682_v20 = vpack.c.bf16 %v2336_v56, %v2329_v55 }
 0x13d   : > { %18165 = vmatpush3.msra.mxu1 %v799_v30  ;;  %19996 = vmatpush3.bf16.msra.mxu0 %v21458_v24 }
 0x13e   : > { %18166 = vmatprep.mubr.msk.f32.mxu1 %vm21285_vm0, %v21284_v0  ;;  %18169 = vmatprep.subr.mxu1 %v21284_v0 }
 0x13f   : > { %19997 = vmatprep.subr.bf16.mxu0 %v21286_v19 }
 0x140   : > { %18309 = vmatmul.mubr.f32.vlgmr.msra.gmra.mrb[2].mxu0 %v21473_v35 }
 0x141   : > { %18319 = vmatprep.mubr.msk.f32.mxu0 %vm21285_vm0, %v21284_v0 }
 0x144   : > { %18167 = vmatmul.mubr.f32.vlgmr.msra.gmra.mrb[0].mxu1 %v21413_v9 }
 0x145   : > { %18170 = vmatpush3.msra.mxu1 %v877_v38  ;;  %18171 = vmatprep.mubr.msk.f32.mxu1 %vm21285_vm0, %v21284_v0  ;;  %v1837_v38 = vand.u32 4294901760, %v1836_v32 }
 0x146   : > { %18174 = vmatprep.subr.mxu1 %v21284_v0 }
 0x147   : > { %v21625_v46 = vpack.c.bf16 %v1844_v43, %v1837_v38 }
 0x14c   : > { %18172 = vmatmul.mubr.f32.vlgmr.msra.gmra.mrb[0].mxu1 %v21405_v5 }
 0x14d   : > { %18175 = vmatpush3.msra.mxu1 %v799_v30  ;;  %18176 = vmatprep.mubr.msk.f32.mxu1 %vm21285_vm0, %v21284_v0  ;;  %v21586_v30 = vpack.c.bf16 %v1342_v60, %v1335_v59  ;;  %v2337_v59 = vsub.f32 %v2335_v51, %v2336_v56 }
 0x14e   : > { %19925 = vmatprep.subr.bf16.mxu1 %v21286_v19 }
 0x154   : > { %18177 = vmatmul.mubr.f32.vlgmr.msra.gmra.mrb[0].mxu1 %v21405_v5 }
 0x155   : > { %19927 = vmatpush3.bf16.msra.mxu1 %v21549_v63  ;;  %18187 = vmatprep.mubr.msk.f32.mxu1 %vm21285_vm0, %v21284_v0 }
 0x156   : > { %19928 = vmatprep.subr.bf16.mxu1 %v21286_v19 }
 0x159   : > { %19930 = vmatpush3.bf16.msra.mxu1 %v21552_v8 }
 0x15a   : > { %19931 = vmatprep.subr.bf16.mxu1 %v21286_v19 }
 0x15c   : > { %18188 = vmatmul.mubr.f32.vlgmr.msra.gmra.mrb[2].mxu1 %v1326_v16 }
 0x15d   : > { %19933 = vmatpush3.bf16.msra.mxu1 %v21559_v17  ;;  %18198 = vmatprep.mubr.msk.f32.mxu1 %vm21285_vm0, %v21284_v0 }
 0x15e   : > { %19934 = vmatprep.subr.bf16.mxu1 %v21286_v19 }
 0x161   : > { %19936 = vmatpush3.bf16.msra.mxu1 %v21563_v22 }
 0x162   : > { %19937 = vmatprep.subr.bf16.mxu1 %v21286_v19 }
 0x164   : > { %18199 = vmatmul.mubr.f32.vlgmr.msra.gmra.mrb[2].mxu1 %v21542_v53 }
 0x165   : > { %19939 = vmatpush3.bf16.msra.mxu1 %v21569_v23  ;;  %18209 = vmatprep.mubr.msk.f32.mxu1 %vm21285_vm0, %v21284_v0 }
 0x166   : > { %19940 = vmatprep.subr.bf16.mxu1 %v21286_v19 }
 0x169   : > { %19942 = vmatpush3.bf16.msra.mxu1 %v21574_v29 }
 0x16a   : > { %19943 = vmatprep.subr.bf16.mxu1 %v21286_v19 }
 0x16c   : > { %18210 = vmatmul.mubr.f32.vlgmr.msra.gmra.mrb[2].mxu1 %v1323_v58  ;;  %v2330_v58 = vsub.f32 %v2328_v50, %v2329_v55 }
 0x16d   : > { %19945 = vmatpush3.bf16.msra.mxu1 %v21549_v63  ;;  %18220 = vmatprep.mubr.msk.f32.mxu1 %vm21285_vm0, %v21284_v0 }
 0x16e   : > { %19946 = vmatprep.subr.bf16.mxu1 %v21286_v19  ;;  %v2331_v62 = vand.u32 4294901760, %v2330_v58 }
 0x171   : > { %19948 = vmatpush3.bf16.msra.mxu1 %v21552_v8 }
 0x172   : > { %19949 = vmatprep.subr.bf16.mxu1 %v21286_v19 }
 0x174   : > { %18221 = vmatmul.mubr.f32.vlgmr.msra.gmra.mrb[2].mxu1 %v1324_v1  ;;  %v2338_v1 = vand.u32 4294901760, %v2337_v59 }
 0x175   : > { %19951 = vmatpush3.bf16.msra.mxu1 %v21586_v30  ;;  %18231 = vmatprep.mubr.msk.f32.mxu1 %vm21285_vm0, %v21284_v0 }
 0x176   : > { %19952 = vmatprep.subr.bf16.mxu1 %v21286_v19  ;;  %v21674_v4 = vpack.c.bf16 %v2338_v1, %v2331_v62  ;;  %v17246_v1 = vld [vmem:[%s23131_s2 + $0x60] sm:$0xff] }
 0x179   : > { %19954 = vmatpush3.bf16.msra.mxu1 %v21590_v31 }
 0x17a   : > { %19955 = vmatprep.subr.bf16.mxu1 %v21286_v19 }
 0x17c   : > { %18232 = vmatmul.mubr.f32.vlgmr.msra.gmra.mrb[2].mxu1 %v21542_v53 }
 0x17d   : > { %19957 = vmatpush3.bf16.msra.mxu1 %v21549_v63  ;;  %18242 = vmatprep.mubr.msk.f32.mxu1 %vm21285_vm0, %v21284_v0 }
 0x17e   : > { %19958 = vmatprep.subr.bf16.mxu1 %v21286_v19 }
 0x181   : > { %19960 = vmatpush3.bf16.msra.mxu1 %v21552_v8 }
 0x182   : > { %19961 = vmatprep.subr.bf16.mxu1 %v21286_v19 }
 0x184   : > { %18243 = vmatmul.mubr.f32.vlgmr.msra.gmra.mrb[2].mxu1 %v21542_v53 }
 0x185   : > { %19963 = vmatpush3.bf16.msra.mxu1 %v21447_v18  ;;  %18253 = vmatprep.mubr.msk.f32.mxu1 %vm21285_vm0, %v21284_v0 }
 0x186   : > { %19964 = vmatprep.subr.bf16.mxu1 %v21286_v19 }
 0x189   : > { %19966 = vmatpush3.bf16.msra.mxu1 %v21458_v24 }
 0x18a   : > { %19967 = vmatprep.subr.bf16.mxu1 %v21286_v19 }
 0x18c   : > { %18254 = vmatmul.mubr.f32.vlgmr.msra.gmra.mrb[2].mxu1 %v1826_v49 }
 0x18d   : > { %19969 = vmatpush3.bf16.msra.mxu1 %v21625_v46  ;;  %18264 = vmatprep.mubr.msk.f32.mxu1 %vm21285_vm0, %v21284_v0 }
 0x18e   : > { %19970 = vmatprep.subr.bf16.mxu1 %v21286_v19 }
 0x191   : > { %19972 = vmatpush3.bf16.msra.mxu1 %v21629_v40 }
 0x192   : > { %19973 = vmatprep.subr.bf16.mxu1 %v21286_v19 }
 0x194   : > { %18265 = vmatmul.mubr.f32.vlgmr.msra.gmra.mrb[2].mxu1 %v21473_v35  ;;  %v21660_v35 = vpack.c.bf16 %v2251_v28, %v2248_v27 }
 0x195   : > { %19975 = vmatpush3.bf16.msra.mxu1 %v21637_v41  ;;  %18275 = vmatprep.mubr.msk.f32.mxu1 %vm21285_vm0, %v21284_v0 }
 0x196   : > { %19976 = vmatprep.subr.bf16.mxu1 %v21286_v19  ;;  %19999 = vmatpush3.bf16.msra.mxu0 %v21660_v35 }
 0x197   : > { %20000 = vmatprep.subr.bf16.mxu0 %v21286_v19 }
 0x199   : > { %19978 = vmatpush3.bf16.msra.mxu1 %v21644_v42 }
 0x19a   : > { %18377 = vmatprep.subr.mxu1 %v21284_v0 }
 0x19c   : > { %18276 = vmatmul.mubr.f32.vlgmr.msra.gmra.mrb[2].mxu1 %v21476_v37  ;;  %v17243_v37 = vld [vmem:[%s23131_s2 + $0x50] sm:$0xff] }
 0x19d   : > { %18379 = vmatprep.mubr.msk.f32.mxu1 %vm21285_vm0, %v21284_v0  ;;  %v2254_v53 = vand.u32 4294901760, %v17243_v37 }
 0x19f   : > { %v21670_v57 = vpack.c.bf16 %v2257_v54, %v2254_v53  ;;  %v2342_v60 = vsub.f32 %v17243_v37, %v2254_v53 }
 0x1a1   : > { %20002 = vmatpush3.bf16.msra.mxu0 %v21670_v57  ;;  %v2343_v2 = vand.u32 4294901760, %v2342_v60  ;;  %v21680_v16 = vpack.c.bf16 %v2349_v61, %v2342_v60 }
 0x1a2   : > { %20003 = vmatprep.subr.bf16.mxu0 %v21286_v19 }
 0x1a3   : > { %v2344_v6 = vsub.f32 %v2342_v60, %v2343_v2  ;;  %v21684_v21 = vpack.c.bf16 %v2350_v3, %v2343_v2  ;;  %v17247_v2 = vld [vmem:[%s23131_s2 + $0x68] sm:$0xff]  ;;  %v3636_v3 = vand.u32 4294901760, %v17246_v1 }
 0x1a5   : > { %v2345_v11 = vand.u32 4294901760, %v2344_v6  ;;  %v3639_v6 = vand.u32 4294901760, %v17247_v2 }
 0x1a7   : > { %v21676_v14 = vpack.c.bf16 %v2352_v12, %v2345_v11  ;;  %v17249_v11 = vld [vmem:[%s23131_s2 + $0x78] sm:$0xff] }
 0x227   : > { %v1240_v32 = vpop.f32.mrb[0].mxu1 }
 0x228   : > { %v2245_v36 = vsel %vm1249_vm2, %v1240_v32, 0  ;;  %v18178_v38 = vpop.f32.mrb[1].mxu1  ;;  %v3716_v32 = vsub.f32 %v17246_v1, %v3636_v3 }
 0x229   : > { %v2316_v43 = vand.u32 4294901760, %v2245_v36  ;;  %v3642_v38 = vand.u32 4294901760, %v17248_v10 }
 0x22b   : > { %v2317_v44 = vsub.f32 %v2245_v36, %v2316_v43  ;;  %v3723_v36 = vsub.f32 %v17247_v2, %v3639_v6 }
 0x22d   : > { %v2318_v33 = vand.u32 4294901760, %v2317_v44 }
 0x22f   : > { %v2319_v34 = vsub.f32 %v2317_v44, %v2318_v33 }
 0x231   : > { %v2320_v47 = vand.u32 4294901760, %v2319_v34 }
 0x233   : > { %18320 = vmatmul.mubr.f32.vlgmr.msra.gmra.mrb[2].mxu0 %v2320_v47  ;;  %v3717_v47 = vand.u32 4294901760, %v3716_v32 }
 0x234   : > { %20005 = vmatpush3.bf16.msra.mxu0 %v21674_v4  ;;  %18330 = vmatprep.mubr.msk.f32.mxu0 %vm21285_vm0, %v21284_v0 }
 0x235   : > { %20006 = vmatprep.subr.bf16.mxu0 %v21286_v19 }
 0x238   : > { %20008 = vmatpush3.bf16.msra.mxu0 %v21676_v14 }
 0x239   : > { %20009 = vmatprep.subr.bf16.mxu0 %v21286_v19 }
 0x23b   : > { %18331 = vmatmul.mubr.f32.vlgmr.msra.gmra.mrb[2].mxu0 %v2316_v43 }
 0x23c   : > { %20011 = vmatpush3.bf16.msra.mxu0 %v21678_v15  ;;  %18341 = vmatprep.mubr.msk.f32.mxu0 %vm21285_vm0, %v21284_v0 }
 0x23d   : > { %20012 = vmatprep.subr.bf16.mxu0 %v21286_v19 }
 0x240   : > { %20014 = vmatpush3.bf16.msra.mxu0 %v21680_v16 }
 0x241   : > { %20015 = vmatprep.subr.bf16.mxu0 %v21286_v19 }
 0x243   : > { %18342 = vmatmul.mubr.f32.vlgmr.msra.gmra.mrb[2].mxu0 %v2317_v44 }
 0x244   : > { %20017 = vmatpush3.bf16.msra.mxu0 %v21660_v35  ;;  %18352 = vmatprep.mubr.msk.f32.mxu0 %vm21285_vm0, %v21284_v0 }
 0x245   : > { %20018 = vmatprep.subr.bf16.mxu0 %v21286_v19 }
 0x248   : > { %20020 = vmatpush3.bf16.msra.mxu0 %v21670_v57 }
 0x249   : > { %20021 = vmatprep.subr.bf16.mxu0 %v21286_v19 }
 0x24b   : > { %18353 = vmatmul.mubr.f32.vlgmr.msra.gmra.mrb[2].mxu0 %v2318_v33  ;;  %v3730_v33 = vsub.f32 %v17248_v10, %v3642_v38 }
 0x24c   : > { %20023 = vmatpush3.bf16.msra.mxu0 %v21682_v20  ;;  %18363 = vmatprep.mubr.msk.f32.mxu0 %vm21285_vm0, %v21284_v0 }
 0x24d   : > { %20024 = vmatprep.subr.bf16.mxu0 %v21286_v19 }
 0x250   : > { %20026 = vmatpush3.bf16.msra.mxu0 %v21684_v21 }
 0x251   : > { %20027 = vmatprep.subr.bf16.mxu0 %v21286_v19 }
 0x253   : > { %18364 = vmatmul.mubr.f32.vlgmr.msra.gmra.mrb[2].mxu0 %v2316_v43 }
 0x254   : > { %20029 = vmatpush3.bf16.msra.mxu0 %v21660_v35  ;;  %18374 = vmatprep.mubr.msk.f32.mxu0 %vm21285_vm0, %v21284_v0 }
 0x255   : > { %20030 = vmatprep.subr.bf16.mxu0 %v21286_v19 }
 0x258   : > { %20032 = vmatpush3.bf16.msra.mxu0 %v21670_v57 }
 0x259   : > { %18635 = vmatprep.subr.mxu0 %v21284_v0 }
 0x25b   : > { %18375 = vmatmul.mubr.f32.vlgmr.msra.gmra.mrb[2].mxu0 %v2316_v43  ;;  %v3645_v43 = vand.u32 4294901760, %v17249_v11 }
 0x25c   : > { %18637 = vmatprep.mubr.msk.f32.mxu0 %vm21285_vm0, %v21284_v0 }
 0x25d   : > { %v3737_v34 = vsub.f32 %v17249_v11, %v3645_v43  ;;  %v17251_v11 = vld [vmem:[%s23131_s2 + $0x80] sm:$0xff] }
 0x26f   : > { %v1999_v48 = vpop.f32.mrb[2].mxu1 }
 0x270   : > { %v18277_v49 = vpop.f32.mrb[3].mxu1  ;;  %v20681_v26 = vadd.f32 %v17236_v25, %v1999_v48  ;;  %v3724_v48 = vand.u32 4294901760, %v3723_v36  ;;  %v21792_v25 = vpack.c.bf16 %v3639_v6, %v3636_v3  ;;  %v20046_v3 = vpack.c.bf16 %v3723_v36, %v3716_v32 }
 0x271   : > { %v20049_v6 = vpack.c.bf16 %v3737_v34, %v3730_v33 }
 0x272   : > { %v20058_v10 = vpack.c.bf16 %v3724_v48, %v3717_v47 }
 0x32e   : > { %v2728_v27 = vpop.f32.mrb[2].mxu0 }
 0x32f   : > { %v21722_v28 = vadd.f32 %v20681_v26, %v2728_v27  ;;  %v18376_v50 = vpop.f32.mrb[3].mxu0  ;;  %v3718_v26 = vsub.f32 %v3716_v32, %v3717_v47  ;;  %v3725_v27 = vsub.f32 %v3723_v36, %v3724_v48  ;;  %v4136_v36 = vand.u32 4294901760, %v17251_v11 }
 0x330   : > { %v3731_v50 = vand.u32 4294901760, %v3730_v33 }
 0x331   : > { %v2734_v51 = vand.u32 4294901760, %v21722_v28  ;;  %v3633_v12 = vsel %vm1249_vm2, %v21722_v28, 0  ;;  %v4216_v47 = vsub.f32 %v17251_v11, %v4136_v36 }
 0x332   : > { %v21785_v44 = vand.u32 4294901760, %v3633_v12 }
 0x333   : > { %18378 = vmatpush3.msra.mxu1 %v2734_v51  ;;  %v2811_v37 = vsub.f32 %v21722_v28, %v2734_v51 }
 0x334   : > { %18380 = vmatmul.mubr.f32.vlgmr.msra.gmra.mrb[4].mxu1 %v21417_v13  ;;  %18382 = vmatprep.subr.mxu1 %v21284_v0  ;;  %v3705_v49 = vsub.f32 %v3633_v12, %v21785_v44  ;;  %v17252_v12 = vld [vmem:[%s23131_s2 + $0x88] sm:$0xff] }
 0x335   : > { %v2812_v52 = vand.u32 4294901760, %v2811_v37  ;;  %18384 = vmatprep.mubr.msk.f32.mxu1 %vm21285_vm0, %v21284_v0 }
 0x337   : > { %v2813_v53 = vsub.f32 %v2811_v37, %v2812_v52 }
 0x339   : > { %v2814_v54 = vand.u32 4294901760, %v2813_v53  ;;  %v3719_v53 = vand.u32 4294901760, %v3718_v26 }
 0x33b   : > { %18383 = vmatpush3.msra.mxu1 %v2814_v54  ;;  %v3726_v54 = vand.u32 4294901760, %v3725_v27 }
 0x33c   : > { %18385 = vmatmul.mubr.f32.vlgmr.msra.gmra.mrb[4].mxu1 %v21405_v5  ;;  %18387 = vmatprep.subr.mxu1 %v21284_v0 }
 0x33d   : > { %18388 = vmatpush3.msra.mxu1 %v2811_v37  ;;  %18389 = vmatprep.mubr.msk.f32.mxu1 %vm21285_vm0, %v21284_v0  ;;  %v3706_v37 = vand.u32 4294901760, %v3705_v49 }
 0x33e   : > { %18392 = vmatprep.subr.mxu1 %v21284_v0 }
 0x344   : > { %18390 = vmatmul.mubr.f32.vlgmr.msra.gmra.mrb[4].mxu1 %v21409_v7 }
 0x345   : > { %18393 = vmatpush3.msra.mxu1 %v2734_v51  ;;  %18394 = vmatprep.mubr.msk.f32.mxu1 %vm21285_vm0, %v21284_v0 }
 0x346   : > { %18397 = vmatprep.subr.mxu1 %v21284_v0 }
 0x34c   : > { %18395 = vmatmul.mubr.f32.vlgmr.msra.gmra.mrb[4].mxu1 %v21413_v9 }
 0x34d   : > { %18398 = vmatpush3.msra.mxu1 %v2812_v52  ;;  %18399 = vmatprep.mubr.msk.f32.mxu1 %vm21285_vm0, %v21284_v0  ;;  %v21795_v52 = vpack.c.bf16 %v3645_v43, %v3642_v38  ;;  %v4139_v38 = vand.u32 4294901760, %v17252_v12  ;;  %v17253_v43 = vld [vmem:[%s23131_s2 + $0x90] sm:$0xff] }
 0x34e   : > { %18402 = vmatprep.subr.mxu1 %v21284_v0 }
 0x34f   : > { %v4223_v48 = vsub.f32 %v17252_v12, %v4139_v38 }
 0x354   : > { %18400 = vmatmul.mubr.f32.vlgmr.msra.gmra.mrb[4].mxu1 %v21405_v5 }
 0x355   : > { %18403 = vmatpush3.msra.mxu1 %v2734_v51  ;;  %18404 = vmatprep.mubr.msk.f32.mxu1 %vm21285_vm0, %v21284_v0  ;;  %v3738_v51 = vand.u32 4294901760, %v3737_v34 }
 0x356   : > { %18407 = vmatprep.subr.mxu1 %v21284_v0 }
 0x357   : > { %v20061_v32 = vpack.c.bf16 %v3738_v51, %v3731_v50 }
 0x35c   : > { %18405 = vmatmul.mubr.f32.vlgmr.msra.gmra.mrb[4].mxu1 %v21405_v5 }
 0x35d   : > { %18409 = vmatprep.mubr.msk.f32.mxu1 %vm21285_vm0, %v21284_v0 }
 0x42f   : > { %v21750_v55 = vpop.f32.mrb[4].mxu1 }
 0x430   : > { %v3180_v56 = vand.u32 4294901760, %v21750_v55  ;;  %v18406_v58 = vpop.f32.mrb[5].mxu1 }
 0x431   : > { %v3739_v58 = vsub.f32 %v3737_v34, %v3738_v51  ;;  %v4133_v34 = vsel %vm1249_vm2, %v21750_v55, 0 }
 0x432   : > { %v3257_v59 = vsub.f32 %v21750_v55, %v3180_v56  ;;  %18408 = vmatpush3.msra.mxu1 %v3180_v56  ;;  %v21835_v27 = vand.u32 4294901760, %v4133_v34  ;;  %v4224_v55 = vand.u32 4294901760, %v4223_v48 }
 0x433   : > { %18410 = vmatmul.mubr.f32.vlgmr.msra.gmra.mrb[6].mxu1 %v21417_v13  ;;  %18412 = vmatprep.subr.mxu1 %v21284_v0 }
 0x434   : > { %v3258_v60 = vand.u32 4294901760, %v3257_v59  ;;  %18414 = vmatprep.mubr.msk.f32.mxu1 %vm21285_vm0, %v21284_v0 }
 0x436   : > { %v3259_v61 = vsub.f32 %v3257_v59, %v3258_v60 }
 0x438   : > { %v3260_v62 = vand.u32 4294901760, %v3259_v61 }
 0x43a   : > { %18413 = vmatpush3.msra.mxu1 %v3260_v62  ;;  %v3740_v62 = vand.u32 4294901760, %v3739_v58  ;;  %v4225_v58 = vsub.f32 %v4223_v48, %v4224_v55 }
 0x43b   : > { %18415 = vmatmul.mubr.f32.vlgmr.msra.gmra.mrb[6].mxu1 %v21405_v5  ;;  %18417 = vmatprep.subr.mxu1 %v21284_v0 }
 0x43c   : > { %18418 = vmatpush3.msra.mxu1 %v3257_v59  ;;  %18419 = vmatprep.mubr.msk.f32.mxu1 %vm21285_vm0, %v21284_v0  ;;  %v3707_v59 = vsub.f32 %v3705_v49, %v3706_v37 }
 0x43d   : > { %18422 = vmatprep.subr.mxu1 %v21284_v0 }
 0x43e   : > { %v3708_v1 = vand.u32 4294901760, %v3707_v59 }
 0x443   : > { %18420 = vmatmul.mubr.f32.vlgmr.msra.gmra.mrb[6].mxu1 %v21409_v7 }
 0x444   : > { %18423 = vmatpush3.msra.mxu1 %v3180_v56  ;;  %18424 = vmatprep.mubr.msk.f32.mxu1 %vm21285_vm0, %v21284_v0 }
 0x445   : > { %18427 = vmatprep.subr.mxu1 %v21284_v0 }
 0x44b   : > { %18425 = vmatmul.mubr.f32.vlgmr.msra.gmra.mrb[6].mxu1 %v21413_v9 }
 0x44c   : > { %18428 = vmatpush3.msra.mxu1 %v3258_v60  ;;  %18429 = vmatprep.mubr.msk.f32.mxu1 %vm21285_vm0, %v21284_v0  ;;  %v20040_v60 = vpack.c.bf16 %v3726_v54, %v3719_v53  ;;  %v4205_v53 = vsub.f32 %v4133_v34, %v21835_v27  ;;  %v20070_v54 = vpack.c.bf16 %v4139_v38, %v4136_v36  ;;  %v17256_v34 = vld [vmem:[%s23131_s2 + $0xa8] sm:$0xff] }
 0x44d   : > { %18432 = vmatprep.subr.mxu1 %v21284_v0 }
 0x453   : > { %18430 = vmatmul.mubr.f32.vlgmr.msra.gmra.mrb[6].mxu1 %v21405_v5 }
 0x454   : > { %18433 = vmatpush3.msra.mxu1 %v3180_v56  ;;  %18434 = vmatprep.mubr.msk.f32.mxu1 %vm21285_vm0, %v21284_v0  ;;  %v3732_v56 = vsub.f32 %v3730_v33, %v3731_v50  ;;  %v17254_v33 = vld [vmem:[%s23131_s2 + $0x98] sm:$0xff] }
 0x455   : > { %20033 = vmatprep.subr.bf16.mxu1 %v21286_v19  ;;  %v4145_v26 = vand.u32 4294901760, %v17254_v33 }
 0x456   : > { %v3733_v61 = vand.u32 4294901760, %v3732_v56 }
 0x457   : > { %v4237_v51 = vsub.f32 %v17254_v33, %v4145_v26  ;;  %v17255_v33 = vld [vmem:[%s23131_s2 + $0xa0] sm:$0xff] }
 0x458   : > { %v20043_v2 = vpack.c.bf16 %v3740_v62, %v3733_v61  ;;  %v4206_v61 = vand.u32 4294901760, %v4205_v53 }
 0x45b   : > { %18435 = vmatmul.mubr.f32.vlgmr.msra.gmra.mrb[6].mxu1 %v21405_v5 }
 0x45c   : > { %20035 = vmatpush3.bf16.msra.mxu1 %v21792_v25  ;;  %18445 = vmatprep.mubr.msk.f32.mxu1 %vm21285_vm0, %v21284_v0 }
 0x45d   : > { %20036 = vmatprep.subr.bf16.mxu1 %v21286_v19 }
 0x460   : > { %20038 = vmatpush3.bf16.msra.mxu1 %v21795_v52 }
 0x461   : > { %20039 = vmatprep.subr.bf16.mxu1 %v21286_v19 }
 0x463   : > { %18446 = vmatmul.mubr.f32.vlgmr.msra.gmra.mrb[8].mxu1 %v3708_v1  ;;  %v4226_v1 = vand.u32 4294901760, %v4225_v58 }
 0x464   : > { %20041 = vmatpush3.bf16.msra.mxu1 %v20040_v60  ;;  %18456 = vmatprep.mubr.msk.f32.mxu1 %vm21285_vm0, %v21284_v0  ;;  %v4238_v60 = vand.u32 4294901760, %v4237_v51 }
 0x465   : > { %20042 = vmatprep.subr.bf16.mxu1 %v21286_v19 }
 0x468   : > { %20044 = vmatpush3.bf16.msra.mxu1 %v20043_v2 }
 0x469   : > { %20045 = vmatprep.subr.bf16.mxu1 %v21286_v19 }
 0x46b   : > { %18457 = vmatmul.mubr.f32.vlgmr.msra.gmra.mrb[8].mxu1 %v21785_v44 }
 0x46c   : > { %20047 = vmatpush3.bf16.msra.mxu1 %v20046_v3  ;;  %18467 = vmatprep.mubr.msk.f32.mxu1 %vm21285_vm0, %v21284_v0  ;;  %v4239_v3 = vsub.f32 %v4237_v51, %v4238_v60 }
 0x46d   : > { %20048 = vmatprep.subr.bf16.mxu1 %v21286_v19 }
 0x46e   : > { %v4240_v11 = vand.u32 4294901760, %v4239_v3 }
 0x470   : > { %20050 = vmatpush3.bf16.msra.mxu1 %v20049_v6 }
 0x471   : > { %20051 = vmatprep.subr.bf16.mxu1 %v21286_v19 }
 0x473   : > { %18468 = vmatmul.mubr.f32.vlgmr.msra.gmra.mrb[8].mxu1 %v3705_v49  ;;  %v4142_v49 = vand.u32 4294901760, %v17253_v43 }
 0x474   : > { %20053 = vmatpush3.bf16.msra.mxu1 %v21792_v25  ;;  %18478 = vmatprep.mubr.msk.f32.mxu1 %vm21285_vm0, %v21284_v0 }
 0x475   : > { %20054 = vmatprep.subr.bf16.mxu1 %v21286_v19  ;;  %v4230_v50 = vsub.f32 %v17253_v43, %v4142_v49 }
 0x477   : > { %v4231_v59 = vand.u32 4294901760, %v4230_v50  ;;  %v20085_v36 = vpack.c.bf16 %v4237_v51, %v4230_v50  ;;  %v17258_v51 = vld [vmem:[%s23131_s2 + $0xb8] sm:$0xff] }
 0x478   : > { %20056 = vmatpush3.bf16.msra.mxu1 %v21795_v52 }
 0x479   : > { %20057 = vmatprep.subr.bf16.mxu1 %v21286_v19  ;;  %v4232_v2 = vsub.f32 %v4230_v50, %v4231_v59  ;;  %v20097_v43 = vpack.c.bf16 %v4238_v60, %v4231_v59  ;;  %v17257_v50 = vld [vmem:[%s23131_s2 + $0xb0] sm:$0xff] }
 0x47b   : > { %18479 = vmatmul.mubr.f32.vlgmr.msra.gmra.mrb[8].mxu1 %v3706_v37  ;;  %v4217_v37 = vand.u32 4294901760, %v4216_v47 }
 0x47c   : > { %20059 = vmatpush3.bf16.msra.mxu1 %v20058_v10  ;;  %18489 = vmatprep.mubr.msk.f32.mxu1 %vm21285_vm0, %v21284_v0  ;;  %v4233_v10 = vand.u32 4294901760, %v4232_v2 }
 0x47d   : > { %20060 = vmatprep.subr.bf16.mxu1 %v21286_v19  ;;  %v4218_v56 = vsub.f32 %v4216_v47, %v4217_v37  ;;  %v20094_v38 = vpack.c.bf16 %v4224_v55, %v4217_v37  ;;  %v4636_v37 = vand.u32 4294901760, %v17257_v50  ;;  %v4639_v55 = vand.u32 4294901760, %v17258_v51 }
 0x47f   : > { %v4219_v62 = vand.u32 4294901760, %v4218_v56  ;;  %v4724_v58 = vsub.f32 %v17257_v50, %v4636_v37  ;;  %v4731_v59 = vsub.f32 %v17258_v51, %v4639_v55 }
 0x480   : > { %20062 = vmatpush3.bf16.msra.mxu1 %v20061_v32  ;;  %v20082_v32 = vpack.c.bf16 %v4223_v48, %v4216_v47  ;;  %v4630_v47 = vand.u32 4294901760, %v17255_v33  ;;  %v4633_v48 = vand.u32 4294901760, %v17256_v34 }
 0x481   : > { %20063 = vmatprep.subr.bf16.mxu1 %v21286_v19  ;;  %v20076_v6 = vpack.c.bf16 %v4226_v1, %v4219_v62  ;;  %v4725_v2 = vand.u32 4294901760, %v4724_v58  ;;  %v4732_v3 = vand.u32 4294901760, %v4731_v59 }
 0x482   : > { %v20106_v62 = vpack.c.bf16 %v4633_v48, %v4630_v47 }
 0x483   : > { %18490 = vmatmul.mubr.f32.vlgmr.msra.gmra.mrb[8].mxu1 %v21785_v44 }
 0x484   : > { %20065 = vmatpush3.bf16.msra.mxu1 %v21792_v25  ;;  %18500 = vmatprep.mubr.msk.f32.mxu1 %vm21285_vm0, %v21284_v0  ;;  %v21847_v25 = vpack.c.bf16 %v4145_v26, %v4142_v49  ;;  %v4710_v49 = vsub.f32 %v17255_v33, %v4630_v47  ;;  %v4717_v26 = vsub.f32 %v17256_v34, %v4633_v48 }
 0x485   : > { %20066 = vmatprep.subr.bf16.mxu1 %v21286_v19 }
 0x486   : > { %v4718_v56 = vand.u32 4294901760, %v4717_v26 }
 0x488   : > { %20068 = vmatpush3.bf16.msra.mxu1 %v21795_v52  ;;  %v4207_v52 = vsub.f32 %v4205_v53, %v4206_v61 }
 0x489   : > { %20069 = vmatprep.subr.bf16.mxu1 %v21286_v19 }
 0x48a   : > { %v4208_v12 = vand.u32 4294901760, %v4207_v52  ;;  %v4726_v52 = vsub.f32 %v4724_v58, %v4725_v2 }
 0x48b   : > { %18501 = vmatmul.mubr.f32.vlgmr.msra.gmra.mrb[8].mxu1 %v21785_v44  ;;  %v20079_v44 = vpack.c.bf16 %v4240_v11, %v4233_v10  ;;  %v20109_v11 = vpack.c.bf16 %v4639_v55, %v4636_v37 }
 0x48c   : > { %20071 = vmatpush3.bf16.msra.mxu1 %v20070_v54  ;;  %18511 = vmatprep.mubr.msk.f32.mxu1 %vm21285_vm0, %v21284_v0 }
 0x48d   : > { %20072 = vmatprep.subr.bf16.mxu1 %v21286_v19 }
 0x490   : > { %20074 = vmatpush3.bf16.msra.mxu1 %v21847_v25 }
 0x491   : > { %20075 = vmatprep.subr.bf16.mxu1 %v21286_v19 }
 0x493   : > { %18512 = vmatmul.mubr.f32.vlgmr.msra.gmra.mrb[8].mxu1 %v4208_v12  ;;  %v4727_v12 = vand.u32 4294901760, %v4726_v52 }
 0x494   : > { %20077 = vmatpush3.bf16.msra.mxu1 %v20076_v6  ;;  %18522 = vmatprep.mubr.msk.f32.mxu1 %vm21285_vm0, %v21284_v0  ;;  %v4733_v6 = vsub.f32 %v4731_v59, %v4732_v3 }
 0x495   : > { %20078 = vmatprep.subr.bf16.mxu1 %v21286_v19 }
 0x498   : > { %20080 = vmatpush3.bf16.msra.mxu1 %v20079_v44  ;;  %v4734_v44 = vand.u32 4294901760, %v4733_v6 }
 0x499   : > { %20081 = vmatprep.subr.bf16.mxu1 %v21286_v19 }
 0x49b   : > { %18523 = vmatmul.mubr.f32.vlgmr.msra.gmra.mrb[8].mxu1 %v21835_v27 }
 0x49c   : > { %20083 = vmatpush3.bf16.msra.mxu1 %v20082_v32  ;;  %18533 = vmatprep.mubr.msk.f32.mxu1 %vm21285_vm0, %v21284_v0  ;;  %v20118_v32 = vpack.c.bf16 %v4717_v26, %v4710_v49 }
 0x49d   : > { %20084 = vmatprep.subr.bf16.mxu1 %v21286_v19 }
 0x4a0   : > { %20086 = vmatpush3.bf16.msra.mxu1 %v20085_v36  ;;  %v20121_v36 = vpack.c.bf16 %v4731_v59, %v4724_v58 }
 0x4a1   : > { %20087 = vmatprep.subr.bf16.mxu1 %v21286_v19 }
 0x4a3   : > { %18534 = vmatmul.mubr.f32.vlgmr.msra.gmra.mrb[8].mxu1 %v4205_v53  ;;  %v4711_v53 = vand.u32 4294901760, %v4710_v49 }
 0x4a4   : > { %20089 = vmatpush3.bf16.msra.mxu1 %v20070_v54  ;;  %18544 = vmatprep.mubr.msk.f32.mxu1 %vm21285_vm0, %v21284_v0 }
 0x4a5   : > { %20090 = vmatprep.subr.bf16.mxu1 %v21286_v19  ;;  %v4712_v60 = vsub.f32 %v4710_v49, %v4711_v53  ;;  %v17250_v49 = vld [vmem:[%s23116_s4 + $0x1] ss:$0 sm:$0xff] }
 0x4a7   : > { %v4713_v1 = vand.u32 4294901760, %v4712_v60 }
 0x4a8   : > { %20092 = vmatpush3.bf16.msra.mxu1 %v21847_v25 }
 0x4a9   : > { %20093 = vmatprep.subr.bf16.mxu1 %v21286_v19 }
 0x4ab   : > { %18545 = vmatmul.mubr.f32.vlgmr.msra.gmra.mrb[8].mxu1 %v4206_v61  ;;  %v4719_v61 = vsub.f32 %v4717_v26, %v4718_v56 }
 0x4ac   : > { %20095 = vmatpush3.bf16.msra.mxu1 %v20094_v38  ;;  %18555 = vmatprep.mubr.msk.f32.mxu1 %vm21285_vm0, %v21284_v0  ;;  %v20130_v38 = vpack.c.bf16 %v4718_v56, %v4711_v53 }
 0x4ad   : > { %20096 = vmatprep.subr.bf16.mxu1 %v21286_v19 }
 0x4b0   : > { %20098 = vmatpush3.bf16.msra.mxu1 %v20097_v43  ;;  %v20133_v43 = vpack.c.bf16 %v4732_v3, %v4725_v2 }
 0x4b1   : > { %20099 = vmatprep.subr.bf16.mxu1 %v21286_v19 }
 0x4b3   : > { %18556 = vmatmul.mubr.f32.vlgmr.msra.gmra.mrb[8].mxu1 %v21835_v27 }
 0x4b4   : > { %20101 = vmatpush3.bf16.msra.mxu1 %v20070_v54  ;;  %18566 = vmatprep.mubr.msk.f32.mxu1 %vm21285_vm0, %v21284_v0  ;;  %v4720_v54 = vand.u32 4294901760, %v4719_v61 }
 0x4b5   : > { %20102 = vmatprep.subr.bf16.mxu1 %v21286_v19 }
 0x4b6   : > { %v20112_v10 = vpack.c.bf16 %v4720_v54, %v4713_v1 }
 0x4b8   : > { %20104 = vmatpush3.bf16.msra.mxu1 %v21847_v25  ;;  %v20115_v25 = vpack.c.bf16 %v4734_v44, %v4727_v12 }
 0x4b9   : > { %20105 = vmatprep.subr.bf16.mxu1 %v21286_v19 }
 0x4bb   : > { %18567 = vmatmul.mubr.f32.vlgmr.msra.gmra.mrb[8].mxu1 %v21835_v27 }
 0x4bc   : > { %20107 = vmatpush3.bf16.msra.mxu1 %v20106_v62  ;;  %18577 = vmatprep.mubr.msk.f32.mxu1 %vm21285_vm0, %v21284_v0 }
 0x4bd   : > { %20108 = vmatprep.subr.bf16.mxu1 %v21286_v19 }
 0x4c0   : > { %20110 = vmatpush3.bf16.msra.mxu1 %v20109_v11 }
 0x4c1   : > { %20111 = vmatprep.subr.bf16.mxu1 %v21286_v19 }
 0x52e   : > { %v3621_v33 = vpop.f32.mrb[6].mxu1 }
 0x52f   : > { %v4627_v27 = vsel %vm1249_vm2, %v3621_v33, 0  ;;  %v18436_v34 = vpop.f32.mrb[7].mxu1 }
 0x530   : > { %v4698_v47 = vand.u32 4294901760, %v4627_v27 }
 0x532   : > { %v4699_v48 = vsub.f32 %v4627_v27, %v4698_v47 }
 0x534   : > { %v4700_v50 = vand.u32 4294901760, %v4699_v48 }
 0x536   : > { %v4701_v51 = vsub.f32 %v4699_v48, %v4700_v50 }
 0x538   : > { %v4702_v37 = vand.u32 4294901760, %v4701_v51 }
 0x53a   : > { %18578 = vmatmul.mubr.f32.vlgmr.msra.gmra.mrb[8].mxu1 %v4702_v37 }
 0x53b   : > { %20113 = vmatpush3.bf16.msra.mxu1 %v20112_v10  ;;  %18588 = vmatprep.mubr.msk.f32.mxu1 %vm21285_vm0, %v21284_v0  ;;  %v17260_v10 = vld [vmem:[%s23131_s2 + $0xc0] sm:$0xff] }
 0x53c   : > { %20114 = vmatprep.subr.bf16.mxu1 %v21286_v19  ;;  %v6018_v12 = vand.u32 4294901760, %v17260_v10 }
 0x53f   : > { %20116 = vmatpush3.bf16.msra.mxu1 %v20115_v25  ;;  %v17262_v25 = vld [vmem:[%s23131_s2 + $0xd0] sm:$0xff] }
 0x540   : > { %20117 = vmatprep.subr.bf16.mxu1 %v21286_v19  ;;  %v6024_v33 = vand.u32 4294901760, %v17262_v25 }
 0x542   : > { %18589 = vmatmul.mubr.f32.vlgmr.msra.gmra.mrb[8].mxu1 %v4698_v47 }
 0x543   : > { %20119 = vmatpush3.bf16.msra.mxu1 %v20118_v32  ;;  %18599 = vmatprep.mubr.msk.f32.mxu1 %vm21285_vm0, %v21284_v0  ;;  %v17263_v32 = vld [vmem:[%s23131_s2 + $0xd8] sm:$0xff] }
 0x544   : > { %20120 = vmatprep.subr.bf16.mxu1 %v21286_v19  ;;  %v6027_v27 = vand.u32 4294901760, %v17263_v32 }
 0x547   : > { %20122 = vmatpush3.bf16.msra.mxu1 %v20121_v36 }
 0x548   : > { %20123 = vmatprep.subr.bf16.mxu1 %v21286_v19 }
 0x54a   : > { %18600 = vmatmul.mubr.f32.vlgmr.msra.gmra.mrb[8].mxu1 %v4699_v48  ;;  %v6119_v48 = vsub.f32 %v17263_v32, %v6027_v27 }
 0x54b   : > { %20125 = vmatpush3.bf16.msra.mxu1 %v20106_v62  ;;  %18610 = vmatprep.mubr.msk.f32.mxu1 %vm21285_vm0, %v21284_v0 }
 0x54c   : > { %20126 = vmatprep.subr.bf16.mxu1 %v21286_v19 }
 0x54f   : > { %20128 = vmatpush3.bf16.msra.mxu1 %v20109_v11 }
 0x550   : > { %20129 = vmatprep.subr.bf16.mxu1 %v21286_v19 }
 0x552   : > { %18611 = vmatmul.mubr.f32.vlgmr.msra.gmra.mrb[8].mxu1 %v4700_v50 }
 0x553   : > { %20131 = vmatpush3.bf16.msra.mxu1 %v20130_v38  ;;  %18621 = vmatprep.mubr.msk.f32.mxu1 %vm21285_vm0, %v21284_v0  ;;  %v6098_v38 = vsub.f32 %v17260_v10, %v6018_v12 }
 0x554   : > { %20132 = vmatprep.subr.bf16.mxu1 %v21286_v19 }
 0x555   : > { %v6099_v50 = vand.u32 4294901760, %v6098_v38 }
 0x557   : > { %20134 = vmatpush3.bf16.msra.mxu1 %v20133_v43 }
 0x558   : > { %20135 = vmatprep.subr.bf16.mxu1 %v21286_v19 }
 0x55a   : > { %18622 = vmatmul.mubr.f32.vlgmr.msra.gmra.mrb[8].mxu1 %v4698_v47 }
 0x55b   : > { %20137 = vmatpush3.bf16.msra.mxu1 %v20106_v62  ;;  %18632 = vmatprep.mubr.msk.f32.mxu1 %vm21285_vm0, %v21284_v0 }
 0x55c   : > { %20138 = vmatprep.subr.bf16.mxu1 %v21286_v19 }
 0x55f   : > { %20140 = vmatpush3.bf16.msra.mxu1 %v20109_v11  ;;  %v17261_v11 = vld [vmem:[%s23131_s2 + $0xc8] sm:$0xff] }
 0x560   : > { %18893 = vmatprep.subr.mxu1 %v21284_v0  ;;  %v6021_v44 = vand.u32 4294901760, %v17261_v11 }
 0x562   : > { %18633 = vmatmul.mubr.f32.vlgmr.msra.gmra.mrb[8].mxu1 %v4698_v47  ;;  %v6105_v43 = vsub.f32 %v17261_v11, %v6021_v44  ;;  %v6112_v47 = vsub.f32 %v17262_v25, %v6024_v33 }
 0x563   : > { %18895 = vmatprep.mubr.msk.f32.mxu1 %vm21285_vm0, %v21284_v0 }
 0x564   : > { %v6106_v51 = vand.u32 4294901760, %v6105_v43  ;;  %v20157_v25 = vpack.c.bf16 %v6119_v48, %v6112_v47 }
 0x566   : > { %v20166_v32 = vpack.c.bf16 %v6106_v51, %v6099_v50 }
 0x635   : > { %v5110_v26 = vpop.f32.mrb[8].mxu1 }
 0x636   : > { %v21921_v55 = vadd.f32 %v17250_v49, %v5110_v26  ;;  %v18634_v53 = vpop.f32.mrb[9].mxu1  ;;  %v21991_v49 = vpack.c.bf16 %v6021_v44, %v6018_v12  ;;  %v6100_v26 = vsub.f32 %v6098_v38, %v6099_v50  ;;  %v20154_v44 = vpack.c.bf16 %v6105_v43, %v6098_v38  ;;  %v17266_v38 = vld [vmem:[%s23131_s2 + $0xe8] sm:$0xff] }
 0x637   : > { %v6107_v53 = vsub.f32 %v6105_v43, %v6106_v51 }
 0x638   : > { %v5116_v56 = vand.u32 4294901760, %v21921_v55  ;;  %v6015_v36 = vsel %vm1249_vm2, %v21921_v55, 0  ;;  %vm9876_vm5 = vcmp.ge.f32.partialorder %v21921_v55, 0.0 }
 0x639   : > { %v21984_v34 = vand.u32 4294901760, %v6015_v36 }
 0x63a   : > { %18636 = vmatpush3.msra.mxu0 %v5116_v56  ;;  %v5193_v58 = vsub.f32 %v21921_v55, %v5116_v56 }
 0x63b   : > { %18638 = vmatmul.mubr.f32.vlgmr.msra.gmra.mrb[4].mxu0 %v21417_v13  ;;  %18640 = vmatprep.subr.mxu0 %v21284_v0  ;;  %v6087_v37 = vsub.f32 %v6015_v36, %v21984_v34  ;;  %v17265_v36 = vld [vmem:[%s23131_s2 + $0xe0] sm:$0xff] }
 0x63c   : > { %v5194_v59 = vand.u32 4294901760, %v5193_v58  ;;  %18642 = vmatprep.mubr.msk.f32.mxu0 %vm21285_vm0, %v21284_v0 }
 0x63e   : > { %v5195_v60 = vsub.f32 %v5193_v58, %v5194_v59 }
 0x640   : > { %v5196_v61 = vand.u32 4294901760, %v5195_v60  ;;  %v21994_v60 = vpack.c.bf16 %v6027_v27, %v6024_v33  ;;  %v6518_v33 = vand.u32 4294901760, %v17265_v36  ;;  %v6521_v27 = vand.u32 4294901760, %v17266_v38 }
 0x642   : > { %18641 = vmatpush3.msra.mxu0 %v5196_v61  ;;  %v6101_v61 = vand.u32 4294901760, %v6100_v26  ;;  %v6598_v51 = vsub.f32 %v17265_v36, %v6518_v33 }
 0x643   : > { %18643 = vmatmul.mubr.f32.vlgmr.msra.gmra.mrb[4].mxu0 %v21405_v5  ;;  %18645 = vmatprep.subr.mxu0 %v21284_v0 }
 0x644   : > { %18646 = vmatpush3.msra.mxu0 %v5193_v58  ;;  %18647 = vmatprep.mubr.msk.f32.mxu0 %vm21285_vm0, %v21284_v0  ;;  %v6120_v58 = vand.u32 4294901760, %v6119_v48 }
 0x645   : > { %18650 = vmatprep.subr.mxu0 %v21284_v0 }
 0x64b   : > { %18648 = vmatmul.mubr.f32.vlgmr.msra.gmra.mrb[4].mxu0 %v21409_v7 }
 0x64c   : > { %18651 = vmatpush3.msra.mxu0 %v5116_v56  ;;  %18652 = vmatprep.mubr.msk.f32.mxu0 %vm21285_vm0, %v21284_v0 }
 0x64d   : > { %18655 = vmatprep.subr.mxu0 %v21284_v0 }
 0x653   : > { %18653 = vmatmul.mubr.f32.vlgmr.msra.gmra.mrb[4].mxu0 %v21413_v9 }
 0x654   : > { %18656 = vmatpush3.msra.mxu0 %v5194_v59  ;;  %18657 = vmatprep.mubr.msk.f32.mxu0 %vm21285_vm0, %v21284_v0  ;;  %v6088_v59 = vand.u32 4294901760, %v6087_v37 }
 0x655   : > { %18660 = vmatprep.subr.mxu0 %v21284_v0 }
 0x65b   : > { %18658 = vmatmul.mubr.f32.vlgmr.msra.gmra.mrb[4].mxu0 %v21405_v5 }
 0x65c   : > { %18661 = vmatpush3.msra.mxu0 %v5116_v56  ;;  %18662 = vmatprep.mubr.msk.f32.mxu0 %vm21285_vm0, %v21284_v0  ;;  %v6113_v56 = vand.u32 4294901760, %v6112_v47 }
 0x65d   : > { %18665 = vmatprep.subr.mxu0 %v21284_v0 }
 0x65e   : > { %v20169_v43 = vpack.c.bf16 %v6120_v58, %v6113_v56 }
 0x663   : > { %18663 = vmatmul.mubr.f32.vlgmr.msra.gmra.mrb[4].mxu0 %v21405_v5 }
 0x664   : > { %18667 = vmatprep.mubr.msk.f32.mxu0 %vm21285_vm0, %v21284_v0 }
 0x736   : > { %v21949_v62 = vpop.f32.mrb[4].mxu0 }
 0x737   : > { %v5562_v1 = vand.u32 4294901760, %v21949_v62  ;;  %v18664_v2 = vpop.f32.mrb[5].mxu0  ;;  %v6515_v50 = vsel %vm1249_vm2, %v21949_v62, 0 }
 0x738   : > { %v6114_v2 = vsub.f32 %v6112_v47, %v6113_v56  ;;  %v17267_v47 = vld [vmem:[%s23131_s2 + $0xf0] sm:$0xff]  ;;  %v22034_v56 = vand.u32 4294901760, %v6515_v50 }
 0x739   : > { %v5639_v3 = vsub.f32 %v21949_v62, %v5562_v1  ;;  %18666 = vmatpush3.msra.mxu0 %v5562_v1  ;;  %v6524_v26 = vand.u32 4294901760, %v17267_v47 }
 0x73a   : > { %18668 = vmatmul.mubr.f32.vlgmr.msra.gmra.mrb[6].mxu0 %v21417_v13  ;;  %18670 = vmatprep.subr.mxu0 %v21284_v0 }
 0x73b   : > { %v5640_v54 = vand.u32 4294901760, %v5639_v3  ;;  %18672 = vmatprep.mubr.msk.f32.mxu0 %vm21285_vm0, %v21284_v0 }
 0x73d   : > { %v5641_v52 = vsub.f32 %v5639_v3, %v5640_v54 }
 0x73f   : > { %v5642_v6 = vand.u32 4294901760, %v5641_v52 }
 0x741   : > { %18671 = vmatpush3.msra.mxu0 %v5642_v6  ;;  %v6115_v6 = vand.u32 4294901760, %v6114_v2  ;;  %v20178_v2 = vpack.c.bf16 %v6521_v27, %v6518_v33 }
 0x742   : > { %18673 = vmatmul.mubr.f32.vlgmr.msra.gmra.mrb[6].mxu0 %v21405_v5  ;;  %18675 = vmatprep.subr.mxu0 %v21284_v0 }
 0x743   : > { %18676 = vmatpush3.msra.mxu0 %v5639_v3  ;;  %18677 = vmatprep.mubr.msk.f32.mxu0 %vm21285_vm0, %v21284_v0  ;;  %v6121_v3 = vsub.f32 %v6119_v48, %v6120_v58  ;;  %v17268_v48 = vld [vmem:[%s23131_s2 + $0xf8] sm:$0xff]  ;;  %v6612_v58 = vsub.f32 %v17267_v47, %v6524_v26 }
 0x744   : > { %18680 = vmatprep.subr.mxu0 %v21284_v0 }
 0x745   : > { %v6122_v10 = vand.u32 4294901760, %v6121_v3 }
 0x747   : > { %v20151_v12 = vpack.c.bf16 %v6122_v10, %v6115_v6 }
 0x74a   : > { %18678 = vmatmul.mubr.f32.vlgmr.msra.gmra.mrb[6].mxu0 %v21409_v7 }
 0x74b   : > { %18681 = vmatpush3.msra.mxu0 %v5562_v1  ;;  %18682 = vmatprep.mubr.msk.f32.mxu0 %vm21285_vm0, %v21284_v0 }
 0x74c   : > { %18685 = vmatprep.subr.mxu0 %v21284_v0 }
 0x752   : > { %18683 = vmatmul.mubr.f32.vlgmr.msra.gmra.mrb[6].mxu0 %v21413_v9 }
 0x753   : > { %18686 = vmatpush3.msra.mxu0 %v5640_v54  ;;  %18687 = vmatprep.mubr.msk.f32.mxu0 %vm21285_vm0, %v21284_v0  ;;  %v6089_v54 = vsub.f32 %v6087_v37, %v6088_v59 }
 0x754   : > { %18690 = vmatprep.subr.mxu0 %v21284_v0 }
 0x755   : > { %v6090_v11 = vand.u32 4294901760, %v6089_v54 }
 0x75a   : > { %18688 = vmatmul.mubr.f32.vlgmr.msra.gmra.mrb[6].mxu0 %v21405_v5 }
 0x75b   : > { %18691 = vmatpush3.msra.mxu0 %v5562_v1  ;;  %18692 = vmatprep.mubr.msk.f32.mxu0 %vm21285_vm0, %v21284_v0  ;;  %v6108_v1 = vand.u32 4294901760, %v6107_v53  ;;  %v6527_v53 = vand.u32 4294901760, %v17268_v48 }
 0x75c   : > { %20141 = vmatprep.subr.bf16.mxu0 %v21286_v19 }
 0x75d   : > { %v20148_v52 = vpack.c.bf16 %v6108_v1, %v6101_v61  ;;  %v6599_v61 = vand.u32 4294901760, %v6598_v51  ;;  %v6587_v1 = vsub.f32 %v6515_v50, %v22034_v56  ;;  %v17269_v50 = vld [vmem:[%s23131_s2 + $0x100] sm:$0xff] }
 0x75f   : > { %v6600_v3 = vsub.f32 %v6598_v51, %v6599_v61  ;;  %v6588_v10 = vand.u32 4294901760, %v6587_v1 }
 0x762   : > { %18693 = vmatmul.mubr.f32.vlgmr.msra.gmra.mrb[6].mxu0 %v21405_v5 }
 0x763   : > { %20143 = vmatpush3.bf16.msra.mxu0 %v21991_v49  ;;  %18703 = vmatprep.mubr.msk.f32.mxu0 %vm21285_vm0, %v21284_v0 }
 0x764   : > { %20144 = vmatprep.subr.bf16.mxu0 %v21286_v19 }
 0x767   : > { %20146 = vmatpush3.bf16.msra.mxu0 %v21994_v60 }
 0x768   : > { %20147 = vmatprep.subr.bf16.mxu0 %v21286_v19 }
 0x76a   : > { %18704 = vmatmul.mubr.f32.vlgmr.msra.gmra.mrb[8].mxu0 %v6090_v11  ;;  %v6601_v11 = vand.u32 4294901760, %v6600_v3 }
 0x76b   : > { %20149 = vmatpush3.bf16.msra.mxu0 %v20148_v52  ;;  %18714 = vmatprep.mubr.msk.f32.mxu0 %vm21285_vm0, %v21284_v0  ;;  %v6613_v52 = vand.u32 4294901760, %v6612_v58 }
 0x76c   : > { %20150 = vmatprep.subr.bf16.mxu0 %v21286_v19 }
 0x76f   : > { %20152 = vmatpush3.bf16.msra.mxu0 %v20151_v12 }
 0x770   : > { %20153 = vmatprep.subr.bf16.mxu0 %v21286_v19 }
 0x772   : > { %18715 = vmatmul.mubr.f32.vlgmr.msra.gmra.mrb[8].mxu0 %v21984_v34 }
 0x773   : > { %20155 = vmatpush3.bf16.msra.mxu0 %v20154_v44  ;;  %18725 = vmatprep.mubr.msk.f32.mxu0 %vm21285_vm0, %v21284_v0  ;;  %v6614_v44 = vsub.f32 %v6612_v58, %v6613_v52 }
 0x774   : > { %20156 = vmatprep.subr.bf16.mxu0 %v21286_v19 }
 0x775   : > { %v6615_v36 = vand.u32 4294901760, %v6614_v44 }
 0x777   : > { %20158 = vmatpush3.bf16.msra.mxu0 %v20157_v25 }
 0x778   : > { %20159 = vmatprep.subr.bf16.mxu0 %v21286_v19 }
 0x77a   : > { %18726 = vmatmul.mubr.f32.vlgmr.msra.gmra.mrb[8].mxu0 %v6087_v37  ;;  %v6605_v37 = vsub.f32 %v17266_v38, %v6521_v27 }
 0x77b   : > { %20161 = vmatpush3.bf16.msra.mxu0 %v21991_v49  ;;  %18736 = vmatprep.mubr.msk.f32.mxu0 %vm21285_vm0, %v21284_v0 }
 0x77c   : > { %20162 = vmatprep.subr.bf16.mxu0 %v21286_v19  ;;  %v6606_v62 = vand.u32 4294901760, %v6605_v37  ;;  %v20190_v33 = vpack.c.bf16 %v6605_v37, %v6598_v51  ;;  %v17270_v51 = vld [vmem:[%s23131_s2 + $0x108] sm:$0xff] }
 0x77e   : > { %v6607_v54 = vsub.f32 %v6605_v37, %v6606_v62  ;;  %v20202_v47 = vpack.c.bf16 %v6606_v62, %v6599_v61  ;;  %v7012_v37 = vand.u32 4294901760, %v17269_v50  ;;  %v17272_v61 = vld [vmem:[%s23131_s2 + $0x118] sm:$0xff] }
 0x77f   : > { %20164 = vmatpush3.bf16.msra.mxu0 %v21994_v60 }
 0x780   : > { %20165 = vmatprep.subr.bf16.mxu0 %v21286_v19  ;;  %v6608_v12 = vand.u32 4294901760, %v6607_v54 }
 0x782   : > { %18737 = vmatmul.mubr.f32.vlgmr.msra.gmra.mrb[8].mxu0 %v6088_v59  ;;  %v6619_v59 = vsub.f32 %v17268_v48, %v6527_v53 }
 0x783   : > { %20167 = vmatpush3.bf16.msra.mxu0 %v20166_v32  ;;  %18747 = vmatprep.mubr.msk.f32.mxu0 %vm21285_vm0, %v21284_v0  ;;  %v20184_v32 = vpack.c.bf16 %v6608_v12, %v6601_v11 }
 0x784   : > { %20168 = vmatprep.subr.bf16.mxu0 %v21286_v19  ;;  %v6620_v6 = vand.u32 4294901760, %v6619_v59  ;;  %v20193_v27 = vpack.c.bf16 %v6619_v59, %v6612_v58 }
 0x786   : > { %v6621_v25 = vsub.f32 %v6619_v59, %v6620_v6  ;;  %v20205_v48 = vpack.c.bf16 %v6620_v6, %v6613_v52  ;;  %v17271_v59 = vld [vmem:[%s23131_s2 + $0x110] sm:$0xff] }
 0x787   : > { %20170 = vmatpush3.bf16.msra.mxu0 %v20169_v43  ;;  %v7018_v62 = vand.u32 4294901760, %v17271_v59 }
 0x788   : > { %20171 = vmatprep.subr.bf16.mxu0 %v21286_v19  ;;  %v6622_v38 = vand.u32 4294901760, %v6621_v25 }
 0x789   : > { %v7106_v52 = vsub.f32 %v17271_v59, %v7018_v62 }
 0x78a   : > { %18748 = vmatmul.mubr.f32.vlgmr.msra.gmra.mrb[8].mxu0 %v21984_v34 }
 0x78b   : > { %20173 = vmatpush3.bf16.msra.mxu0 %v21991_v49  ;;  %18758 = vmatprep.mubr.msk.f32.mxu0 %vm21285_vm0, %v21284_v0  ;;  %v22046_v49 = vpack.c.bf16 %v6527_v53, %v6524_v26  ;;  %v7015_v26 = vand.u32 4294901760, %v17270_v51  ;;  %v7092_v53 = vsub.f32 %v17269_v50, %v7012_v37  ;;  %v7107_v25 = vand.u32 4294901760, %v7106_v52 }
 0x78c   : > { %20174 = vmatprep.subr.bf16.mxu0 %v21286_v19 }
 0x78d   : > { %v7099_v58 = vsub.f32 %v17270_v51, %v7015_v26  ;;  %v7093_v3 = vand.u32 4294901760, %v7092_v53  ;;  %v20214_v12 = vpack.c.bf16 %v7015_v26, %v7012_v37 }
 0x78f   : > { %20176 = vmatpush3.bf16.msra.mxu0 %v21994_v60  ;;  %v6589_v60 = vsub.f32 %v6587_v1, %v6588_v10  ;;  %v7100_v54 = vand.u32 4294901760, %v7099_v58 }
 0x790   : > { %20177 = vmatprep.subr.bf16.mxu0 %v21286_v19 }
 0x791   : > { %v6590_v43 = vand.u32 4294901760, %v6589_v60  ;;  %v7101_v11 = vsub.f32 %v7099_v58, %v7100_v54 }
 0x792   : > { %18759 = vmatmul.mubr.f32.vlgmr.msra.gmra.mrb[8].mxu0 %v21984_v34  ;;  %v20187_v34 = vpack.c.bf16 %v6622_v38, %v6615_v36 }
 0x793   : > { %20179 = vmatpush3.bf16.msra.mxu0 %v20178_v2  ;;  %18769 = vmatprep.mubr.msk.f32.mxu0 %vm21285_vm0, %v21284_v0 }
 0x794   : > { %20180 = vmatprep.subr.bf16.mxu0 %v21286_v19 }
 0x797   : > { %20182 = vmatpush3.bf16.msra.mxu0 %v22046_v49 }
 0x798   : > { %20183 = vmatprep.subr.bf16.mxu0 %v21286_v19 }
 0x79a   : > { %18770 = vmatmul.mubr.f32.vlgmr.msra.gmra.mrb[8].mxu0 %v6590_v43 }
 0x79b   : > { %20185 = vmatpush3.bf16.msra.mxu0 %v20184_v32  ;;  %18780 = vmatprep.mubr.msk.f32.mxu0 %vm21285_vm0, %v21284_v0  ;;  %v7108_v32 = vsub.f32 %v7106_v52, %v7107_v25 }
 0x79c   : > { %20186 = vmatprep.subr.bf16.mxu0 %v21286_v19 }
 0x79f   : > { %20188 = vmatpush3.bf16.msra.mxu0 %v20187_v34  ;;  %v7109_v34 = vand.u32 4294901760, %v7108_v32 }
 0x7a0   : > { %20189 = vmatprep.subr.bf16.mxu0 %v21286_v19 }
 0x7a2   : > { %18781 = vmatmul.mubr.f32.vlgmr.msra.gmra.mrb[8].mxu0 %v22034_v56 }
 0x7a3   : > { %20191 = vmatpush3.bf16.msra.mxu0 %v20190_v33  ;;  %18791 = vmatprep.mubr.msk.f32.mxu0 %vm21285_vm0, %v21284_v0 }
 0x7a4   : > { %20192 = vmatprep.subr.bf16.mxu0 %v21286_v19 }
 0x7a7   : > { %20194 = vmatpush3.bf16.msra.mxu0 %v20193_v27  ;;  %v20226_v27 = vpack.c.bf16 %v7099_v58, %v7092_v53 }
 0x7a8   : > { %20195 = vmatprep.subr.bf16.mxu0 %v21286_v19 }
 0x7aa   : > { %18792 = vmatmul.mubr.f32.vlgmr.msra.gmra.mrb[8].mxu0 %v6587_v1  ;;  %v7021_v1 = vand.u32 4294901760, %v17272_v61 }
 0x7ab   : > { %20197 = vmatpush3.bf16.msra.mxu0 %v20178_v2  ;;  %18802 = vmatprep.mubr.msk.f32.mxu0 %vm21285_vm0, %v21284_v0 }
 0x7ac   : > { %20198 = vmatprep.subr.bf16.mxu0 %v21286_v19  ;;  %v7113_v6 = vsub.f32 %v17272_v61, %v7021_v1  ;;  %v20217_v43 = vpack.c.bf16 %v7021_v1, %v7018_v62 }
 0x7ae   : > { %v7114_v60 = vand.u32 4294901760, %v7113_v6 }
 0x7af   : > { %20200 = vmatpush3.bf16.msra.mxu0 %v22046_v49 }
 0x7b0   : > { %20201 = vmatprep.subr.bf16.mxu0 %v21286_v19  ;;  %v7115_v36 = vsub.f32 %v7113_v6, %v7114_v60  ;;  %v20241_v50 = vpack.c.bf16 %v7114_v60, %v7107_v25 }
 0x7b2   : > { %18803 = vmatmul.mubr.f32.vlgmr.msra.gmra.mrb[8].mxu0 %v6588_v10  ;;  %v7094_v10 = vsub.f32 %v7092_v53, %v7093_v3  ;;  %v7116_v33 = vand.u32 4294901760, %v7115_v36  ;;  %v17264_v53 = vld [vmem:[%s23116_s4 + $0x2] ss:$0 sm:$0xff] }
 0x7b3   : > { %20203 = vmatpush3.bf16.msra.mxu0 %v20202_v47  ;;  %18813 = vmatprep.mubr.msk.f32.mxu0 %vm21285_vm0, %v21284_v0  ;;  %v20229_v47 = vpack.c.bf16 %v7113_v6, %v7106_v52  ;;  %v21287_v52 = vmov -1.0  }
 0x7b4   : > { %20204 = vmatprep.subr.bf16.mxu0 %v21286_v19  ;;  %v7095_v44 = vand.u32 4294901760, %v7094_v10 }
 0x7b7   : > { %20206 = vmatpush3.bf16.msra.mxu0 %v20205_v48  ;;  %v20238_v48 = vpack.c.bf16 %v7100_v54, %v7093_v3 }
 0x7b8   : > { %20207 = vmatprep.subr.bf16.mxu0 %v21286_v19 }
 0x7ba   : > { %18814 = vmatmul.mubr.f32.vlgmr.msra.gmra.mrb[8].mxu0 %v22034_v56 }
 0x7bb   : > { %20209 = vmatpush3.bf16.msra.mxu0 %v20178_v2  ;;  %18824 = vmatprep.mubr.msk.f32.mxu0 %vm21285_vm0, %v21284_v0  ;;  %v7102_v2 = vand.u32 4294901760, %v7101_v11 }
 0x7bc   : > { %20210 = vmatprep.subr.bf16.mxu0 %v21286_v19 }
 0x7bd   : > { %v20220_v38 = vpack.c.bf16 %v7102_v2, %v7095_v44 }
 0x7bf   : > { %20212 = vmatpush3.bf16.msra.mxu0 %v22046_v49  ;;  %v20223_v49 = vpack.c.bf16 %v7116_v33, %v7109_v34 }
 0x7c0   : > { %20213 = vmatprep.subr.bf16.mxu0 %v21286_v19 }
 0x7c2   : > { %18825 = vmatmul.mubr.f32.vlgmr.msra.gmra.mrb[8].mxu0 %v22034_v56 }
 0x7c3   : > { %20215 = vmatpush3.bf16.msra.mxu0 %v20214_v12  ;;  %18835 = vmatprep.mubr.msk.f32.mxu0 %vm21285_vm0, %v21284_v0 }
 0x7c4   : > { %20216 = vmatprep.subr.bf16.mxu0 %v21286_v19 }
 0x7c7   : > { %20218 = vmatpush3.bf16.msra.mxu0 %v20217_v43 }
 0x7c8   : > { %20219 = vmatprep.subr.bf16.mxu0 %v21286_v19 }
 0x835   : > { %v6003_v51 = vpop.f32.mrb[6].mxu0 }
 0x836   : > { %v7009_v56 = vsel %vm1249_vm2, %v6003_v51, 0  ;;  %v18694_v37 = vpop.f32.mrb[7].mxu0 }
 0x837   : > { %v7080_v26 = vand.u32 4294901760, %v7009_v56  ;;  %v17279_v37 = vld [vmem:[%s23115_s3 + $0xf0] sm:$0xff] }
 0x839   : > { %v7081_v59 = vsub.f32 %v7009_v56, %v7080_v26 }
 0x83b   : > { %v7082_v61 = vand.u32 4294901760, %v7081_v59 }
 0x83d   : > { %v7083_v62 = vsub.f32 %v7081_v59, %v7082_v61 }
 0x83f   : > { %v7084_v1 = vand.u32 4294901760, %v7083_v62 }
 0x841   : > { %18836 = vmatmul.mubr.f32.vlgmr.msra.gmra.mrb[8].mxu0 %v7084_v1  ;;  %v8415_v1 = vand.u32 4294901760, %v17279_v37 }
 0x842   : > { %20221 = vmatpush3.bf16.msra.mxu0 %v20220_v38  ;;  %18846 = vmatprep.mubr.msk.f32.mxu0 %vm21285_vm0, %v21284_v0 }
 0x843   : > { %20222 = vmatprep.subr.bf16.mxu0 %v21286_v19 }
 0x846   : > { %20224 = vmatpush3.bf16.msra.mxu0 %v20223_v49 }
 0x847   : > { %20225 = vmatprep.subr.bf16.mxu0 %v21286_v19 }
 0x849   : > { %18847 = vmatmul.mubr.f32.vlgmr.msra.gmra.mrb[8].mxu0 %v7080_v26 }
 0x84a   : > { %20227 = vmatpush3.bf16.msra.mxu0 %v20226_v27  ;;  %18857 = vmatprep.mubr.msk.f32.mxu0 %vm21285_vm0, %v21284_v0 }
 0x84b   : > { %20228 = vmatprep.subr.bf16.mxu0 %v21286_v19 }
 0x84e   : > { %20230 = vmatpush3.bf16.msra.mxu0 %v20229_v47 }
 0x84f   : > { %20231 = vmatprep.subr.bf16.mxu0 %v21286_v19 }
 0x851   : > { %18858 = vmatmul.mubr.f32.vlgmr.msra.gmra.mrb[8].mxu0 %v7081_v59 }
 0x852   : > { %20233 = vmatpush3.bf16.msra.mxu0 %v20214_v12  ;;  %18868 = vmatprep.mubr.msk.f32.mxu0 %vm21285_vm0, %v21284_v0 }
 0x853   : > { %20234 = vmatprep.subr.bf16.mxu0 %v21286_v19 }
 0x856   : > { %20236 = vmatpush3.bf16.msra.mxu0 %v20217_v43 }
 0x857   : > { %20237 = vmatprep.subr.bf16.mxu0 %v21286_v19 }
 0x859   : > { %18869 = vmatmul.mubr.f32.vlgmr.msra.gmra.mrb[8].mxu0 %v7082_v61 }
 0x85a   : > { %20239 = vmatpush3.bf16.msra.mxu0 %v20238_v48  ;;  %18879 = vmatprep.mubr.msk.f32.mxu0 %vm21285_vm0, %v21284_v0  ;;  %v17277_v48 = vld [vmem:[%s23115_s3 + $0xe0] sm:$0xff] }
 0x85b   : > { %20240 = vmatprep.subr.bf16.mxu0 %v21286_v19  ;;  %v8409_v51 = vand.u32 4294901760, %v17277_v48 }
 0x85d   : > { %v8489_v61 = vsub.f32 %v17277_v48, %v8409_v51 }
 0x85e   : > { %20242 = vmatpush3.bf16.msra.mxu0 %v20241_v50  ;;  %v17278_v50 = vld [vmem:[%s23115_s3 + $0xe8] sm:$0xff] }
 0x85f   : > { %20243 = vmatprep.subr.bf16.mxu0 %v21286_v19  ;;  %v8412_v56 = vand.u32 4294901760, %v17278_v50 }
 0x861   : > { %18880 = vmatmul.mubr.f32.vlgmr.msra.gmra.mrb[8].mxu0 %v7080_v26  ;;  %v8496_v62 = vsub.f32 %v17278_v50, %v8412_v56 }
 0x862   : > { %20245 = vmatpush3.bf16.msra.mxu0 %v20214_v12  ;;  %18890 = vmatprep.mubr.msk.f32.mxu0 %vm21285_vm0, %v21284_v0 }
 0x863   : > { %20246 = vmatprep.subr.bf16.mxu0 %v21286_v19 }
 0x866   : > { %20248 = vmatpush3.bf16.msra.mxu0 %v20217_v43 }
 0x867   : > { %19151 = vmatprep.subr.mxu0 %v21284_v0 }
 0x869   : > { %18891 = vmatmul.mubr.f32.vlgmr.msra.gmra.mrb[8].mxu0 %v7080_v26  ;;  %v17280_v26 = vld [vmem:[%s23115_s3 + $0xf8] sm:$0xff] }
 0x86a   : > { %19153 = vmatprep.mubr.msk.f32.mxu0 %vm21285_vm0, %v21284_v0 }
 0x93c   : > { %v7492_v58 = vpop.f32.mrb[8].mxu0 }
 0x93d   : > { %v20684_v3 = vadd.f32 %v17264_v53, %v7492_v58  ;;  %v18892_v54 = vpop.f32.mrb[9].mxu0  ;;  %v8418_v53 = vand.u32 4294901760, %v17280_v26 }
 0x93f   : > { %vm7497_vm3 = vcmp.ge.f32.partialorder %v20684_v3, 0.0  ;;  %16990 = vst.msk [vmem:[%s23123_s21] sm:$0xff] %vm1249_vm2, %v20684_v3  ;;  %v8510_v54 = vsub.f32 %v17280_v26, %v8418_v53  ;;  %s21128_s21 = scalar_lea.vmem %s22973_s24, 128 }
 0x940   : > { %v7498_v6 = vsel %vm7497_vm3, 1.0, %v21287_v52  ;;  %p21129_p11 = scmp.ne.s32.totalorder %s22973_s24, %s21128_s21 }
 0x941   : > { %v7499_v10 = vmul.f32 1e-06, %v7498_v6  ;;  %v8490_v6 = vand.u32 4294901760, %v8489_v61 }
 0x942   : > { %p21130_p12 = pnand %p21129_p11, %p21378_p5 }
 0x943   : > { %v7500_v11 = vadd.f32 %v20684_v3, %v7499_v10  ;;  %v8497_v10 = vand.u32 4294901760, %v8496_v62 }
 0x944   : > { %p21131_p13 = pneg %p21130_p12 }
 0x945   : > { %21121 = vrcp.f32 %v7500_v11 }
 0x94f   : > { %v21122_v12 = vpop.eup %21121 }
 0x950   : > { %v22131_v44 = vmul.f32 %v21122_v12, %v20684_v3  ;;  %v8503_v3 = vsub.f32 %v17279_v37, %v8415_v1  ;;  %v22196_v12 = vpack.c.bf16 %v8412_v56, %v8409_v51  ;;  %v20262_v37 = vpack.c.bf16 %v8496_v62, %v8489_v61 }
 0x952   : > { %v7504_v25 = vand.u32 4294901760, %v22131_v44  ;;  %v20265_v26 = vpack.c.bf16 %v8510_v54, %v8503_v3 }
 0x954   : > { %18894 = vmatpush3.msra.mxu1 %v7504_v25  ;;  %v7581_v60 = vsub.f32 %v22131_v44, %v7504_v25 }
 0x955   : > { %18896 = vmatmul.mubr.f32.vlgmr.msra.gmra.mrb[10].mxu1 %v21417_v13  ;;  %18898 = vmatprep.subr.mxu1 %v21284_v0 }
 0x956   : > { %v7582_v2 = vand.u32 4294901760, %v7581_v60  ;;  %18900 = vmatprep.mubr.msk.f32.mxu1 %vm21285_vm0, %v21284_v0 }
 0x958   : > { %v7583_v32 = vsub.f32 %v7581_v60, %v7582_v2 }
 0x95a   : > { %v7584_v36 = vand.u32 4294901760, %v7583_v32  ;;  %v8511_v32 = vand.u32 4294901760, %v8510_v54 }
 0x95c   : > { %18899 = vmatpush3.msra.mxu1 %v7584_v36 }
 0x95d   : > { %18901 = vmatmul.mubr.f32.vlgmr.msra.gmra.mrb[10].mxu1 %v21405_v5  ;;  %18903 = vmatprep.subr.mxu1 %v21284_v0 }
 0x95e   : > { %18904 = vmatpush3.msra.mxu1 %v7581_v60  ;;  %18905 = vmatprep.mubr.msk.f32.mxu1 %vm21285_vm0, %v21284_v0  ;;  %v8498_v60 = vsub.f32 %v8496_v62, %v8497_v10  ;;  %v17274_v62 = vld [vmem:[%s23115_s3 + $0xc8] sm:$0xff] }
 0x95f   : > { %18908 = vmatprep.subr.mxu1 %v21284_v0 }
 0x965   : > { %18906 = vmatmul.mubr.f32.vlgmr.msra.gmra.mrb[10].mxu1 %v21409_v7 }
 0x966   : > { %18909 = vmatpush3.msra.mxu1 %v7504_v25  ;;  %18910 = vmatprep.mubr.msk.f32.mxu1 %vm21285_vm0, %v21284_v0 }
 0x967   : > { %18913 = vmatprep.subr.mxu1 %v21284_v0 }
 0x96d   : > { %18911 = vmatmul.mubr.f32.vlgmr.msra.gmra.mrb[10].mxu1 %v21413_v9 }
 0x96e   : > { %18914 = vmatpush3.msra.mxu1 %v7582_v2  ;;  %18915 = vmatprep.mubr.msk.f32.mxu1 %vm21285_vm0, %v21284_v0  ;;  %v8504_v2 = vand.u32 4294901760, %v8503_v3 }
 0x96f   : > { %18918 = vmatprep.subr.mxu1 %v21284_v0 }
 0x975   : > { %18916 = vmatmul.mubr.f32.vlgmr.msra.gmra.mrb[10].mxu1 %v21405_v5 }
 0x976   : > { %18919 = vmatpush3.msra.mxu1 %v7504_v25  ;;  %18920 = vmatprep.mubr.msk.f32.mxu1 %vm21285_vm0, %v21284_v0  ;;  %v8491_v25 = vsub.f32 %v8489_v61, %v8490_v6  ;;  %v17273_v61 = vld [vmem:[%s23115_s3 + $0xc0] sm:$0xff] }
 0x977   : > { %18923 = vmatprep.subr.mxu1 %v21284_v0 }
 0x97d   : > { %18921 = vmatmul.mubr.f32.vlgmr.msra.gmra.mrb[10].mxu1 %v21405_v5 }
 0x97e   : > { %18925 = vmatprep.mubr.msk.f32.mxu1 %vm21285_vm0, %v21284_v0 }
 0xa50   : > { %v7945_v38 = vpop.f32.mrb[10].mxu1 }
 0xa51   : > { %v7950_v43 = vand.u32 4294901760, %v7945_v38  ;;  %v18922_v34 = vpop.f32.mrb[11].mxu1  ;;  %v8406_v59 = vsel %vm1249_vm2, %v7945_v38, 0 }
 0xa52   : > { %v22189_v58 = vand.u32 4294901760, %v8406_v59  ;;  %v8499_v34 = vand.u32 4294901760, %v8498_v60 }
 0xa53   : > { %v8027_v33 = vsub.f32 %v7945_v38, %v7950_v43  ;;  %18924 = vmatpush3.msra.mxu1 %v7950_v43  ;;  %v22199_v38 = vpack.c.bf16 %v8418_v53, %v8415_v1  ;;  %v20277_v1 = vpack.c.bf16 %v8511_v32, %v8504_v2  ;;  %v8897_v53 = vand.u32 4294901760, %v17273_v61 }
 0xa54   : > { %18926 = vmatmul.mubr.f32.vlgmr.msra.gmra.mrb[12].mxu1 %v21417_v13  ;;  %18928 = vmatprep.subr.mxu1 %v21284_v0  ;;  %v8478_v11 = vsub.f32 %v8406_v59, %v22189_v58  ;;  %v20274_v59 = vpack.c.bf16 %v8497_v10, %v8490_v6  ;;  %v17276_v6 = vld [vmem:[%s23115_s3 + $0xd8] sm:$0xff]  ;;  %v8894_v10 = vsel %vm1249_vm2, %v22131_v44, 0 }
 0xa55   : > { %v8028_v49 = vand.u32 4294901760, %v8027_v33  ;;  %18930 = vmatprep.mubr.msk.f32.mxu1 %vm21285_vm0, %v21284_v0 }
 0xa56   : > { %v8479_v36 = vand.u32 4294901760, %v8478_v11 }
 0xa57   : > { %v8029_v27 = vsub.f32 %v8027_v33, %v8028_v49 }
 0xa59   : > { %v8030_v47 = vand.u32 4294901760, %v8029_v27  ;;  %v8480_v27 = vsub.f32 %v8478_v11, %v8479_v36 }
 0xa5b   : > { %18929 = vmatpush3.msra.mxu1 %v8030_v47  ;;  %v8481_v51 = vand.u32 4294901760, %v8480_v27 }
 0xa5c   : > { %18931 = vmatmul.mubr.f32.vlgmr.msra.gmra.mrb[12].mxu1 %v21405_v5  ;;  %18933 = vmatprep.subr.mxu1 %v21284_v0 }
 0xa5d   : > { %18934 = vmatpush3.msra.mxu1 %v8027_v33  ;;  %18935 = vmatprep.mubr.msk.f32.mxu1 %vm21285_vm0, %v21284_v0  ;;  %v8505_v33 = vsub.f32 %v8503_v3, %v8504_v2  ;;  %v8900_v3 = vand.u32 4294901760, %v17274_v62  ;;  %v8906_v2 = vand.u32 4294901760, %v17276_v6 }
 0xa5e   : > { %18938 = vmatprep.subr.mxu1 %v21284_v0 }
 0xa5f   : > { %v8506_v48 = vand.u32 4294901760, %v8505_v33 }
 0xa64   : > { %18936 = vmatmul.mubr.f32.vlgmr.msra.gmra.mrb[12].mxu1 %v21409_v7 }
 0xa65   : > { %18939 = vmatpush3.msra.mxu1 %v7950_v43  ;;  %18940 = vmatprep.mubr.msk.f32.mxu1 %vm21285_vm0, %v21284_v0 }
 0xa66   : > { %18943 = vmatprep.subr.mxu1 %v21284_v0 }
 0xa6c   : > { %18941 = vmatmul.mubr.f32.vlgmr.msra.gmra.mrb[12].mxu1 %v21413_v9 }
 0xa6d   : > { %18944 = vmatpush3.msra.mxu1 %v8028_v49  ;;  %18945 = vmatprep.mubr.msk.f32.mxu1 %vm21285_vm0, %v21284_v0  ;;  %v8512_v49 = vsub.f32 %v8510_v54, %v8511_v32  ;;  %v17275_v54 = vld [vmem:[%s23115_s3 + $0xd0] sm:$0xff]  ;;  %v22239_v32 = vand.u32 4294901760, %v8894_v10 }
 0xa6e   : > { %18948 = vmatprep.subr.mxu1 %v21284_v0  ;;  %v8903_v60 = vand.u32 4294901760, %v17275_v54 }
 0xa6f   : > { %v8513_v50 = vand.u32 4294901760, %v8512_v49  ;;  %v8966_v33 = vsub.f32 %v8894_v10, %v22239_v32  ;;  %v20286_v49 = vpack.c.bf16 %v8900_v3, %v8897_v53 }
 0xa71   : > { %v20259_v56 = vpack.c.bf16 %v8513_v50, %v8506_v48 }
 0xa74   : > { %18946 = vmatmul.mubr.f32.vlgmr.msra.gmra.mrb[12].mxu1 %v21405_v5 }
 0xa75   : > { %18949 = vmatpush3.msra.mxu1 %v7950_v43  ;;  %18950 = vmatprep.mubr.msk.f32.mxu1 %vm21285_vm0, %v21284_v0  ;;  %v8492_v43 = vand.u32 4294901760, %v8491_v25  ;;  %v8984_v25 = vsub.f32 %v17274_v62, %v8900_v3 }
 0xa76   : > { %20249 = vmatprep.subr.bf16.mxu1 %v21286_v19 }
 0xa77   : > { %v20256_v47 = vpack.c.bf16 %v8499_v34, %v8492_v43  ;;  %v8998_v43 = vsub.f32 %v17276_v6, %v8906_v2  ;;  %v8985_v44 = vand.u32 4294901760, %v8984_v25 }
 0xa79   : > { %v8999_v50 = vand.u32 4294901760, %v8998_v43 }
 0xa7c   : > { %18951 = vmatmul.mubr.f32.vlgmr.msra.gmra.mrb[12].mxu1 %v21405_v5 }
 0xa7d   : > { %20251 = vmatpush3.bf16.msra.mxu1 %v22196_v12  ;;  %18961 = vmatprep.mubr.msk.f32.mxu1 %vm21285_vm0, %v21284_v0 }
 0xa7e   : > { %20252 = vmatprep.subr.bf16.mxu1 %v21286_v19 }
 0xa81   : > { %20254 = vmatpush3.bf16.msra.mxu1 %v22199_v38 }
 0xa82   : > { %20255 = vmatprep.subr.bf16.mxu1 %v21286_v19 }
 0xa84   : > { %18962 = vmatmul.mubr.f32.vlgmr.msra.gmra.mrb[14].mxu1 %v8481_v51  ;;  %v22251_v51 = vpack.c.bf16 %v8906_v2, %v8903_v60 }
 0xa85   : > { %20257 = vmatpush3.bf16.msra.mxu1 %v20256_v47  ;;  %18972 = vmatprep.mubr.msk.f32.mxu1 %vm21285_vm0, %v21284_v0  ;;  %v8986_v47 = vsub.f32 %v8984_v25, %v8985_v44 }
 0xa86   : > { %20258 = vmatprep.subr.bf16.mxu1 %v21286_v19 }
 0xa89   : > { %20260 = vmatpush3.bf16.msra.mxu1 %v20259_v56 }
 0xa8a   : > { %20261 = vmatprep.subr.bf16.mxu1 %v21286_v19 }
 0xa8c   : > { %18973 = vmatmul.mubr.f32.vlgmr.msra.gmra.mrb[14].mxu1 %v22189_v58 }
 0xa8d   : > { %20263 = vmatpush3.bf16.msra.mxu1 %v20262_v37  ;;  %18983 = vmatprep.mubr.msk.f32.mxu1 %vm21285_vm0, %v21284_v0  ;;  %v8987_v37 = vand.u32 4294901760, %v8986_v47 }
 0xa8e   : > { %20264 = vmatprep.subr.bf16.mxu1 %v21286_v19 }
 0xa91   : > { %20266 = vmatpush3.bf16.msra.mxu1 %v20265_v26 }
 0xa92   : > { %20267 = vmatprep.subr.bf16.mxu1 %v21286_v19 }
 0xa94   : > { %18984 = vmatmul.mubr.f32.vlgmr.msra.gmra.mrb[14].mxu1 %v8478_v11  ;;  %v8977_v11 = vsub.f32 %v17273_v61, %v8897_v53 }
 0xa95   : > { %20269 = vmatpush3.bf16.msra.mxu1 %v22196_v12  ;;  %18994 = vmatprep.mubr.msk.f32.mxu1 %vm21285_vm0, %v21284_v0 }
 0xa96   : > { %20270 = vmatprep.subr.bf16.mxu1 %v21286_v19  ;;  %v8978_v34 = vand.u32 4294901760, %v8977_v11  ;;  %v20298_v3 = vpack.c.bf16 %v8984_v25, %v8977_v11  ;;  %v17282_v25 = vld [vmem:[%s23115_s3 + $0x108] sm:$0xff] }
 0xa97   : > { %v9393_v2 = vand.u32 4294901760, %v17282_v25 }
 0xa98   : > { %v8979_v27 = vsub.f32 %v8977_v11, %v8978_v34  ;;  %v20310_v6 = vpack.c.bf16 %v8985_v44, %v8978_v34  ;;  %v17281_v11 = vld [vmem:[%s23115_s3 + $0x100] sm:$0xff]  ;;  %v17283_v34 = vld [vmem:[%s23115_s3 + $0x110] sm:$0xff]  ;;  %v17284_v44 = vld [vmem:[%s23115_s3 + $0x118] sm:$0xff] }
 0xa99   : > { %20272 = vmatpush3.bf16.msra.mxu1 %v22199_v38 }
 0xa9a   : > { %20273 = vmatprep.subr.bf16.mxu1 %v21286_v19  ;;  %v8980_v56 = vand.u32 4294901760, %v8979_v27  ;;  %v9399_v27 = vand.u32 4294901760, %v17284_v44 }
 0xa9c   : > { %18995 = vmatmul.mubr.f32.vlgmr.msra.gmra.mrb[14].mxu1 %v8479_v36  ;;  %v8991_v36 = vsub.f32 %v17275_v54, %v8903_v60  ;;  %v20292_v61 = vpack.c.bf16 %v8987_v37, %v8980_v56  ;;  %v9390_v60 = vand.u32 4294901760, %v17281_v11 }
 0xa9d   : > { %20275 = vmatpush3.bf16.msra.mxu1 %v20274_v59  ;;  %19005 = vmatprep.mubr.msk.f32.mxu1 %vm21285_vm0, %v21284_v0  ;;  %v9000_v59 = vsub.f32 %v8998_v43, %v8999_v50 }
 0xa9e   : > { %20276 = vmatprep.subr.bf16.mxu1 %v21286_v19  ;;  %v8992_v48 = vand.u32 4294901760, %v8991_v36  ;;  %v20301_v54 = vpack.c.bf16 %v8998_v43, %v8991_v36  ;;  %v9477_v43 = vsub.f32 %v17282_v25, %v9393_v2 }
 0xaa0   : > { %v8993_v26 = vsub.f32 %v8991_v36, %v8992_v48  ;;  %v20313_v10 = vpack.c.bf16 %v8999_v50, %v8992_v48  ;;  %v9470_v36 = vsub.f32 %v17281_v11, %v9390_v60  ;;  %v9478_v48 = vand.u32 4294901760, %v9477_v43 }
 0xaa1   : > { %20278 = vmatpush3.bf16.msra.mxu1 %v20277_v1  ;;  %v9001_v1 = vand.u32 4294901760, %v9000_v59 }
 0xaa2   : > { %20279 = vmatprep.subr.bf16.mxu1 %v21286_v19  ;;  %v8994_v62 = vand.u32 4294901760, %v8993_v26  ;;  %v9471_v47 = vand.u32 4294901760, %v9470_v36  ;;  %v9479_v37 = vsub.f32 %v9477_v43, %v9478_v48  ;;  %v20322_v26 = vpack.c.bf16 %v9393_v2, %v9390_v60 }
 0xaa4   : > { %19006 = vmatmul.mubr.f32.vlgmr.msra.gmra.mrb[14].mxu1 %v22189_v58  ;;  %v9472_v56 = vsub.f32 %v9470_v36, %v9471_v47  ;;  %v20346_v11 = vpack.c.bf16 %v9478_v48, %v9471_v47 }
 0xaa5   : > { %20281 = vmatpush3.bf16.msra.mxu1 %v22196_v12  ;;  %19016 = vmatprep.mubr.msk.f32.mxu1 %vm21285_vm0, %v21284_v0  ;;  %v8967_v12 = vand.u32 4294901760, %v8966_v33 }
 0xaa6   : > { %20282 = vmatprep.subr.bf16.mxu1 %v21286_v19  ;;  %v9473_v59 = vand.u32 4294901760, %v9472_v56 }
 0xaa9   : > { %20284 = vmatpush3.bf16.msra.mxu1 %v22199_v38  ;;  %v8968_v38 = vsub.f32 %v8966_v33, %v8967_v12 }
 0xaaa   : > { %20285 = vmatprep.subr.bf16.mxu1 %v21286_v19 }
 0xaab   : > { %v8969_v53 = vand.u32 4294901760, %v8968_v38 }
 0xaac   : > { %19017 = vmatmul.mubr.f32.vlgmr.msra.gmra.mrb[14].mxu1 %v22189_v58  ;;  %v20295_v58 = vpack.c.bf16 %v9001_v1, %v8994_v62 }
 0xaad   : > { %20287 = vmatpush3.bf16.msra.mxu1 %v20286_v49  ;;  %19027 = vmatprep.mubr.msk.f32.mxu1 %vm21285_vm0, %v21284_v0 }
 0xaae   : > { %20288 = vmatprep.subr.bf16.mxu1 %v21286_v19 }
 0xab1   : > { %20290 = vmatpush3.bf16.msra.mxu1 %v22251_v51 }
 0xab2   : > { %20291 = vmatprep.subr.bf16.mxu1 %v21286_v19 }
 0xab4   : > { %19028 = vmatmul.mubr.f32.vlgmr.msra.gmra.mrb[14].mxu1 %v8969_v53 }
 0xab5   : > { %20293 = vmatpush3.bf16.msra.mxu1 %v20292_v61  ;;  %19038 = vmatprep.mubr.msk.f32.mxu1 %vm21285_vm0, %v21284_v0 }
 0xab6   : > { %20294 = vmatprep.subr.bf16.mxu1 %v21286_v19 }
 0xab9   : > { %20296 = vmatpush3.bf16.msra.mxu1 %v20295_v58 }
 0xaba   : > { %20297 = vmatprep.subr.bf16.mxu1 %v21286_v19 }
 0xabc   : > { %19039 = vmatmul.mubr.f32.vlgmr.msra.gmra.mrb[14].mxu1 %v22239_v32 }
 0xabd   : > { %20299 = vmatpush3.bf16.msra.mxu1 %v20298_v3  ;;  %19049 = vmatprep.mubr.msk.f32.mxu1 %vm21285_vm0, %v21284_v0 }
 0xabe   : > { %20300 = vmatprep.subr.bf16.mxu1 %v21286_v19 }
 0xac1   : > { %20302 = vmatpush3.bf16.msra.mxu1 %v20301_v54 }
 0xac2   : > { %20303 = vmatprep.subr.bf16.mxu1 %v21286_v19 }
 0xac4   : > { %19050 = vmatmul.mubr.f32.vlgmr.msra.gmra.mrb[14].mxu1 %v8966_v33  ;;  %v9396_v33 = vand.u32 4294901760, %v17283_v34 }
 0xac5   : > { %20305 = vmatpush3.bf16.msra.mxu1 %v20286_v49  ;;  %19060 = vmatprep.mubr.msk.f32.mxu1 %vm21285_vm0, %v21284_v0 }
 0xac6   : > { %20306 = vmatprep.subr.bf16.mxu1 %v21286_v19  ;;  %v9484_v50 = vsub.f32 %v17283_v34, %v9396_v33  ;;  %v20325_v58 = vpack.c.bf16 %v9399_v27, %v9396_v33 }
 0xac8   : > { %v9485_v38 = vand.u32 4294901760, %v9484_v50 }
 0xac9   : > { %20308 = vmatpush3.bf16.msra.mxu1 %v22251_v51 }
 0xaca   : > { %20309 = vmatprep.subr.bf16.mxu1 %v21286_v19  ;;  %v9486_v62 = vsub.f32 %v9484_v50, %v9485_v38 }
 0xacc   : > { %19061 = vmatmul.mubr.f32.vlgmr.msra.gmra.mrb[14].mxu1 %v8967_v12  ;;  %v9491_v12 = vsub.f32 %v17284_v44, %v9399_v27  ;;  %v9487_v3 = vand.u32 4294901760, %v9486_v62 }
 0xacd   : > { %20311 = vmatpush3.bf16.msra.mxu1 %v20310_v6  ;;  %19071 = vmatprep.mubr.msk.f32.mxu1 %vm21285_vm0, %v21284_v0  ;;  %v20334_v6 = vpack.c.bf16 %v9477_v43, %v9470_v36  ;;  %v12255_v36 = vlaneseq }
 0xace   : > { %20312 = vmatprep.subr.bf16.mxu1 %v21286_v19  ;;  %v9492_v61 = vand.u32 4294901760, %v9491_v12 }
 0xacf   : > { %v12256_v43 = vand.u32 127, %v12255_v36 }
 0xad0   : > { %v9493_v1 = vsub.f32 %v9491_v12, %v9492_v61  ;;  %v20349_v25 = vpack.c.bf16 %v9492_v61, %v9485_v38 }
 0xad1   : > { %20314 = vmatpush3.bf16.msra.mxu1 %v20313_v10  ;;  %v20337_v10 = vpack.c.bf16 %v9491_v12, %v9484_v50  ;;  %vm12257_vm4 = vcmp.lt.s32.totalorder %v12256_v43, 16 }
 0xad2   : > { %20315 = vmatprep.subr.bf16.mxu1 %v21286_v19  ;;  %v9494_v54 = vand.u32 4294901760, %v9493_v1  ;;  %v22317_v47 = vsel %vm12257_vm4, 1.0, %v21284_v0 }
 0xad3   : > { %v12335_v48 = vsub.f32 %v22317_v47, %v22317_v47 }
 0xad4   : > { %19072 = vmatmul.mubr.f32.vlgmr.msra.gmra.mrb[14].mxu1 %v22239_v32 }
 0xad5   : > { %20317 = vmatpush3.bf16.msra.mxu1 %v20286_v49  ;;  %19082 = vmatprep.mubr.msk.f32.mxu1 %vm21285_vm0, %v21284_v0  ;;  %v9480_v49 = vand.u32 4294901760, %v9479_v37  ;;  %v12336_v50 = vand.u32 4294901760, %v12335_v48  ;;  %v21288_v37 = vmov 1.0  }
 0xad6   : > { %20318 = vmatprep.subr.bf16.mxu1 %v21286_v19 }
 0xad7   : > { %v20328_v53 = vpack.c.bf16 %v9480_v49, %v9473_v59  ;;  %v12337_v12 = vsub.f32 %v12335_v48, %v12336_v50 }
 0xad9   : > { %20320 = vmatpush3.bf16.msra.mxu1 %v22251_v51  ;;  %v20331_v51 = vpack.c.bf16 %v9494_v54, %v9487_v3  ;;  %v12338_v59 = vand.u32 4294901760, %v12337_v12 }
 0xada   : > { %20321 = vmatprep.subr.bf16.mxu1 %v21286_v19 }
 0xadc   : > { %19083 = vmatmul.mubr.f32.vlgmr.msra.gmra.mrb[14].mxu1 %v22239_v32 }
 0xadd   : > { %20323 = vmatpush3.bf16.msra.mxu1 %v20322_v26  ;;  %19093 = vmatprep.mubr.msk.f32.mxu1 %vm21285_vm0, %v21284_v0 }
 0xade   : > { %20324 = vmatprep.subr.bf16.mxu1 %v21286_v19 }
 0xae1   : > { %20326 = vmatpush3.bf16.msra.mxu1 %v20325_v58 }
 0xae2   : > { %20327 = vmatprep.subr.bf16.mxu1 %v21286_v19 }
 0xb4f   : > { %v8391_v60 = vpop.f32.mrb[12].mxu1 }
 0xb50   : > { %v9387_v32 = vsel %vm1249_vm2, %v8391_v60, 0  ;;  %v18952_v2 = vpop.f32.mrb[13].mxu1 }
 0xb51   : > { %v9458_v34 = vand.u32 4294901760, %v9387_v32 }
 0xb53   : > { %v9459_v44 = vsub.f32 %v9387_v32, %v9458_v34 }
 0xb55   : > { %v9460_v33 = vand.u32 4294901760, %v9459_v44 }
 0xb57   : > { %v9461_v27 = vsub.f32 %v9459_v44, %v9460_v33 }
 0xb59   : > { %v9462_v56 = vand.u32 4294901760, %v9461_v27 }
 0xb5b   : > { %19094 = vmatmul.mubr.f32.vlgmr.msra.gmra.mrb[14].mxu1 %v9462_v56 }
 0xb5c   : > { %20329 = vmatpush3.bf16.msra.mxu1 %v20328_v53  ;;  %19104 = vmatprep.mubr.msk.f32.mxu1 %vm21285_vm0, %v21284_v0 }
 0xb5d   : > { %20330 = vmatprep.subr.bf16.mxu1 %v21286_v19 }
 0xb60   : > { %20332 = vmatpush3.bf16.msra.mxu1 %v20331_v51 }
 0xb61   : > { %20333 = vmatprep.subr.bf16.mxu1 %v21286_v19 }
 0xb63   : > { %19105 = vmatmul.mubr.f32.vlgmr.msra.gmra.mrb[14].mxu1 %v9458_v34 }
 0xb64   : > { %20335 = vmatpush3.bf16.msra.mxu1 %v20334_v6  ;;  %19115 = vmatprep.mubr.msk.f32.mxu1 %vm21285_vm0, %v21284_v0 }
 0xb65   : > { %20336 = vmatprep.subr.bf16.mxu1 %v21286_v19 }
 0xb68   : > { %20338 = vmatpush3.bf16.msra.mxu1 %v20337_v10 }
 0xb69   : > { %20339 = vmatprep.subr.bf16.mxu1 %v21286_v19 }
 0xb6b   : > { %19116 = vmatmul.mubr.f32.vlgmr.msra.gmra.mrb[14].mxu1 %v9459_v44  ;;  %v13146_v44 = vsel %vm1249_vm2, %v22317_v47, 0 }
 0xb6c   : > { %20341 = vmatpush3.bf16.msra.mxu1 %v20322_v26  ;;  %19126 = vmatprep.mubr.msk.f32.mxu1 %vm21285_vm0, %v21284_v0 }
 0xb6d   : > { %20342 = vmatprep.subr.bf16.mxu1 %v21286_v19 }
 0xb70   : > { %20344 = vmatpush3.bf16.msra.mxu1 %v20325_v58 }
 0xb71   : > { %20345 = vmatprep.subr.bf16.mxu1 %v21286_v19 }
 0xb73   : > { %19127 = vmatmul.mubr.f32.vlgmr.msra.gmra.mrb[14].mxu1 %v9460_v33  ;;  %v13218_v33 = vsub.f32 %v13146_v44, %v13146_v44 }
 0xb74   : > { %20347 = vmatpush3.bf16.msra.mxu1 %v20346_v11  ;;  %19137 = vmatprep.mubr.msk.f32.mxu1 %vm21285_vm0, %v21284_v0 }
 0xb75   : > { %20348 = vmatprep.subr.bf16.mxu1 %v21286_v19  ;;  %v13219_v27 = vand.u32 4294901760, %v13218_v33 }
 0xb77   : > { %v13220_v56 = vsub.f32 %v13218_v33, %v13219_v27 }
 0xb78   : > { %20350 = vmatpush3.bf16.msra.mxu1 %v20349_v25 }
 0xb79   : > { %20351 = vmatprep.subr.bf16.mxu1 %v21286_v19  ;;  %v13221_v36 = vand.u32 4294901760, %v13220_v56 }
 0xb7b   : > { %19138 = vmatmul.mubr.f32.vlgmr.msra.gmra.mrb[14].mxu1 %v9458_v34 }
 0xb7c   : > { %20353 = vmatpush3.bf16.msra.mxu1 %v20322_v26  ;;  %19148 = vmatprep.mubr.msk.f32.mxu1 %vm21285_vm0, %v21284_v0  ;;  %v9877_v26 = vsel %vm9876_vm5, 1.0, %v21287_v52 }
 0xb7d   : > { %20354 = vmatprep.subr.bf16.mxu1 %v21286_v19  ;;  %v9878_v38 = vmul.f32 1e-06, %v9877_v26 }
 0xb7f   : > { %v9879_v61 = vadd.f32 %v21921_v55, %v9878_v38 }
 0xb80   : > { %20356 = vmatpush3.bf16.msra.mxu1 %v20325_v58 }
 0xb81   : > { %19409 = vmatprep.subr.mxu1 %v21284_v0  ;;  %21123 = vrcp.f32 %v9879_v61 }
 0xb83   : > { %19149 = vmatmul.mubr.f32.vlgmr.msra.gmra.mrb[14].mxu1 %v9458_v34 }
 0xb84   : > { %19410 = vmatpush3.msk.msra.mxu1 %vm12257_vm4, %v21288_v37  ;;  %19411 = vmatprep.mubr.msk.f32.mxu1 %vm21285_vm0, %v21284_v0 }
 0xb85   : > { %19414 = vmatprep.subr.mxu1 %v21284_v0 }
 0xb87   : > { %19412 = vmatmul.mubr.f32.vlgmr.msra.gmra.mrb[16].mxu1 %v21417_v13 }
 0xb88   : > { %19415 = vmatpush3.msra.mxu1 %v12338_v59  ;;  %19416 = vmatprep.mubr.msk.f32.mxu1 %vm21285_vm0, %v21284_v0 }
 0xb89   : > { %19419 = vmatprep.subr.mxu1 %v21284_v0 }
 0xb8b   : > { %v21124_v53 = vpop.eup %21123 }
 0xb8f   : > { %19417 = vmatmul.mubr.f32.vlgmr.msra.gmra.mrb[16].mxu1 %v21405_v5 }
 0xb90   : > { %19420 = vmatpush3.msra.mxu1 %v12335_v48  ;;  %19421 = vmatprep.mubr.msk.f32.mxu1 %vm21285_vm0, %v21284_v0  ;;  %v17291_v48 = vld [vmem:[%s23115_s3 + $0x90] sm:$0xff] }
 0xb91   : > { %19424 = vmatprep.subr.mxu1 %v21284_v0  ;;  %v10794_v26 = vand.u32 4294901760, %v17291_v48 }
 0xb97   : > { %19422 = vmatmul.mubr.f32.vlgmr.msra.gmra.mrb[16].mxu1 %v21409_v7 }
 0xb98   : > { %19425 = vmatpush3.msk.msra.mxu1 %vm12257_vm4, %v21288_v37  ;;  %19426 = vmatprep.mubr.msk.f32.mxu1 %vm21285_vm0, %v21284_v0 }
 0xb99   : > { %19429 = vmatprep.subr.mxu1 %v21284_v0 }
 0xb9f   : > { %19427 = vmatmul.mubr.f32.vlgmr.msra.gmra.mrb[16].mxu1 %v21413_v9 }
 0xba0   : > { %19430 = vmatpush3.msra.mxu1 %v12336_v50  ;;  %19431 = vmatprep.mubr.msk.f32.mxu1 %vm21285_vm0, %v21284_v0  ;;  %v17292_v50 = vld [vmem:[%s23115_s3 + $0x98] sm:$0xff] }
 0xba1   : > { %19434 = vmatprep.subr.mxu1 %v21284_v0  ;;  %v10797_v38 = vand.u32 4294901760, %v17292_v50 }
 0xba3   : > { %v22567_v44 = vpack.c.bf16 %v10797_v38, %v10794_v26 }
 0xba7   : > { %19432 = vmatmul.mubr.f32.vlgmr.msra.gmra.mrb[16].mxu1 %v21405_v5 }
 0xba8   : > { %19435 = vmatpush3.msk.msra.mxu1 %vm12257_vm4, %v21288_v37  ;;  %19436 = vmatprep.mubr.msk.f32.mxu1 %vm21285_vm0, %v21284_v0 }
 0xba9   : > { %19439 = vmatprep.subr.mxu1 %v21284_v0 }
 0xbaf   : > { %19437 = vmatmul.mubr.f32.vlgmr.msra.gmra.mrb[16].mxu1 %v21405_v5 }
 0xbb0   : > { %19441 = vmatprep.mubr.msk.f32.mxu1 %vm21285_vm0, %v21284_v0 }
 0xc56   : > { %v9870_v49 = vpop.f32.mrb[14].mxu1 }
 0xc57   : > { %v9875_v62 = vmul.f32 %v21921_v55, %v9870_v49  ;;  %v19150_v1 = vpop.f32.mrb[15].mxu1 }
 0xc58   : > { %v22542_v1 = vsub.f32 %v17292_v50, %v10797_v38 }
 0xc59   : > { %v22359_v58 = vmul.f32 %v21124_v53, %v9875_v62  ;;  %16991 = vst.msk [vmem:[%s323_s13] sm:$0xff] %vm1249_vm2, %v9875_v62  ;;  %v22540_v62 = vsub.f32 %v17291_v48, %v10794_v26  ;;  %s21134_s13 = scalar_lea.vmem %s21133_s20, 256 }
 0xc5a   : > { %p21136_p1 = scmp.lt.s32.totalorder %s21134_s13, %s21128_s21 }
 0xc5b   : > { %v9883_v3 = vand.u32 4294901760, %v22359_v58 }
 0xc5c   : > { %p21137_p2 = por %p21136_p1, %p21135_p0 }
 0xc5d   : > { %v9960_v54 = vsub.f32 %v22359_v58, %v9883_v3  ;;  %19152 = vmatpush3.msra.mxu0 %v9883_v3 }
 0xc5e   : > { %19154 = vmatmul.mubr.f32.vlgmr.msra.gmra.mrb[10].mxu0 %v21417_v13  ;;  %19156 = vmatprep.subr.mxu0 %v21284_v0  ;;  %p21138_p3 = pnand %p21137_p2, %p21131_p13 }
 0xc5f   : > { %v9961_v51 = vand.u32 4294901760, %v9960_v54  ;;  %19158 = vmatprep.mubr.msk.f32.mxu0 %vm21285_vm0, %v21284_v0 }
 0xc61   : > { %v9962_v55 = vsub.f32 %v9960_v54, %v9961_v51 }
 0xc63   : > { %v9963_v6 = vand.u32 4294901760, %v9962_v55 }
 0xc65   : > { %19157 = vmatpush3.msra.mxu0 %v9963_v6 }
 0xc66   : > { %19159 = vmatmul.mubr.f32.vlgmr.msra.gmra.mrb[10].mxu0 %v21405_v5  ;;  %19161 = vmatprep.subr.mxu0 %v21284_v0 }
 0xc67   : > { %19162 = vmatpush3.msra.mxu0 %v9960_v54  ;;  %19163 = vmatprep.mubr.msk.f32.mxu0 %vm21285_vm0, %v21284_v0 }
 0xc68   : > { %19166 = vmatprep.subr.mxu0 %v21284_v0 }
 0xc6e   : > { %19164 = vmatmul.mubr.f32.vlgmr.msra.gmra.mrb[10].mxu0 %v21409_v7 }
 0xc6f   : > { %19167 = vmatpush3.msra.mxu0 %v9883_v3  ;;  %19168 = vmatprep.mubr.msk.f32.mxu0 %vm21285_vm0, %v21284_v0 }
 0xc70   : > { %19171 = vmatprep.subr.mxu0 %v21284_v0 }
 0xc76   : > { %19169 = vmatmul.mubr.f32.vlgmr.msra.gmra.mrb[10].mxu0 %v21413_v9 }
 0xc77   : > { %19172 = vmatpush3.msra.mxu0 %v9961_v51  ;;  %19173 = vmatprep.mubr.msk.f32.mxu0 %vm21285_vm0, %v21284_v0 }
 0xc78   : > { %19176 = vmatprep.subr.mxu0 %v21284_v0 }
 0xc7e   : > { %19174 = vmatmul.mubr.f32.vlgmr.msra.gmra.mrb[10].mxu0 %v21405_v5 }
 0xc7f   : > { %19177 = vmatpush3.msra.mxu0 %v9883_v3  ;;  %19178 = vmatprep.mubr.msk.f32.mxu0 %vm21285_vm0, %v21284_v0 }
 0xc80   : > { %19181 = vmatprep.subr.mxu0 %v21284_v0 }
 0xc82   : > { %v12695_v10 = vpop.f32.mrb[16].mxu1 }
 0xc83   : > { %v12700_v11 = vand.u32 4294901760, %v12695_v10  ;;  %v19438_v25 = vpop.f32.mrb[17].mxu1 }
 0xc84   : > { %v10890_v25 = vand.u32 4294901760, %v22542_v1 }
 0xc85   : > { %v12777_v60 = vsub.f32 %v12695_v10, %v12700_v11  ;;  %19440 = vmatpush3.msra.mxu1 %v12700_v11 }
 0xc86   : > { %19179 = vmatmul.mubr.f32.vlgmr.msra.gmra.mrb[10].mxu0 %v21405_v5  ;;  %19442 = vmatmul.mubr.f32.vlgmr.msra.gmra.mrb[18].mxu1 %v21417_v13 }
 0xc87   : > { %v12778_v32 = vand.u32 4294901760, %v12777_v60  ;;  %19444 = vmatprep.subr.mxu1 %v21284_v0  ;;  %19446 = vmatprep.mubr.msk.f32.mxu1 %vm21285_vm0, %v21284_v0 }
 0xc88   : > { %19183 = vmatprep.mubr.msk.f32.mxu0 %vm21285_vm0, %v21284_v0 }
 0xc89   : > { %v12779_v2 = vsub.f32 %v12777_v60, %v12778_v32 }
 0xc8b   : > { %v12780_v34 = vand.u32 4294901760, %v12779_v2 }
 0xc8d   : > { %19445 = vmatpush3.msra.mxu1 %v12780_v34 }
 0xc8e   : > { %19447 = vmatmul.mubr.f32.vlgmr.msra.gmra.mrb[18].mxu1 %v21405_v5  ;;  %19449 = vmatprep.subr.mxu1 %v21284_v0 }
 0xc8f   : > { %19450 = vmatpush3.msra.mxu1 %v12777_v60  ;;  %19451 = vmatprep.mubr.msk.f32.mxu1 %vm21285_vm0, %v21284_v0 }
 0xc90   : > { %19454 = vmatprep.subr.mxu1 %v21284_v0 }
 0xc96   : > { %19452 = vmatmul.mubr.f32.vlgmr.msra.gmra.mrb[18].mxu1 %v21409_v7 }
 0xc97   : > { %19455 = vmatpush3.msra.mxu1 %v12700_v11  ;;  %19456 = vmatprep.mubr.msk.f32.mxu1 %vm21285_vm0, %v21284_v0 }
 0xc98   : > { %19459 = vmatprep.subr.mxu1 %v21284_v0 }
 0xc9e   : > { %19457 = vmatmul.mubr.f32.vlgmr.msra.gmra.mrb[18].mxu1 %v21413_v9 }
 0xc9f   : > { %19460 = vmatpush3.msra.mxu1 %v12778_v32  ;;  %19461 = vmatprep.mubr.msk.f32.mxu1 %vm21285_vm0, %v21284_v0 }
 0xca0   : > { %19464 = vmatprep.subr.mxu1 %v21284_v0 }
 0xca6   : > { %19462 = vmatmul.mubr.f32.vlgmr.msra.gmra.mrb[18].mxu1 %v21405_v5 }
 0xca7   : > { %19465 = vmatpush3.msra.mxu1 %v12700_v11  ;;  %19466 = vmatprep.mubr.msk.f32.mxu1 %vm21285_vm0, %v21284_v0  ;;  %v10883_v11 = vand.u32 4294901760, %v22540_v62 }
 0xca8   : > { %20465 = vmatprep.subr.bf16.mxu1 %v21286_v19 }
 0xca9   : > { %v10884_v56 = vsub.f32 %v22540_v62, %v10883_v11 }
 0xcae   : > { %19467 = vmatmul.mubr.f32.vlgmr.msra.gmra.mrb[18].mxu1 %v21405_v5 }
 0xcaf   : > { %20467 = vmatpush3.bf16.msra.mxu1 %v21549_v63  ;;  %19477 = vmatprep.mubr.msk.f32.mxu1 %vm21285_vm0, %v21284_v0 }
 0xcb0   : > { %20468 = vmatprep.subr.bf16.mxu1 %v21286_v19 }
 0xcb3   : > { %20470 = vmatpush3.bf16.msra.mxu1 %v21552_v8 }
 0xcb4   : > { %20471 = vmatprep.subr.bf16.mxu1 %v21286_v19 }
 0xcb6   : > { %19478 = vmatmul.mubr.f32.vlgmr.msra.gmra.mrb[20].mxu1 %v13221_v36  ;;  %v10891_v36 = vsub.f32 %v22542_v1, %v10890_v25 }
 0xcb7   : > { %20473 = vmatpush3.bf16.msra.mxu1 %v21559_v17  ;;  %19488 = vmatprep.mubr.msk.f32.mxu1 %vm21285_vm0, %v21284_v0  ;;  %v13635_v17 = vsel %vm1249_vm2, %v12695_v10, 0 }
 0xcb8   : > { %20474 = vmatprep.subr.bf16.mxu1 %v21286_v19 }
 0xcbb   : > { %20476 = vmatpush3.bf16.msra.mxu1 %v21563_v22  ;;  %v13706_v22 = vand.u32 4294901760, %v13635_v17 }
 0xcbc   : > { %20477 = vmatprep.subr.bf16.mxu1 %v21286_v19 }
 0xcbe   : > { %19489 = vmatmul.mubr.msk.f32.vlgmr.msra.gmra.mrb[20].mxu1 %vm1249_vm2, %v22317_v47 }
 0xcbf   : > { %20479 = vmatpush3.bf16.msra.mxu1 %v21569_v23  ;;  %19499 = vmatprep.mubr.msk.f32.mxu1 %vm21285_vm0, %v21284_v0  ;;  %v13707_v23 = vsub.f32 %v13635_v17, %v13706_v22 }
 0xcc0   : > { %20480 = vmatprep.subr.bf16.mxu1 %v21286_v19 }
 0xcc3   : > { %20482 = vmatpush3.bf16.msra.mxu1 %v21574_v29  ;;  %v13708_v29 = vand.u32 4294901760, %v13707_v23 }
 0xcc4   : > { %20483 = vmatprep.subr.bf16.mxu1 %v21286_v19 }
 0xcc6   : > { %19500 = vmatmul.mubr.f32.vlgmr.msra.gmra.mrb[20].mxu1 %v13218_v33 }
 0xcc7   : > { %20485 = vmatpush3.bf16.msra.mxu1 %v21549_v63  ;;  %19510 = vmatprep.mubr.msk.f32.mxu1 %vm21285_vm0, %v21284_v0 }
 0xcc8   : > { %20486 = vmatprep.subr.bf16.mxu1 %v21286_v19 }
 0xccb   : > { %20488 = vmatpush3.bf16.msra.mxu1 %v21552_v8 }
 0xccc   : > { %20489 = vmatprep.subr.bf16.mxu1 %v21286_v19 }
 0xcce   : > { %19511 = vmatmul.mubr.f32.vlgmr.msra.gmra.mrb[20].mxu1 %v13219_v27 }
 0xccf   : > { %20491 = vmatpush3.bf16.msra.mxu1 %v21586_v30  ;;  %19521 = vmatprep.mubr.msk.f32.mxu1 %vm21285_vm0, %v21284_v0  ;;  %v13709_v30 = vsub.f32 %v13707_v23, %v13708_v29 }
 0xcd0   : > { %20492 = vmatprep.subr.bf16.mxu1 %v21286_v19 }
 0xcd3   : > { %20494 = vmatpush3.bf16.msra.mxu1 %v21590_v31 }
 0xcd4   : > { %20495 = vmatprep.subr.bf16.mxu1 %v21286_v19 }
 0xcd6   : > { %19522 = vmatmul.mubr.msk.f32.vlgmr.msra.gmra.mrb[20].mxu1 %vm1249_vm2, %v22317_v47 }
 0xcd7   : > { %20497 = vmatpush3.bf16.msra.mxu1 %v21549_v63  ;;  %19532 = vmatprep.mubr.msk.f32.mxu1 %vm21285_vm0, %v21284_v0  ;;  %v13710_v63 = vand.u32 4294901760, %v13709_v30  ;;  %v10885_v30 = vand.u32 4294901760, %v10884_v56 }
 0xcd8   : > { %20498 = vmatprep.subr.bf16.mxu1 %v21286_v19 }
 0xcdb   : > { %20500 = vmatpush3.bf16.msra.mxu1 %v21552_v8 }
 0xcdc   : > { %20501 = vmatprep.subr.bf16.mxu1 %v21286_v19 }
 0xcde   : > { %19533 = vmatmul.mubr.msk.f32.vlgmr.msra.gmra.mrb[20].mxu1 %vm1249_vm2, %v22317_v47 }
 0xcdf   : > { %20503 = vmatpush3.bf16.msra.mxu1 %v21447_v18  ;;  %19543 = vmatprep.mubr.msk.f32.mxu1 %vm21285_vm0, %v21284_v0 }
 0xce0   : > { %20504 = vmatprep.subr.bf16.mxu1 %v21286_v19 }
 0xce3   : > { %20506 = vmatpush3.bf16.msra.mxu1 %v21458_v24 }
 0xce4   : > { %20507 = vmatprep.subr.bf16.mxu1 %v21286_v19 }
 0xce6   : > { %19544 = vmatmul.mubr.f32.vlgmr.msra.gmra.mrb[20].mxu1 %v13710_v63  ;;  %v10892_v63 = vand.u32 4294901760, %v10891_v36 }
 0xce7   : > { %20509 = vmatpush3.bf16.msra.mxu1 %v21625_v46  ;;  %19554 = vmatprep.mubr.msk.f32.mxu1 %vm21285_vm0, %v21284_v0 }
 0xce8   : > { %20510 = vmatprep.subr.bf16.mxu1 %v21286_v19 }
 0xceb   : > { %20512 = vmatpush3.bf16.msra.mxu1 %v21629_v40  ;;  %v17289_v40 = vld [vmem:[%s23115_s3 + $0x80] sm:$0xff] }
 0xcec   : > { %20513 = vmatprep.subr.bf16.mxu1 %v21286_v19 }
 0xcee   : > { %19555 = vmatmul.mubr.f32.vlgmr.msra.gmra.mrb[20].mxu1 %v13706_v22 }
 0xcef   : > { %20515 = vmatpush3.bf16.msra.mxu1 %v21637_v41  ;;  %19565 = vmatprep.mubr.msk.f32.mxu1 %vm21285_vm0, %v21284_v0  ;;  %v17290_v41 = vld [vmem:[%s23115_s3 + $0x88] sm:$0xff] }
 0xcf0   : > { %20516 = vmatprep.subr.bf16.mxu1 %v21286_v19  ;;  %v10791_v43 = vand.u32 4294901760, %v17290_v41 }
 0xcf2   : > { %v22532_v59 = vsub.f32 %v17290_v41, %v10791_v43  ;;  %v17288_v41 = vld [vmem:[%s23115_s3 + $0x78] sm:$0xff] }
 0xcf3   : > { %20518 = vmatpush3.bf16.msra.mxu1 %v21644_v42  ;;  %v10788_v42 = vand.u32 4294901760, %v17289_v40  ;;  %v11285_v50 = vand.u32 4294901760, %v17288_v41 }
 0xcf4   : > { %20519 = vmatprep.subr.bf16.mxu1 %v21286_v19  ;;  %v10876_v53 = vand.u32 4294901760, %v22532_v59 }
 0xcf5   : > { %v22530_v37 = vsub.f32 %v17289_v40, %v10788_v42  ;;  %v22549_v51 = vpack.c.bf16 %v10791_v43, %v10788_v42  ;;  %v17287_v40 = vld [vmem:[%s23115_s3 + $0x70] sm:$0xff] }
 0xcf6   : > { %19566 = vmatmul.mubr.f32.vlgmr.msra.gmra.mrb[20].mxu1 %v13707_v23  ;;  %v10877_v10 = vsub.f32 %v22532_v59, %v10876_v53  ;;  %v11282_v48 = vand.u32 4294901760, %v17287_v40 }
 0xcf7   : > { %20521 = vmatpush3.bf16.msra.mxu1 %v21447_v18  ;;  %19576 = vmatprep.mubr.msk.f32.mxu1 %vm21285_vm0, %v21284_v0  ;;  %v10869_v49 = vand.u32 4294901760, %v22530_v37 }
 0xcf8   : > { %20522 = vmatprep.subr.bf16.mxu1 %v21286_v19  ;;  %v10878_v27 = vand.u32 4294901760, %v10877_v10 }
 0xcf9   : > { %v10870_v55 = vsub.f32 %v22530_v37, %v10869_v49 }
 0xcfb   : > { %20524 = vmatpush3.bf16.msra.mxu1 %v21458_v24  ;;  %v10871_v33 = vand.u32 4294901760, %v10870_v55 }
 0xcfc   : > { %20525 = vmatprep.subr.bf16.mxu1 %v21286_v19 }
 0xcfe   : > { %19577 = vmatmul.mubr.f32.vlgmr.msra.gmra.mrb[20].mxu1 %v13708_v29  ;;  %v20364_v29 = vpack.c.bf16 %v10878_v27, %v10871_v33  ;;  %v17293_v33 = vld [vmem:[%s23115_s3 + $0xa0] sm:$0xff]  ;;  %v17294_v27 = vld [vmem:[%s23115_s3 + $0xa8] sm:$0xff] }
 0xcff   : > { %20527 = vmatpush3.bf16.msra.mxu1 %v21484_v39  ;;  %19587 = vmatprep.mubr.msk.f32.mxu1 %vm21285_vm0, %v21284_v0  ;;  %v11769_v56 = vand.u32 4294901760, %v17293_v33  ;;  %v11772_v36 = vand.u32 4294901760, %v17294_v27 }
 0xd00   : > { %20528 = vmatprep.subr.bf16.mxu1 %v21286_v19 }
 0xd03   : > { %20530 = vmatpush3.bf16.msra.mxu1 %v21498_v45 }
 0xd04   : > { %20531 = vmatprep.subr.bf16.mxu1 %v21286_v19 }
 0xd06   : > { %19588 = vmatmul.mubr.f32.vlgmr.msra.gmra.mrb[20].mxu1 %v13706_v22 }
 0xd07   : > { %20533 = vmatpush3.bf16.msra.mxu1 %v21447_v18  ;;  %19598 = vmatprep.mubr.msk.f32.mxu1 %vm21285_vm0, %v21284_v0 }
 0xd08   : > { %20534 = vmatprep.subr.bf16.mxu1 %v21286_v19 }
 0xd0b   : > { %20536 = vmatpush3.bf16.msra.mxu1 %v21458_v24 }
 0xd0c   : > { %20537 = vmatprep.subr.bf16.mxu1 %v21286_v19 }
 0xd0e   : > { %19599 = vmatmul.mubr.f32.vlgmr.msra.gmra.mrb[20].mxu1 %v13706_v22 }
 0xd0f   : > { %20539 = vmatpush3.bf16.msra.mxu1 %v21660_v35  ;;  %19609 = vmatprep.mubr.msk.f32.mxu1 %vm21285_vm0, %v21284_v0 }
 0xd10   : > { %20540 = vmatprep.subr.bf16.mxu1 %v21286_v19 }
 0xd13   : > { %20542 = vmatpush3.bf16.msra.mxu1 %v21670_v57 }
 0xd14   : > { %20543 = vmatprep.subr.bf16.mxu1 %v21286_v19 }
 0xd59   : > { %v10324_v18 = vpop.f32.mrb[10].mxu0 }
 0xd5a   : > { %v10329_v39 = vand.u32 4294901760, %v10324_v18  ;;  %v19180_v45 = vpop.f32.mrb[11].mxu0  ;;  %v10785_v12 = vsel %vm1249_vm2, %v10324_v18, 0 }
 0xd5b   : > { %v22534_v61 = vand.u32 4294901760, %v10785_v12  ;;  %v20367_v45 = vpack.c.bf16 %v10892_v63, %v10885_v30 }
 0xd5c   : > { %v10406_v8 = vsub.f32 %v10324_v18, %v10329_v39  ;;  %19182 = vmatpush3.msra.mxu0 %v10329_v39 }
 0xd5d   : > { %19184 = vmatmul.mubr.f32.vlgmr.msra.gmra.mrb[12].mxu0 %v21417_v13  ;;  %19186 = vmatprep.subr.mxu0 %v21284_v0  ;;  %v22546_v3 = vsub.f32 %v10785_v12, %v22534_v61 }
 0xd5e   : > { %v10407_v24 = vand.u32 4294901760, %v10406_v8  ;;  %19188 = vmatprep.mubr.msk.f32.mxu0 %vm21285_vm0, %v21284_v0 }
 0xd5f   : > { %v10858_v32 = vand.u32 4294901760, %v22546_v3 }
 0xd60   : > { %v10408_v31 = vsub.f32 %v10406_v8, %v10407_v24 }
 0xd61   : > { %v10859_v22 = vsub.f32 %v22546_v3, %v10858_v32 }
 0xd62   : > { %v10409_v46 = vand.u32 4294901760, %v10408_v31 }
 0xd64   : > { %19187 = vmatpush3.msra.mxu0 %v10409_v46 }
 0xd65   : > { %19189 = vmatmul.mubr.f32.vlgmr.msra.gmra.mrb[12].mxu0 %v21405_v5  ;;  %19191 = vmatprep.subr.mxu0 %v21284_v0 }
 0xd66   : > { %19192 = vmatpush3.msra.mxu0 %v10406_v8  ;;  %19193 = vmatprep.mubr.msk.f32.mxu0 %vm21285_vm0, %v21284_v0  ;;  %v20370_v8 = vpack.c.bf16 %v22532_v59, %v22530_v37 }
 0xd67   : > { %19196 = vmatprep.subr.mxu0 %v21284_v0 }
 0xd6d   : > { %19194 = vmatmul.mubr.f32.vlgmr.msra.gmra.mrb[12].mxu0 %v21409_v7 }
 0xd6e   : > { %19197 = vmatpush3.msra.mxu0 %v10329_v39  ;;  %19198 = vmatprep.mubr.msk.f32.mxu0 %vm21285_vm0, %v21284_v0 }
 0xd6f   : > { %19201 = vmatprep.subr.mxu0 %v21284_v0 }
 0xd75   : > { %19199 = vmatmul.mubr.f32.vlgmr.msra.gmra.mrb[12].mxu0 %v21413_v9 }
 0xd76   : > { %19202 = vmatpush3.msra.mxu0 %v10407_v24  ;;  %19203 = vmatprep.mubr.msk.f32.mxu0 %vm21285_vm0, %v21284_v0  ;;  %v20385_v24 = vpack.c.bf16 %v10890_v25, %v10883_v11 }
 0xd77   : > { %19206 = vmatprep.subr.mxu0 %v21284_v0 }
 0xd7d   : > { %19204 = vmatmul.mubr.f32.vlgmr.msra.gmra.mrb[12].mxu0 %v21405_v5 }
 0xd7e   : > { %19207 = vmatpush3.msra.mxu0 %v10329_v39  ;;  %19208 = vmatprep.mubr.msk.f32.mxu0 %vm21285_vm0, %v21284_v0  ;;  %v10860_v39 = vand.u32 4294901760, %v10859_v22  ;;  %v11856_v22 = vsub.f32 %v17294_v27, %v11772_v36 }
 0xd7f   : > { %20357 = vmatprep.subr.bf16.mxu0 %v21286_v19 }
 0xd81   : > { %v13141_v54 = vpop.f32.mrb[18].mxu1 }
 0xd82   : > { %v14124_v6 = vsel %vm1249_vm2, %v13141_v54, 0  ;;  %v19468_v60 = vpop.f32.mrb[19].mxu1 }
 0xd83   : > { %v22561_v2 = vand.u32 4294901760, %v14124_v6 }
 0xd85   : > { %v22564_v34 = vsub.f32 %v14124_v6, %v22561_v2  ;;  %19209 = vmatmul.mubr.f32.vlgmr.msra.gmra.mrb[12].mxu0 %v21405_v5 }
 0xd86   : > { %20359 = vmatpush3.bf16.msra.mxu0 %v22549_v51  ;;  %19219 = vmatprep.mubr.msk.f32.mxu0 %vm21285_vm0, %v21284_v0 }
 0xd87   : > { %v14197_v17 = vand.u32 4294901760, %v22564_v34  ;;  %20360 = vmatprep.subr.bf16.mxu0 %v21286_v19 }
 0xd89   : > { %v14198_v23 = vsub.f32 %v22564_v34, %v14197_v17 }
 0xd8a   : > { %20362 = vmatpush3.bf16.msra.mxu0 %v22567_v44 }
 0xd8b   : > { %v14199_v18 = vand.u32 4294901760, %v14198_v23  ;;  %20363 = vmatprep.subr.bf16.mxu0 %v21286_v19  ;;  %v17295_v23 = vld [vmem:[%s23115_s3 + $0xb0] sm:$0xff] }
 0xd8c   : > { %v11775_v30 = vand.u32 4294901760, %v17295_v23 }
 0xd8d   : > { %19220 = vmatmul.mubr.f32.vlgmr.msra.gmra.mrb[14].mxu0 %v10860_v39  ;;  %19610 = vmatmul.mubr.f32.vlgmr.msra.gmra.mrb[20].mxu1 %v14199_v18  ;;  %v11857_v39 = vand.u32 4294901760, %v11856_v22 }
 0xd8e   : > { %20365 = vmatpush3.bf16.msra.mxu0 %v20364_v29  ;;  %20545 = vmatpush3.bf16.msra.mxu1 %v21674_v4  ;;  %v20373_v4 = vpack.c.bf16 %v22542_v1, %v22540_v62  ;;  %v17296_v29 = vld [vmem:[%s23115_s3 + $0xb8] sm:$0xff] }
 0xd8f   : > { %20366 = vmatprep.subr.bf16.mxu0 %v21286_v19  ;;  %20546 = vmatprep.subr.bf16.mxu1 %v21286_v19  ;;  %v11778_v63 = vand.u32 4294901760, %v17296_v29 }
 0xd90   : > { %19230 = vmatprep.mubr.msk.f32.mxu0 %vm21285_vm0, %v21284_v0  ;;  %19620 = vmatprep.mubr.msk.f32.mxu1 %vm21285_vm0, %v21284_v0 }
 0xd92   : > { %20368 = vmatpush3.bf16.msra.mxu0 %v20367_v45  ;;  %20548 = vmatpush3.bf16.msra.mxu1 %v21676_v14  ;;  %v20382_v14 = vpack.c.bf16 %v10876_v53, %v10869_v49  ;;  %v11863_v45 = vsub.f32 %v17295_v23, %v11775_v30 }
 0xd93   : > { %20369 = vmatprep.subr.bf16.mxu0 %v21286_v19  ;;  %20549 = vmatprep.subr.bf16.mxu1 %v21286_v19 }
 0xd95   : > { %19231 = vmatmul.mubr.f32.vlgmr.msra.gmra.mrb[14].mxu0 %v22534_v61  ;;  %19621 = vmatmul.mubr.f32.vlgmr.msra.gmra.mrb[20].mxu1 %v22561_v2 }
 0xd96   : > { %20371 = vmatpush3.bf16.msra.mxu0 %v20370_v8  ;;  %20551 = vmatpush3.bf16.msra.mxu1 %v21678_v15  ;;  %v17285_v15 = vld [vmem:[%s23115_s3 + $0x60] sm:$0xff]  ;;  %v11870_v8 = vsub.f32 %v17296_v29, %v11778_v63  ;;  %v17304_v29 = vld [vmem:[%s23115_s3 + $0x28] sm:$0xff] }
 0xd97   : > { %20372 = vmatprep.subr.bf16.mxu0 %v21286_v19  ;;  %20552 = vmatprep.subr.bf16.mxu1 %v21286_v19  ;;  %v11276_v31 = vand.u32 4294901760, %v17285_v15 }
 0xd98   : > { %19241 = vmatprep.mubr.msk.f32.mxu0 %vm21285_vm0, %v21284_v0  ;;  %19631 = vmatprep.mubr.msk.f32.mxu1 %vm21285_vm0, %v21284_v0 }
 0xd99   : > { %v22658_v42 = vsub.f32 %v17285_v15, %v11276_v31  ;;  %v20430_v15 = vpack.c.bf16 %v11772_v36, %v11769_v56 }
 0xd9a   : > { %20374 = vmatpush3.bf16.msra.mxu0 %v20373_v4  ;;  %20554 = vmatpush3.bf16.msra.mxu1 %v21680_v16  ;;  %v17286_v16 = vld [vmem:[%s23115_s3 + $0x68] sm:$0xff] }
 0xd9b   : > { %20375 = vmatprep.subr.bf16.mxu0 %v21286_v19  ;;  %20555 = vmatprep.subr.bf16.mxu1 %v21286_v19  ;;  %v11279_v46 = vand.u32 4294901760, %v17286_v16  ;;  %v11357_v37 = vand.u32 4294901760, %v22658_v42 }
 0xd9d   : > { %19242 = vmatmul.mubr.f32.vlgmr.msra.gmra.mrb[14].mxu0 %v22546_v3  ;;  %19632 = vmatmul.mubr.f32.vlgmr.msra.gmra.mrb[20].mxu1 %v22564_v34  ;;  %v22660_v43 = vsub.f32 %v17286_v16, %v11279_v46  ;;  %v22679_v38 = vpack.c.bf16 %v11279_v46, %v11276_v31  ;;  %v22688_v3 = vpack.c.bf16 %v11285_v50, %v11282_v48  ;;  %v11871_v31 = vand.u32 4294901760, %v11870_v8 }
 0xd9e   : > { %20377 = vmatpush3.bf16.msra.mxu0 %v22549_v51  ;;  %20557 = vmatpush3.bf16.msra.mxu1 %v21660_v35 }
 0xd9f   : > { %20378 = vmatprep.subr.bf16.mxu0 %v21286_v19  ;;  %20558 = vmatprep.subr.bf16.mxu1 %v21286_v19  ;;  %v11364_v59 = vand.u32 4294901760, %v22660_v43 }
 0xda0   : > { %19252 = vmatprep.mubr.msk.f32.mxu0 %vm21285_vm0, %v21284_v0  ;;  %19642 = vmatprep.mubr.msk.f32.mxu1 %vm21285_vm0, %v21284_v0 }
 0xda1   : > { %v11365_v49 = vsub.f32 %v22660_v43, %v11364_v59  ;;  %v20418_v34 = vpack.c.bf16 %v11364_v59, %v11357_v37 }
 0xda2   : > { %20380 = vmatpush3.bf16.msra.mxu0 %v22567_v44  ;;  %20560 = vmatpush3.bf16.msra.mxu1 %v21670_v57 }
 0xda3   : > { %20381 = vmatprep.subr.bf16.mxu0 %v21286_v19  ;;  %20561 = vmatprep.subr.bf16.mxu1 %v21286_v19  ;;  %v11366_v54 = vand.u32 4294901760, %v11365_v49 }
 0xda5   : > { %19253 = vmatmul.mubr.f32.vlgmr.msra.gmra.mrb[14].mxu0 %v10858_v32  ;;  %19643 = vmatmul.mubr.f32.vlgmr.msra.gmra.mrb[20].mxu1 %v14197_v17  ;;  %v20406_v32 = vpack.c.bf16 %v22660_v43, %v22658_v42  ;;  %v11849_v17 = vsub.f32 %v17293_v33, %v11769_v56 }
 0xda6   : > { %20383 = vmatpush3.bf16.msra.mxu0 %v20382_v14  ;;  %20563 = vmatpush3.bf16.msra.mxu1 %v21682_v20  ;;  %v11273_v20 = vsel %vm1249_vm2, %v22359_v58, 0  ;;  %v11377_v58 = vsub.f32 %v17288_v41, %v11285_v50  ;;  %v11858_v14 = vsub.f32 %v11856_v22, %v11857_v39  ;;  %v11872_v41 = vsub.f32 %v11870_v8, %v11871_v31 }
 0xda7   : > { %20384 = vmatprep.subr.bf16.mxu0 %v21286_v19  ;;  %20564 = vmatprep.subr.bf16.mxu1 %v21286_v19  ;;  %v22662_v12 = vand.u32 4294901760, %v11273_v20  ;;  %v11850_v18 = vand.u32 4294901760, %v11849_v17 }
 0xda8   : > { %19263 = vmatprep.mubr.msk.f32.mxu0 %vm21285_vm0, %v21284_v0  ;;  %19653 = vmatprep.mubr.msk.f32.mxu1 %vm21285_vm0, %v21284_v0  ;;  %v11378_v1 = vand.u32 4294901760, %v11377_v58  ;;  %v11859_v46 = vand.u32 4294901760, %v11858_v14 }
 0xda9   : > { %v11345_v26 = vsub.f32 %v11273_v20, %v22662_v12  ;;  %v11851_v4 = vsub.f32 %v11849_v17, %v11850_v18 }
 0xdaa   : > { %20386 = vmatpush3.bf16.msra.mxu0 %v20385_v24  ;;  %20566 = vmatpush3.bf16.msra.mxu1 %v21684_v21  ;;  %v11370_v21 = vsub.f32 %v17287_v40, %v11282_v48  ;;  %v11379_v55 = vsub.f32 %v11377_v58, %v11378_v1  ;;  %v11864_v24 = vand.u32 4294901760, %v11863_v45  ;;  %v11873_v48 = vand.u32 4294901760, %v11872_v41 }
 0xdab   : > { %20387 = vmatprep.subr.bf16.mxu0 %v21286_v19  ;;  %20567 = vmatprep.subr.bf16.mxu1 %v21286_v19  ;;  %v11346_v53 = vand.u32 4294901760, %v11345_v26  ;;  %v11852_v16 = vand.u32 4294901760, %v11851_v4 }
 0xdac   : > { %v11371_v62 = vand.u32 4294901760, %v11370_v21  ;;  %v11380_v11 = vand.u32 4294901760, %v11379_v55  ;;  %v11865_v40 = vsub.f32 %v11863_v45, %v11864_v24  ;;  %v20457_v59 = vpack.c.bf16 %v11871_v31, %v11864_v24 }
 0xdad   : > { %19264 = vmatmul.mubr.f32.vlgmr.msra.gmra.mrb[14].mxu0 %v22534_v61  ;;  %19654 = vmatmul.mubr.f32.vlgmr.msra.gmra.mrb[20].mxu1 %v22561_v2  ;;  %v11347_v6 = vsub.f32 %v11345_v26, %v11346_v53  ;;  %v20436_v20 = vpack.c.bf16 %v11859_v46, %v11852_v16 }
 0xdae   : > { %20389 = vmatpush3.bf16.msra.mxu0 %v22549_v51  ;;  %20569 = vmatpush3.bf16.msra.mxu1 %v21660_v35  ;;  %v11358_v35 = vsub.f32 %v22658_v42, %v11357_v37  ;;  %v11372_v51 = vsub.f32 %v11370_v21, %v11371_v62  ;;  %v20433_v42 = vpack.c.bf16 %v11778_v63, %v11775_v30  ;;  %v11866_v43 = vand.u32 4294901760, %v11865_v40  ;;  %v17305_v63 = vld [vmem:[%s23115_s3 + $0x30] sm:$0xff] }
 0xdaf   : > { %20390 = vmatprep.subr.bf16.mxu0 %v21286_v19  ;;  %20570 = vmatprep.subr.bf16.mxu1 %v21286_v19  ;;  %v11348_v25 = vand.u32 4294901760, %v11347_v6  ;;  %v20454_v37 = vpack.c.bf16 %v11857_v39, %v11850_v18  ;;  %v15526_v30 = vand.u32 4294901760, %v17304_v29  ;;  %v17306_v18 = vld [vmem:[%s23115_s3 + $0x38] sm:$0xff] }
 0xdb0   : > { %19274 = vmatprep.mubr.msk.f32.mxu0 %vm21285_vm0, %v21284_v0  ;;  %19664 = vmatprep.mubr.msk.f32.mxu1 %vm21285_vm0, %v21284_v0  ;;  %v20439_v50 = vpack.c.bf16 %v11873_v48, %v11866_v43  ;;  %v15532_v4 = vand.u32 4294901760, %v17306_v18 }
 0xdb2   : > { %20392 = vmatpush3.bf16.msra.mxu0 %v22567_v44  ;;  %20572 = vmatpush3.bf16.msra.mxu1 %v21670_v57  ;;  %v11359_v57 = vand.u32 4294901760, %v11358_v35  ;;  %v20421_v44 = vpack.c.bf16 %v11378_v1, %v11371_v62  ;;  %v15624_v16 = vsub.f32 %v17306_v18, %v15532_v4 }
 0xdb3   : > { %20393 = vmatprep.subr.bf16.mxu0 %v21286_v19 }
 0xdb4   : > { %v20400_v10 = vpack.c.bf16 %v11366_v54, %v11359_v57  ;;  %v21127_v54 = vld [vmem:[%s23116_s4] ss:$0 sm:$0xff]  ;;  %v15625_v43 = vand.u32 4294901760, %v15624_v16 }
 0xdb5   : > { %19275 = vmatmul.mubr.f32.vlgmr.msra.gmra.mrb[14].mxu0 %v22534_v61  ;;  %19665 = vmatmul.mubr.f32.vlgmr.msra.gmra.mrb[20].mxu1 %v22561_v2  ;;  %v11373_v61 = vand.u32 4294901760, %v11372_v51  ;;  %v20409_v2 = vpack.c.bf16 %v11377_v58, %v11370_v21  ;;  %v20442_v21 = vpack.c.bf16 %v11856_v22, %v11849_v17  ;;  %v20445_v58 = vpack.c.bf16 %v11870_v8, %v11863_v45 }
 0xdb6   : > { %20395 = vmatpush3.bf16.msra.mxu0 %v22679_v38  ;;  %19285 = vmatprep.mubr.msk.f32.mxu0 %vm21285_vm0, %v21284_v0  ;;  %v15529_v8 = vand.u32 4294901760, %v17305_v63 }
 0xdb7   : > { %20396 = vmatprep.subr.bf16.mxu0 %v21286_v19  ;;  %v20403_v60 = vpack.c.bf16 %v11380_v11, %v11373_v61 }
 0xdba   : > { %20398 = vmatpush3.bf16.msra.mxu0 %v22688_v3 }
 0xdbb   : > { %20399 = vmatprep.subr.bf16.mxu0 %v21286_v19 }
 0xdbd   : > { %19286 = vmatmul.mubr.f32.vlgmr.msra.gmra.mrb[14].mxu0 %v11348_v25 }
 0xdbe   : > { %20401 = vmatpush3.bf16.msra.mxu0 %v20400_v10  ;;  %19296 = vmatprep.mubr.msk.f32.mxu0 %vm21285_vm0, %v21284_v0 }
 0xdbf   : > { %20402 = vmatprep.subr.bf16.mxu0 %v21286_v19 }
 0xdc2   : > { %20404 = vmatpush3.bf16.msra.mxu0 %v20403_v60 }
 0xdc3   : > { %20405 = vmatprep.subr.bf16.mxu0 %v21286_v19 }
 0xdc5   : > { %19297 = vmatmul.mubr.f32.vlgmr.msra.gmra.mrb[14].mxu0 %v22662_v12 }
 0xdc6   : > { %20407 = vmatpush3.bf16.msra.mxu0 %v20406_v32  ;;  %19307 = vmatprep.mubr.msk.f32.mxu0 %vm21285_vm0, %v21284_v0 }
 0xdc7   : > { %20408 = vmatprep.subr.bf16.mxu0 %v21286_v19 }
 0xdca   : > { %20410 = vmatpush3.bf16.msra.mxu0 %v20409_v2 }
 0xdcb   : > { %20411 = vmatprep.subr.bf16.mxu0 %v21286_v19 }
 0xdcd   : > { %19308 = vmatmul.mubr.f32.vlgmr.msra.gmra.mrb[14].mxu0 %v11345_v26 }
 0xdce   : > { %20413 = vmatpush3.bf16.msra.mxu0 %v22679_v38  ;;  %19318 = vmatprep.mubr.msk.f32.mxu0 %vm21285_vm0, %v21284_v0 }
 0xdcf   : > { %20414 = vmatprep.subr.bf16.mxu0 %v21286_v19 }
 0xdd2   : > { %20416 = vmatpush3.bf16.msra.mxu0 %v22688_v3 }
 0xdd3   : > { %20417 = vmatprep.subr.bf16.mxu0 %v21286_v19 }
 0xdd5   : > { %19319 = vmatmul.mubr.f32.vlgmr.msra.gmra.mrb[14].mxu0 %v11346_v53 }
 0xdd6   : > { %20419 = vmatpush3.bf16.msra.mxu0 %v20418_v34  ;;  %19329 = vmatprep.mubr.msk.f32.mxu0 %vm21285_vm0, %v21284_v0 }
 0xdd7   : > { %20420 = vmatprep.subr.bf16.mxu0 %v21286_v19 }
 0xdda   : > { %20422 = vmatpush3.bf16.msra.mxu0 %v20421_v44 }
 0xddb   : > { %20423 = vmatprep.subr.bf16.mxu0 %v21286_v19 }
 0xddd   : > { %19330 = vmatmul.mubr.f32.vlgmr.msra.gmra.mrb[14].mxu0 %v22662_v12 }
 0xdde   : > { %20425 = vmatpush3.bf16.msra.mxu0 %v22679_v38  ;;  %19340 = vmatprep.mubr.msk.f32.mxu0 %vm21285_vm0, %v21284_v0 }
 0xddf   : > { %20426 = vmatprep.subr.bf16.mxu0 %v21286_v19 }
 0xde2   : > { %20428 = vmatpush3.bf16.msra.mxu0 %v22688_v3 }
 0xde3   : > { %20429 = vmatprep.subr.bf16.mxu0 %v21286_v19 }
 0xde5   : > { %19341 = vmatmul.mubr.f32.vlgmr.msra.gmra.mrb[14].mxu0 %v22662_v12 }
 0xde6   : > { %20431 = vmatpush3.bf16.msra.mxu0 %v20430_v15  ;;  %19351 = vmatprep.mubr.msk.f32.mxu0 %vm21285_vm0, %v21284_v0 }
 0xde7   : > { %20432 = vmatprep.subr.bf16.mxu0 %v21286_v19 }
 0xdea   : > { %20434 = vmatpush3.bf16.msra.mxu0 %v20433_v42 }
 0xdeb   : > { %20435 = vmatprep.subr.bf16.mxu0 %v21286_v19 }
 0xe58   : > { %v10770_v26 = vpop.f32.mrb[12].mxu0 }
 0xe59   : > { %v11766_v12 = vsel %vm1249_vm2, %v10770_v26, 0  ;;  %v19210_v38 = vpop.f32.mrb[13].mxu0 }
 0xe5a   : > { %v11837_v35 = vand.u32 4294901760, %v11766_v12 }
 0xe5c   : > { %v11838_v49 = vsub.f32 %v11766_v12, %v11837_v35 }
 0xe5e   : > { %v11839_v62 = vand.u32 4294901760, %v11838_v49 }
 0xe60   : > { %v11840_v1 = vsub.f32 %v11838_v49, %v11839_v62 }
 0xe62   : > { %v11841_v53 = vand.u32 4294901760, %v11840_v1 }
 0xe64   : > { %19352 = vmatmul.mubr.f32.vlgmr.msra.gmra.mrb[14].mxu0 %v11841_v53 }
 0xe65   : > { %20437 = vmatpush3.bf16.msra.mxu0 %v20436_v20  ;;  %19362 = vmatprep.mubr.msk.f32.mxu0 %vm21285_vm0, %v21284_v0 }
 0xe66   : > { %20438 = vmatprep.subr.bf16.mxu0 %v21286_v19 }
 0xe69   : > { %20440 = vmatpush3.bf16.msra.mxu0 %v20439_v50  ;;  %v22841_v50 = vpack.c.bf16 %v15532_v4, %v15529_v8 }
 0xe6a   : > { %20441 = vmatprep.subr.bf16.mxu0 %v21286_v19 }
 0xe6c   : > { %19363 = vmatmul.mubr.f32.vlgmr.msra.gmra.mrb[14].mxu0 %v11837_v35 }
 0xe6d   : > { %20443 = vmatpush3.bf16.msra.mxu0 %v20442_v21  ;;  %19373 = vmatprep.mubr.msk.f32.mxu0 %vm21285_vm0, %v21284_v0 }
 0xe6e   : > { %20444 = vmatprep.subr.bf16.mxu0 %v21286_v19 }
 0xe71   : > { %20446 = vmatpush3.bf16.msra.mxu0 %v20445_v58 }
 0xe72   : > { %20447 = vmatprep.subr.bf16.mxu0 %v21286_v19 }
 0xe74   : > { %19374 = vmatmul.mubr.f32.vlgmr.msra.gmra.mrb[14].mxu0 %v11838_v49 }
 0xe75   : > { %20449 = vmatpush3.bf16.msra.mxu0 %v20430_v15  ;;  %19384 = vmatprep.mubr.msk.f32.mxu0 %vm21285_vm0, %v21284_v0 }
 0xe76   : > { %20450 = vmatprep.subr.bf16.mxu0 %v21286_v19 }
 0xe79   : > { %20452 = vmatpush3.bf16.msra.mxu0 %v20433_v42 }
 0xe7a   : > { %20453 = vmatprep.subr.bf16.mxu0 %v21286_v19 }
 0xe7c   : > { %19385 = vmatmul.mubr.f32.vlgmr.msra.gmra.mrb[14].mxu0 %v11839_v62 }
 0xe7d   : > { %20455 = vmatpush3.bf16.msra.mxu0 %v20454_v37  ;;  %19395 = vmatprep.mubr.msk.f32.mxu0 %vm21285_vm0, %v21284_v0 }
 0xe7e   : > { %20456 = vmatprep.subr.bf16.mxu0 %v21286_v19 }
 0xe81   : > { %20458 = vmatpush3.bf16.msra.mxu0 %v20457_v59  ;;  %v15626_v59 = vsub.f32 %v15624_v16, %v15625_v43 }
 0xe82   : > { %20459 = vmatprep.subr.bf16.mxu0 %v21286_v19 }
 0xe84   : > { %19396 = vmatmul.mubr.f32.vlgmr.msra.gmra.mrb[14].mxu0 %v11837_v35 }
 0xe85   : > { %20461 = vmatpush3.bf16.msra.mxu0 %v20430_v15  ;;  %19406 = vmatprep.mubr.msk.f32.mxu0 %vm21285_vm0, %v21284_v0  ;;  %v15617_v15 = vsub.f32 %v17305_v63, %v15529_v8 }
 0xe86   : > { %20462 = vmatprep.subr.bf16.mxu0 %v21286_v19 }
 0xe87   : > { %v20589_v1 = vpack.c.bf16 %v15624_v16, %v15617_v15 }
 0xe88   : > { %v14607_v3 = vpop.f32.mrb[20].mxu1 }
 0xe89   : > { %20464 = vmatpush3.bf16.msra.mxu0 %v20433_v42  ;;  %v19666_v57 = vpop.f32.mrb[21].mxu1  ;;  %v20685_v51 = vadd.f32 %v21127_v54, %v14607_v3  ;;  %v15618_v42 = vand.u32 4294901760, %v15617_v15  ;;  %v15510_v3 = vld [vmem:[%s23115_s3] sm:$0xff] }
 0xe8a   : > { %19667 = vmatprep.subr.mxu0 %v21284_v0  ;;  %v15511_v57 = vld [vmem:[%s23115_s3 + $0x8] sm:$0xff] }
 0xe8b   : > { %vm14612_vm6 = vcmp.ge.f32.partialorder %v20685_v51, 0.0  ;;  %v15619_v37 = vsub.f32 %v15617_v15, %v15618_v42  ;;  %v20601_v54 = vpack.c.bf16 %v15625_v43, %v15618_v42  ;;  %v17309_v43 = vld [vmem:[%s23115_s3 + $0x50] sm:$0xff] }
 0xe8c   : > { %19407 = vmatmul.mubr.f32.vlgmr.msra.gmra.mrb[14].mxu0 %v11837_v35  ;;  %v14613_v55 = vsel %vm14612_vm6, 1.0, %v21287_v52  ;;  %v15627_v35 = vand.u32 4294901760, %v15626_v59 }
 0xe8d   : > { %19669 = vmatprep.mubr.msk.f32.mxu0 %vm21285_vm0, %v21284_v0  ;;  %v14614_v6 = vmul.f32 1e-06, %v14613_v55  ;;  %v15620_v38 = vand.u32 4294901760, %v15619_v37  ;;  %v16014_v55 = vand.u32 4294901760, %v15511_v57 }
 0xe8f   : > { %v14615_v10 = vadd.f32 %v20685_v51, %v14614_v6  ;;  %v20583_v49 = vpack.c.bf16 %v15627_v35, %v15620_v38  ;;  %v16011_v51 = vand.u32 4294901760, %v15510_v3  ;;  %v15512_v6 = vld [vmem:[%s23115_s3 + $0x10] sm:$0xff] }
 0xe91   : > { %21125 = vrcp.f32 %v14615_v10  ;;  %v15513_v10 = vld [vmem:[%s23115_s3 + $0x18] sm:$0xff] }
 0xe9b   : > { %v21126_v60 = vpop.eup %21125 }
 0xf5f   : > { %v12249_v61 = vpop.f32.mrb[14].mxu0 }
 0xf60   : > { %v12254_v11 = vmul.f32 %v21722_v28, %v12249_v61  ;;  %v19408_v25 = vpop.f32.mrb[15].mxu0 }
 0xf61   : > { %v16098_v25 = vsub.f32 %v15511_v57, %v16014_v55 }
 0xf62   : > { %v22769_v32 = vmul.f32 %v21126_v60, %v12254_v11  ;;  %16992 = vst.msk [vmem:[%s23122_s22] sm:$0xff] %vm1249_vm2, %v12254_v11  ;;  %v16091_v11 = vsub.f32 %v15510_v3, %v16011_v51  ;;  %v16017_v60 = vand.u32 4294901760, %v15512_v6  ;;  %s22979_s22 = scalar_lea.hbm %s23117_s5, %s22963_s12 }
 0xf64   : > { %v14619_v2 = vand.u32 4294901760, %v22769_v32  ;;  %v16008_v61 = vsel %vm1249_vm2, %v22769_v32, 0 }
 0xf66   : > { %v14696_v34 = vsub.f32 %v22769_v32, %v14619_v2  ;;  %19668 = vmatpush3.msra.mxu0 %v14619_v2  ;;  %v16099_v32 = vand.u32 4294901760, %v16098_v25 }
 0xf67   : > { %19670 = vmatmul.mubr.f32.vlgmr.msra.gmra.mrb[16].mxu0 %v21417_v13  ;;  %19672 = vmatprep.subr.mxu0 %v21284_v0 }
 0xf68   : > { %v14697_v52 = vand.u32 4294901760, %v14696_v34  ;;  %19674 = vmatprep.mubr.msk.f32.mxu0 %vm21285_vm0, %v21284_v0 }
 0xf6a   : > { %v14698_v28 = vsub.f32 %v14696_v34, %v14697_v52 }
 0xf6c   : > { %v14699_v44 = vand.u32 4294901760, %v14698_v28 }
 0xf6e   : > { %19673 = vmatpush3.msra.mxu0 %v14699_v44  ;;  %v16092_v44 = vand.u32 4294901760, %v16091_v11 }
 0xf6f   : > { %19675 = vmatmul.mubr.f32.vlgmr.msra.gmra.mrb[16].mxu0 %v21405_v5  ;;  %19677 = vmatprep.subr.mxu0 %v21284_v0 }
 0xf70   : > { %19678 = vmatpush3.msra.mxu0 %v14696_v34  ;;  %19679 = vmatprep.mubr.msk.f32.mxu0 %vm21285_vm0, %v21284_v0  ;;  %v22881_v34 = vand.u32 4294901760, %v16008_v61  ;;  %v20634_v16 = vpack.c.bf16 %v16099_v32, %v16092_v44 }
 0xf71   : > { %19682 = vmatprep.subr.mxu0 %v21284_v0 }
 0xf77   : > { %19680 = vmatmul.mubr.f32.vlgmr.msra.gmra.mrb[16].mxu0 %v21409_v7 }
 0xf78   : > { %19683 = vmatpush3.msra.mxu0 %v14619_v2  ;;  %19684 = vmatprep.mubr.msk.f32.mxu0 %vm21285_vm0, %v21284_v0 }
 0xf79   : > { %19687 = vmatprep.subr.mxu0 %v21284_v0 }
 0xf7f   : > { %19685 = vmatmul.mubr.f32.vlgmr.msra.gmra.mrb[16].mxu0 %v21413_v9 }
 0xf80   : > { %19688 = vmatpush3.msra.mxu0 %v14697_v52  ;;  %19689 = vmatprep.mubr.msk.f32.mxu0 %vm21285_vm0, %v21284_v0  ;;  %v16105_v52 = vsub.f32 %v15512_v6, %v16017_v60 }
 0xf81   : > { %19692 = vmatprep.subr.mxu0 %v21284_v0 }
 0xf87   : > { %19690 = vmatmul.mubr.f32.vlgmr.msra.gmra.mrb[16].mxu0 %v21405_v5 }
 0xf88   : > { %19693 = vmatpush3.msra.mxu0 %v14619_v2  ;;  %19694 = vmatprep.mubr.msk.f32.mxu0 %vm21285_vm0, %v21284_v0  ;;  %v16020_v2 = vand.u32 4294901760, %v15513_v10 }
 0xf89   : > { %19697 = vmatprep.subr.mxu0 %v21284_v0 }
 0xf8a   : > { %v16112_v28 = vsub.f32 %v15513_v10, %v16020_v2 }
 0xf8c   : > { %v20625_v15 = vpack.c.bf16 %v16112_v28, %v16105_v52 }
 0xf8f   : > { %19695 = vmatmul.mubr.f32.vlgmr.msra.gmra.mrb[16].mxu0 %v21405_v5 }
 0xf90   : > { %19699 = vmatprep.mubr.msk.f32.mxu0 %vm21285_vm0, %v21284_v0 }
0x1062   : > { %v15060_v33 = vpop.f32.mrb[16].mxu0 }
0x1063   : > { %v15065_v27 = vand.u32 4294901760, %v15060_v33  ;;  %v19696_v56 = vpop.f32.mrb[17].mxu0  ;;  %v15520_v39 = vsel %vm1249_vm2, %v15060_v33, 0 }
0x1064   : > { %v22831_v14 = vand.u32 4294901760, %v15520_v39  ;;  %v16093_v56 = vsub.f32 %v16091_v11, %v16092_v44 }
0x1065   : > { %v15142_v36 = vsub.f32 %v15060_v33, %v15065_v27  ;;  %19698 = vmatpush3.msra.mxu0 %v15065_v27  ;;  %v16080_v33 = vsub.f32 %v16008_v61, %v22881_v34 }
0x1066   : > { %19700 = vmatmul.mubr.f32.vlgmr.msra.gmra.mrb[18].mxu0 %v21417_v13  ;;  %19702 = vmatprep.subr.mxu0 %v21284_v0  ;;  %v17303_v13 = vld [vmem:[%s23115_s3 + $0x20] sm:$0xff]  ;;  %v15592_v46 = vsub.f32 %v15520_v39, %v22831_v14 }
0x1067   : > { %v15143_v17 = vand.u32 4294901760, %v15142_v36  ;;  %19704 = vmatprep.mubr.msk.f32.mxu0 %vm21285_vm0, %v21284_v0 }
0x1068   : > { %v15593_v48 = vand.u32 4294901760, %v15592_v46 }
0x1069   : > { %v15144_v22 = vsub.f32 %v15142_v36, %v15143_v17 }
0x106a   : > { %v15594_v26 = vsub.f32 %v15592_v46, %v15593_v48 }
0x106b   : > { %v15145_v23 = vand.u32 4294901760, %v15144_v22  ;;  %v16113_v22 = vand.u32 4294901760, %v16112_v28 }
0x106d   : > { %19703 = vmatpush3.msra.mxu0 %v15145_v23  ;;  %v16081_v23 = vand.u32 4294901760, %v16080_v33  ;;  %v16114_v63 = vsub.f32 %v16112_v28, %v16113_v22 }
0x106e   : > { %19705 = vmatmul.mubr.f32.vlgmr.msra.gmra.mrb[18].mxu0 %v21405_v5  ;;  %19707 = vmatprep.subr.mxu0 %v21284_v0 }
0x106f   : > { %19708 = vmatpush3.msra.mxu0 %v15142_v36  ;;  %19709 = vmatprep.mubr.msk.f32.mxu0 %vm21285_vm0, %v21284_v0  ;;  %v16100_v36 = vsub.f32 %v16098_v25, %v16099_v32  ;;  %v16082_v18 = vsub.f32 %v16080_v33, %v16081_v23 }
0x1070   : > { %19712 = vmatprep.subr.mxu0 %v21284_v0 }
0x1071   : > { %v16083_v8 = vand.u32 4294901760, %v16082_v18 }
0x1076   : > { %19710 = vmatmul.mubr.f32.vlgmr.msra.gmra.mrb[18].mxu0 %v21409_v7  ;;  %v15523_v7 = vand.u32 4294901760, %v17303_v13 }
0x1077   : > { %19713 = vmatpush3.msra.mxu0 %v15065_v27  ;;  %19714 = vmatprep.mubr.msk.f32.mxu0 %vm21285_vm0, %v21284_v0 }
0x1078   : > { %19717 = vmatprep.subr.mxu0 %v21284_v0  ;;  %v15603_v45 = vsub.f32 %v17303_v13, %v15523_v7  ;;  %v22838_v40 = vpack.c.bf16 %v15526_v30, %v15523_v7  ;;  %v22893_v13 = vpack.c.bf16 %v16020_v2, %v16017_v60  ;;  %v16101_v7 = vand.u32 4294901760, %v16100_v36 }
0x107a   : > { %v15604_v24 = vand.u32 4294901760, %v15603_v45 }
0x107c   : > { %v15605_v41 = vsub.f32 %v15603_v45, %v15604_v24 }
0x107e   : > { %19715 = vmatmul.mubr.f32.vlgmr.msra.gmra.mrb[18].mxu0 %v21413_v9  ;;  %v15610_v9 = vsub.f32 %v17304_v29, %v15526_v30  ;;  %v15606_v21 = vand.u32 4294901760, %v15605_v41  ;;  %v16094_v29 = vand.u32 4294901760, %v16093_v56 }
0x107f   : > { %19718 = vmatpush3.msra.mxu0 %v15143_v17  ;;  %19719 = vmatprep.mubr.msk.f32.mxu0 %vm21285_vm0, %v21284_v0  ;;  %v16106_v17 = vand.u32 4294901760, %v16105_v52 }
0x1080   : > { %19722 = vmatprep.subr.mxu0 %v21284_v0  ;;  %v15611_v31 = vand.u32 4294901760, %v15610_v9  ;;  %v20586_v62 = vpack.c.bf16 %v15610_v9, %v15603_v45  ;;  %v20616_v39 = vpack.c.bf16 %v16101_v7, %v16094_v29 }
0x1081   : > { %v16107_v30 = vsub.f32 %v16105_v52, %v16106_v17 }
0x1082   : > { %v15612_v20 = vsub.f32 %v15610_v9, %v15611_v31  ;;  %v20598_v53 = vpack.c.bf16 %v15611_v31, %v15604_v24  ;;  %v16115_v9 = vand.u32 4294901760, %v16114_v63  ;;  %v20637_v24 = vpack.c.bf16 %v16113_v22, %v16106_v17  ;;  %v17307_v31 = vld [vmem:[%s23115_s3 + $0x40] sm:$0xff] }
0x1083   : > { %v16108_v45 = vand.u32 4294901760, %v16107_v30 }
0x1084   : > { %v15613_v58 = vand.u32 4294901760, %v15612_v20 }
0x1085   : > { %v20619_v4 = vpack.c.bf16 %v16115_v9, %v16108_v45 }
0x1086   : > { %19720 = vmatmul.mubr.f32.vlgmr.msra.gmra.mrb[18].mxu0 %v21405_v5  ;;  %v20580_v12 = vpack.c.bf16 %v15613_v58, %v15606_v21 }
0x1087   : > { %19723 = vmatpush3.msra.mxu0 %v15065_v27  ;;  %19724 = vmatprep.mubr.msk.f32.mxu0 %vm21285_vm0, %v21284_v0  ;;  %v20610_v27 = vpack.c.bf16 %v16014_v55, %v16011_v51 }
0x1088   : > { %20573 = vmatprep.subr.bf16.mxu0 %v21286_v19 }
0x108e   : > { %19725 = vmatmul.mubr.f32.vlgmr.msra.gmra.mrb[18].mxu0 %v21405_v5  ;;  %v15595_v5 = vand.u32 4294901760, %v15594_v26 }
0x108f   : > { %20575 = vmatpush3.bf16.msra.mxu0 %v22838_v40  ;;  %19735 = vmatprep.mubr.msk.f32.mxu0 %vm21285_vm0, %v21284_v0 }
0x1090   : > { %20576 = vmatprep.subr.bf16.mxu0 %v21286_v19 }
0x1093   : > { %20578 = vmatpush3.bf16.msra.mxu0 %v22841_v50 }
0x1094   : > { %20579 = vmatprep.subr.bf16.mxu0 %v21286_v19 }
0x1096   : > { %19736 = vmatmul.mubr.f32.vlgmr.msra.gmra.mrb[20].mxu0 %v15595_v5 }
0x1097   : > { %20581 = vmatpush3.bf16.msra.mxu0 %v20580_v12  ;;  %19746 = vmatprep.mubr.msk.f32.mxu0 %vm21285_vm0, %v21284_v0 }
0x1098   : > { %20582 = vmatprep.subr.bf16.mxu0 %v21286_v19 }
0x109b   : > { %20584 = vmatpush3.bf16.msra.mxu0 %v20583_v49 }
0x109c   : > { %20585 = vmatprep.subr.bf16.mxu0 %v21286_v19 }
0x109e   : > { %19747 = vmatmul.mubr.f32.vlgmr.msra.gmra.mrb[20].mxu0 %v22831_v14 }
0x109f   : > { %20587 = vmatpush3.bf16.msra.mxu0 %v20586_v62  ;;  %19757 = vmatprep.mubr.msk.f32.mxu0 %vm21285_vm0, %v21284_v0 }
0x10a0   : > { %20588 = vmatprep.subr.bf16.mxu0 %v21286_v19 }
0x10a3   : > { %20590 = vmatpush3.bf16.msra.mxu0 %v20589_v1 }
0x10a4   : > { %20591 = vmatprep.subr.bf16.mxu0 %v21286_v19 }
0x10a6   : > { %19758 = vmatmul.mubr.f32.vlgmr.msra.gmra.mrb[20].mxu0 %v15592_v46  ;;  %v17308_v46 = vld [vmem:[%s23115_s3 + $0x48] sm:$0xff] }
0x10a7   : > { %20593 = vmatpush3.bf16.msra.mxu0 %v22838_v40  ;;  %19768 = vmatprep.mubr.msk.f32.mxu0 %vm21285_vm0, %v21284_v0  ;;  %v16507_v41 = vand.u32 4294901760, %v17308_v46 }
0x10a8   : > { %20594 = vmatprep.subr.bf16.mxu0 %v21286_v19 }
0x10a9   : > { %v16591_v42 = vsub.f32 %v17308_v46, %v16507_v41 }
0x10ab   : > { %20596 = vmatpush3.bf16.msra.mxu0 %v22841_v50  ;;  %v16592_v37 = vand.u32 4294901760, %v16591_v42 }
0x10ac   : > { %20597 = vmatprep.subr.bf16.mxu0 %v21286_v19 }
0x10ad   : > { %v16593_v38 = vsub.f32 %v16591_v42, %v16592_v37 }
0x10ae   : > { %19769 = vmatmul.mubr.f32.vlgmr.msra.gmra.mrb[20].mxu0 %v15593_v48  ;;  %v17310_v48 = vld [vmem:[%s23115_s3 + $0x58] sm:$0xff] }
0x10af   : > { %20599 = vmatpush3.bf16.msra.mxu0 %v20598_v53  ;;  %19779 = vmatprep.mubr.msk.f32.mxu0 %vm21285_vm0, %v21284_v0  ;;  %v16513_v21 = vand.u32 4294901760, %v17310_v48  ;;  %v16594_v1 = vand.u32 4294901760, %v16593_v38 }
0x10b0   : > { %20600 = vmatprep.subr.bf16.mxu0 %v21286_v19 }
0x10b1   : > { %v16605_v26 = vsub.f32 %v17310_v48, %v16513_v21 }
0x10b3   : > { %20602 = vmatpush3.bf16.msra.mxu0 %v20601_v54  ;;  %v16606_v62 = vand.u32 4294901760, %v16605_v26 }
0x10b4   : > { %20603 = vmatprep.subr.bf16.mxu0 %v21286_v19 }
0x10b5   : > { %v16607_v3 = vsub.f32 %v16605_v26, %v16606_v62 }
0x10b6   : > { %19780 = vmatmul.mubr.f32.vlgmr.msra.gmra.mrb[20].mxu0 %v22831_v14 }
0x10b7   : > { %20605 = vmatpush3.bf16.msra.mxu0 %v22838_v40  ;;  %19790 = vmatprep.mubr.msk.f32.mxu0 %vm21285_vm0, %v21284_v0  ;;  %v16504_v40 = vand.u32 4294901760, %v17307_v31  ;;  %v16608_v55 = vand.u32 4294901760, %v16607_v3 }
0x10b8   : > { %20606 = vmatprep.subr.bf16.mxu0 %v21286_v19 }
0x10b9   : > { %v16584_v20 = vsub.f32 %v17307_v31, %v16504_v40  ;;  %v20646_v35 = vpack.c.bf16 %v16507_v41, %v16504_v40 }
0x10bb   : > { %20608 = vmatpush3.bf16.msra.mxu0 %v22841_v50  ;;  %v16510_v50 = vand.u32 4294901760, %v17309_v43  ;;  %v16585_v58 = vand.u32 4294901760, %v16584_v20  ;;  %v20658_v10 = vpack.c.bf16 %v16591_v42, %v16584_v20 }
0x10bc   : > { %20609 = vmatprep.subr.bf16.mxu0 %v21286_v19 }
0x10bd   : > { %v16598_v59 = vsub.f32 %v17309_v43, %v16510_v50  ;;  %v16586_v12 = vsub.f32 %v16584_v20, %v16585_v58  ;;  %v20649_v54 = vpack.c.bf16 %v16513_v21, %v16510_v50 }
0x10be   : > { %19791 = vmatmul.mubr.f32.vlgmr.msra.gmra.mrb[20].mxu0 %v22831_v14  ;;  %v20622_v14 = vpack.c.bf16 %v16098_v25, %v16091_v11  ;;  %v20670_v11 = vpack.c.bf16 %v16592_v37, %v16585_v58 }
0x10bf   : > { %20611 = vmatpush3.bf16.msra.mxu0 %v20610_v27  ;;  %19801 = vmatprep.mubr.msk.f32.mxu0 %vm21285_vm0, %v21284_v0  ;;  %v16587_v5 = vand.u32 4294901760, %v16586_v12  ;;  %v16599_v49 = vand.u32 4294901760, %v16598_v59  ;;  %v20661_v61 = vpack.c.bf16 %v16605_v26, %v16598_v59 }
0x10c0   : > { %20612 = vmatprep.subr.bf16.mxu0 %v21286_v19 }
0x10c1   : > { %v16600_v53 = vsub.f32 %v16598_v59, %v16599_v49  ;;  %v20652_v57 = vpack.c.bf16 %v16594_v1, %v16587_v5  ;;  %v20673_v25 = vpack.c.bf16 %v16606_v62, %v16599_v49 }
0x10c3   : > { %20614 = vmatpush3.bf16.msra.mxu0 %v22893_v13  ;;  %v16601_v51 = vand.u32 4294901760, %v16600_v53 }
0x10c4   : > { %20615 = vmatprep.subr.bf16.mxu0 %v21286_v19 }
0x10c5   : > { %v20655_v6 = vpack.c.bf16 %v16608_v55, %v16601_v51 }
0x10c6   : > { %19802 = vmatmul.mubr.f32.vlgmr.msra.gmra.mrb[20].mxu0 %v16083_v8 }
0x10c7   : > { %20617 = vmatpush3.bf16.msra.mxu0 %v20616_v39  ;;  %19812 = vmatprep.mubr.msk.f32.mxu0 %vm21285_vm0, %v21284_v0 }
0x10c8   : > { %20618 = vmatprep.subr.bf16.mxu0 %v21286_v19 }
0x10cb   : > { %20620 = vmatpush3.bf16.msra.mxu0 %v20619_v4 }
0x10cc   : > { %20621 = vmatprep.subr.bf16.mxu0 %v21286_v19 }
0x10ce   : > { %19813 = vmatmul.mubr.f32.vlgmr.msra.gmra.mrb[20].mxu0 %v22881_v34 }
0x10cf   : > { %20623 = vmatpush3.bf16.msra.mxu0 %v20622_v14  ;;  %19823 = vmatprep.mubr.msk.f32.mxu0 %vm21285_vm0, %v21284_v0 }
0x10d0   : > { %20624 = vmatprep.subr.bf16.mxu0 %v21286_v19 }
0x10d3   : > { %20626 = vmatpush3.bf16.msra.mxu0 %v20625_v15 }
0x10d4   : > { %20627 = vmatprep.subr.bf16.mxu0 %v21286_v19 }
0x10d6   : > { %19824 = vmatmul.mubr.f32.vlgmr.msra.gmra.mrb[20].mxu0 %v16080_v33 }
0x10d7   : > { %20629 = vmatpush3.bf16.msra.mxu0 %v20610_v27  ;;  %19834 = vmatprep.mubr.msk.f32.mxu0 %vm21285_vm0, %v21284_v0 }
0x10d8   : > { %20630 = vmatprep.subr.bf16.mxu0 %v21286_v19 }
0x10db   : > { %20632 = vmatpush3.bf16.msra.mxu0 %v22893_v13 }
0x10dc   : > { %20633 = vmatprep.subr.bf16.mxu0 %v21286_v19 }
0x10de   : > { %19835 = vmatmul.mubr.f32.vlgmr.msra.gmra.mrb[20].mxu0 %v16081_v23 }
0x10df   : > { %20635 = vmatpush3.bf16.msra.mxu0 %v20634_v16  ;;  %19845 = vmatprep.mubr.msk.f32.mxu0 %vm21285_vm0, %v21284_v0 }
0x10e0   : > { %20636 = vmatprep.subr.bf16.mxu0 %v21286_v19 }
0x10e3   : > { %20638 = vmatpush3.bf16.msra.mxu0 %v20637_v24 }
0x10e4   : > { %20639 = vmatprep.subr.bf16.mxu0 %v21286_v19 }
0x10e6   : > { %19846 = vmatmul.mubr.f32.vlgmr.msra.gmra.mrb[20].mxu0 %v22881_v34 }
0x10e7   : > { %20641 = vmatpush3.bf16.msra.mxu0 %v20610_v27  ;;  %19856 = vmatprep.mubr.msk.f32.mxu0 %vm21285_vm0, %v21284_v0 }
0x10e8   : > { %20642 = vmatprep.subr.bf16.mxu0 %v21286_v19 }
0x10eb   : > { %20644 = vmatpush3.bf16.msra.mxu0 %v22893_v13 }
0x10ec   : > { %20645 = vmatprep.subr.bf16.mxu0 %v21286_v19 }
0x10ee   : > { %19857 = vmatmul.mubr.f32.vlgmr.msra.gmra.mrb[20].mxu0 %v22881_v34 }
0x10ef   : > { %20647 = vmatpush3.bf16.msra.mxu0 %v20646_v35  ;;  %19867 = vmatprep.mubr.msk.f32.mxu0 %vm21285_vm0, %v21284_v0 }
0x10f0   : > { %20648 = vmatprep.subr.bf16.mxu0 %v21286_v19 }
0x10f3   : > { %20650 = vmatpush3.bf16.msra.mxu0 %v20649_v54 }
0x10f4   : > { %20651 = vmatprep.subr.bf16.mxu0 %v21286_v19 }
0x1161   : > { %v15506_v60 = vpop.f32.mrb[18].mxu0 }
0x1162   : > { %v16501_v2 = vsel %vm1249_vm2, %v15506_v60, 0  ;;  %v19726_v34 = vpop.f32.mrb[19].mxu0 }
0x1163   : > { %v16572_v52 = vand.u32 4294901760, %v16501_v2 }
0x1165   : > { %v16573_v28 = vsub.f32 %v16501_v2, %v16572_v52 }
0x1167   : > { %v16574_v44 = vand.u32 4294901760, %v16573_v28 }
0x1169   : > { %v16575_v32 = vsub.f32 %v16573_v28, %v16574_v44 }
0x116b   : > { %v16576_v33 = vand.u32 4294901760, %v16575_v32 }
0x116d   : > { %19868 = vmatmul.mubr.f32.vlgmr.msra.gmra.mrb[20].mxu0 %v16576_v33 }
0x116e   : > { %20653 = vmatpush3.bf16.msra.mxu0 %v20652_v57  ;;  %19878 = vmatprep.mubr.msk.f32.mxu0 %vm21285_vm0, %v21284_v0 }
0x116f   : > { %20654 = vmatprep.subr.bf16.mxu0 %v21286_v19 }
0x1172   : > { %20656 = vmatpush3.bf16.msra.mxu0 %v20655_v6 }
0x1173   : > { %20657 = vmatprep.subr.bf16.mxu0 %v21286_v19 }
0x1175   : > { %19879 = vmatmul.mubr.f32.vlgmr.msra.gmra.mrb[20].mxu0 %v16572_v52 }
0x1176   : > { %20659 = vmatpush3.bf16.msra.mxu0 %v20658_v10  ;;  %19889 = vmatprep.mubr.msk.f32.mxu0 %vm21285_vm0, %v21284_v0 }
0x1177   : > { %20660 = vmatprep.subr.bf16.mxu0 %v21286_v19 }
0x117a   : > { %20662 = vmatpush3.bf16.msra.mxu0 %v20661_v61 }
0x117b   : > { %20663 = vmatprep.subr.bf16.mxu0 %v21286_v19 }
0x117d   : > { %19890 = vmatmul.mubr.f32.vlgmr.msra.gmra.mrb[20].mxu0 %v16573_v28 }
0x117e   : > { %20665 = vmatpush3.bf16.msra.mxu0 %v20646_v35  ;;  %19900 = vmatprep.mubr.msk.f32.mxu0 %vm21285_vm0, %v21284_v0 }
0x117f   : > { %20666 = vmatprep.subr.bf16.mxu0 %v21286_v19 }
0x1182   : > { %20668 = vmatpush3.bf16.msra.mxu0 %v20649_v54 }
0x1183   : > { %20669 = vmatprep.subr.bf16.mxu0 %v21286_v19 }
0x1185   : > { %19901 = vmatmul.mubr.f32.vlgmr.msra.gmra.mrb[20].mxu0 %v16574_v44 }
0x1186   : > { %20671 = vmatpush3.bf16.msra.mxu0 %v20670_v11  ;;  %19911 = vmatprep.mubr.msk.f32.mxu0 %vm21285_vm0, %v21284_v0 }
0x1187   : > { %20672 = vmatprep.subr.bf16.mxu0 %v21286_v19 }
0x118a   : > { %20674 = vmatpush3.bf16.msra.mxu0 %v20673_v25 }
0x118b   : > { %20675 = vmatprep.subr.bf16.mxu0 %v21286_v19 }
0x118d   : > { %19912 = vmatmul.mubr.f32.vlgmr.msra.gmra.mrb[20].mxu0 %v16572_v52 }
0x118e   : > { %20677 = vmatpush3.bf16.msra.mxu0 %v20646_v35  ;;  %19922 = vmatprep.mubr.msk.f32.mxu0 %vm21285_vm0, %v21284_v0 }
0x118f   : > { %20678 = vmatprep.subr.bf16.mxu0 %v21286_v19 }
0x1192   : > { %20680 = vmatpush3.bf16.msra.mxu0 %v20649_v54 }
0x1195   : > { %19923 = vmatmul.mubr.f32.vlgmr.msra.gmra.mrb[20].mxu0 %v16572_v52 }
0x1196   : > { %21141 = shalt.err (!%p21138_p3)
}
0x1197   : > { %s21142_s10 = scalar_lea.hbm %s22969_s23, 128  ;;  %s21146_s19 = scalar_lea.hbm %s23118_s6, 512 }
0x1198   : > { %p21143_p4 = scmp.ne.s32.totalorder %s22969_s23, %s21142_s10  ;;  %p21147_p9 = scmp.lt.u32.totalorder %s22969_s23, %s23118_s6 }
0x1199   : > { %p21148_p10 = scmp.lt.u32.totalorder %s21146_s19, %s21142_s10  ;;  %p21150_p12 = scmp.lt.u32.totalorder %s21142_s10, %s22969_s23 }
0x119a   : > { %p21144_p7 = pnand %p21143_p4, %p21378_p5 }
0x119b   : > { %p21149_p11 = por %p21148_p10, %p21147_p9 }
0x119c   : > { %p21145_p8 = pneg %p21144_p7 }
0x119d   : > { %p21151_p13 = por %p21150_p12, %p21149_p11 }
0x119f   : > { %p21152_p0 = pnand %p21151_p13, %p21145_p8 }
0x11a1   : > { %21155 = shalt.err (!%p21152_p0)
}
0x11a2   : > { %21063 = dma.vmem_to_hbm [thread:$0]  (%p21378_p5), %s22973_s24, 128, %s22969_s23, %s22981_s9  }
0x11a3   : > { %s23132_s21 = scalar_lea.vmem [#allocation2], %s22121_s18  ;;  %s23011_s10 = scalar_lea.hbm %s23119_s7, %s22963_s12 }
0x11a4   : > { %s17023_s0 = sshll.u32 %s23132_s21, 4  ;;  %s23133_s25 = scalar_lea.vmem [#allocation6], %s22121_s18  ;;  %s23013_s0 = int_to_ptr.vmem [resolvable:$true] %s17023_s0 }
0x11a5   : > { %s23017_s19 = sshll.u32 %s23133_s25, 4  ;;  %s16995_s20 = scalar_lea.sflag [#allocation3], %s22118_s17  ;;  %s17050_s19 = int_to_ptr.vmem [resolvable:$true] %s23017_s19 }
0x11a6   : > { %s21156_s1 = scalar_lea.vmem %s23013_s0, 128  ;;  %s21290_s23 = smov [#allocation2]  }
0x11a7   : > { %p21157_p1 = scmp.ne.s32.totalorder %s23013_s0, %s21156_s1  ;;  %s21160_s24 = sshll.u32 %s21290_s23, 4  ;;  %s21161_s24 = int_to_ptr.vmem [resolvable:$false] %s21160_s24 }
0x11a8   : > { %s21162_s21 = scalar_lea.vmem %s21161_s24, 256  ;;  %p21163_p4 = scmp.lt.s32.totalorder %s23013_s0, %s21161_s24 }
0x11a9   : > { %p21158_p2 = pnand %p21157_p1, %p21378_p5  ;;  %p21164_p7 = scmp.lt.s32.totalorder %s21162_s21, %s21156_s1 }
0x11ab   : > { %p21159_p3 = pneg %p21158_p2  ;;  %p21165_p8 = por %p21164_p7, %p21163_p4 }
0x11ad   : > { %p21166_p9 = pnand %p21165_p8, %p21159_p3 }
0x11af   : > { %21169 = shalt.err (!%p21166_p9)
}
0x11b0   : > { %s21170_s13 = scalar_lea.hbm %s22979_s22, 128  ;;  %s21174_s23 = scalar_lea.hbm %s23117_s5, 512 }
0x11b1   : > { %p21171_p10 = scmp.ne.s32.totalorder %s22979_s22, %s21170_s13  ;;  %p21175_p13 = scmp.lt.u32.totalorder %s22979_s22, %s23117_s5 }
0x11b2   : > { %p21176_p0 = scmp.lt.u32.totalorder %s21174_s23, %s21170_s13  ;;  %p21178_p2 = scmp.lt.u32.totalorder %s21170_s13, %s22979_s22 }
0x11b3   : > { %p21172_p11 = pnand %p21171_p10, %p21378_p5 }
0x11b4   : > { %p21177_p1 = por %p21176_p0, %p21175_p13 }
0x11b5   : > { %p21173_p12 = pneg %p21172_p11 }
0x11b6   : > { %p21179_p3 = por %p21178_p2, %p21177_p1 }
0x11b8   : > { %p21180_p4 = pnand %p21179_p3, %p21173_p12 }
0x11ba   : > { %21183 = shalt.err (!%p21180_p4)
}
0x11bb   : > { %21062 = dma.vmem_to_hbm [thread:$0]  (%p21378_p5), %s23013_s0, 128, %s22979_s22, %s16995_s20  }
0x11bc   : > { %s21184_s1 = scalar_lea.vmem %s17050_s19, 128  ;;  %s21291_s2 = smov [#allocation6]  }
0x11bd   : > { %p21185_p7 = scmp.ne.s32.totalorder %s17050_s19, %s21184_s1  ;;  %s21188_s21 = sshll.u32 %s21291_s2, 4  ;;  %s21189_s21 = int_to_ptr.vmem [resolvable:$false] %s21188_s21 }
0x11be   : > { %s21190_s13 = scalar_lea.vmem %s21189_s21, 256  ;;  %p21191_p10 = scmp.lt.s32.totalorder %s17050_s19, %s21189_s21 }
0x11bf   : > { %p21186_p8 = pnand %p21185_p7, %p21378_p5  ;;  %p21192_p11 = scmp.lt.s32.totalorder %s21190_s13, %s21184_s1 }
0x11c1   : > { %p21187_p9 = pneg %p21186_p8  ;;  %p21193_p12 = por %p21192_p11, %p21191_p10 }
0x11c3   : > { %p21194_p13 = pnand %p21193_p12, %p21187_p9 }
0x11c5   : > { %21197 = shalt.err (!%p21194_p13)
}
0x11c6   : > { %s21198_s22 = scalar_lea.hbm %s23011_s10, 128  ;;  %s21202_s26 = scalar_lea.hbm %s23119_s7, 512 }
0x11c7   : > { %p21199_p0 = scmp.ne.s32.totalorder %s23011_s10, %s21198_s22  ;;  %p21203_p3 = scmp.lt.u32.totalorder %s23011_s10, %s23119_s7 }
0x11c8   : > { %p21204_p4 = scmp.lt.u32.totalorder %s21202_s26, %s21198_s22  ;;  %p21206_p8 = scmp.lt.u32.totalorder %s21198_s22, %s23011_s10 }
0x11c9   : > { %p21200_p1 = pnand %p21199_p0, %p21378_p5 }
0x11ca   : > { %p21205_p7 = por %p21204_p4, %p21203_p3 }
0x11cb   : > { %p21201_p2 = pneg %p21200_p1 }
0x11cc   : > { %p21207_p9 = por %p21206_p8, %p21205_p7 }
0x11ce   : > { %p21208_p10 = pnand %p21207_p9, %p21201_p2 }
0x11d0   : > { %21211 = shalt.err (!%p21208_p10)
}
0x11d1   : > { %21064 = dma.vmem_to_hbm [thread:$0]  (%p21378_p5), %s17050_s19, 128, %s23011_s10, %s22981_s9  }
0x11d2   : > { %s337_s24 = scalar_lea.vmem [#allocation7], %s22121_s18  ;;  %s23066_s13 = scalar_lea.hbm %s23120_s8, %s22963_s12 }
0x11d3   : > { %s17062_s1 = sshll.u32 %s337_s24, 4  ;;  %s17010_s22 = scalar_lea.sflag [#allocation8], %s22118_s17  ;;  %s23068_s1 = int_to_ptr.vmem [resolvable:$true] %s17062_s1 }
0x11d4   : > { %s21212_s9 = scalar_lea.vmem %s23068_s1, 128  ;;  %s21292_s18 = smov [#allocation7]  }
0x11d5   : > { %p21213_p11 = scmp.ne.s32.totalorder %s23068_s1, %s21212_s9  ;;  %s21216_s10 = sshll.u32 %s21292_s18, 4  ;;  %s21217_s10 = int_to_ptr.vmem [resolvable:$false] %s21216_s10 }
0x11d6   : > { %s21218_s19 = scalar_lea.vmem %s21217_s10, 256  ;;  %p21219_p0 = scmp.lt.s32.totalorder %s23068_s1, %s21217_s10 }
0x11d7   : > { %p21214_p12 = pnand %p21213_p11, %p21378_p5  ;;  %p21220_p1 = scmp.lt.s32.totalorder %s21218_s19, %s21212_s9 }
0x11d9   : > { %p21215_p13 = pneg %p21214_p12  ;;  %p21221_p2 = por %p21220_p1, %p21219_p0 }
0x11db   : > { %p21222_p3 = pnand %p21221_p2, %p21215_p13 }
0x1268   : > { %v16984_v0 = vpop.f32.mrb[20].mxu0 }
0x1269   : > { %v16989_v19 = vmul.f32 %v16984_v0, %v22317_v47  ;;  %v19924_v27 = vpop.f32.mrb[21].mxu0 }
0x126b   : > { %16993 = vst.msk [vmem:[%s337_s24] sm:$0xff] %vm1249_vm2, %v16989_v19 }
0x126c   : > { %21225 = shalt.err (!%p21222_p3)
}
0x126d   : > { %s21226_s17 = scalar_lea.hbm %s23066_s13, 128  ;;  %s21230_s20 = scalar_lea.hbm %s23120_s8, 512 }
0x126e   : > { %p21227_p4 = scmp.ne.s32.totalorder %s23066_s13, %s21226_s17  ;;  %p21231_p9 = scmp.lt.u32.totalorder %s23066_s13, %s23120_s8 }
0x126f   : > { %p21232_p10 = scmp.lt.u32.totalorder %s21230_s20, %s21226_s17  ;;  %p21234_p12 = scmp.lt.u32.totalorder %s21226_s17, %s23066_s13 }
0x1270   : > { %p21228_p7 = pnand %p21227_p4, %p21378_p5 }
0x1271   : > { %p21233_p11 = por %p21232_p10, %p21231_p9 }
0x1272   : > { %p21229_p8 = pneg %p21228_p7 }
0x1273   : > { %p21235_p13 = por %p21234_p12, %p21233_p11 }
0x1275   : > { %p21236_p0 = pnand %p21235_p13, %p21229_p8 }
0x1277   : > { %21239 = shalt.err (!%p21236_p0)
}
0x1278   : > { %21065 = dma.vmem_to_hbm [thread:$0]  (%p21378_p5), %s23068_s1, 128, %s23066_s13, %s17010_s22  }
0x1279 PF: > { %p21083_p1 = scmp.ge.s32.totalorder %s21282_s30, 2  ;;  %s17074_s23 = sand.u32 1, %s21270_s27  }
0x127a   : > { %s17075_s24 = scalar_lea.sflag [#allocation3], %s17074_s23 }
0x127b   : > { %p21071_p2 = pnand %p21083_p1, %p21382_p6 }
0x127d   : > { %21257 = dma.done.wait (!%p21071_p2), %s17075_s24, 128  }
0x127e   : > { %21259 = vsyncadd (!%p21071_p2), %s17075_s24, 4294967168  ;;  %s23134_s2 = sadd.s32 4294967294, %s21282_s30  }
0x127f   : > { %s17083_s21 = sand.u32 1, %s23134_s2  }
0x1280   : > { %s17084_s9 = scalar_lea.sflag [#allocation5], %s17083_s21 }
0x1281   : > { %21261 = dma.done.wait (!%p21071_p2), %s17084_s9, 256  }
0x1282   : > { %21263 = vsyncadd (!%p21071_p2), %s17084_s9, 4294967040  ;;  %s17102_s15 = scalar_lea.sflag [#allocation8], %s17074_s23 }
0x1283   : > { %21265 = dma.done.wait (!%p21071_p2), %s17102_s15, 128  }
0x1284   : > { %21267 = vsyncadd (!%p21071_p2), %s17102_s15, 4294967168  ;;  %p25_p5 = scmp.ge.s32.totalorder %s21363_s11, 6   ;;  %s23135_s27 = smov %s21274_s28 }
0x1285   : > { %s23136_s28 = smov %s21278_s29  ;;  %s23137_s29 = smov %s21376_s14 }
0x1286   : > { %s23138_s30 = smov %s21363_s11  ;;  %27 = sbr.rel (!%p25_p5) target bundleno = 11 (0xb), region = 145 }
0x128d   :  { %17107 = vsyncpa [#allocation3], 1 }
0x128e   :  { %17109 = vsyncpa [#allocation3 + $0x1], 1 }
0x128f   :  { %17110 = vsyncpa [#allocation5], 1 }
0x1290   :  { %17112 = vsyncpa [#allocation5 + $0x1], 1 }
0x1291   :  { %17113 = vsyncpa [#allocation8], 1 }
0x1292   :  { %17115 = vsyncpa [#allocation8 + $0x1], 1 }

</bundles_post_ra>
